<compile_context>
chip_gen: v7x
topology: tpu7x:2x2x1
jax: 0.10.0
libtpu: 0.0.40
codegen_flags: <defaults>
</compile_context>

<pallas_src>
import functools

import jax
import jax.numpy as jnp
import numpy as np
from jax.experimental import pallas as pl
from jax.experimental.pallas import tpu as pltpu


def _layer_norm(v, g, b, eps=1e-5):
    mu = jnp.mean(v, axis=-1, keepdims=True)
    var = jnp.mean((v - mu) ** 2, axis=-1, keepdims=True)
    return (v - mu) * jax.lax.rsqrt(var + eps) * g + b


def dual_encoder_kernel(x_ref, y_ref, mask_ref,
                        wqk_ref, wv_ref, wo_ref,
                        g1_ref, be1_ref, g2_ref, be2_ref,
                        w1_ref, b1_ref, w2_ref, b2_ref,
                        o_ref, ctx_ref, *, n_splits, use_leakyrelu):
    f32 = jnp.float32
    bf16 = jnp.bfloat16

    x = x_ref[0]                         # (S, H) f32
    y = y_ref[0]                         # (S, H) f32
    masked = mask_ref[0] != 0            # (S, S) bool, True => masked out

    S, H = x.shape
    dk = H // n_splits
    scale = 1.0 / float(dk) ** 0.5
    # torch: masked_fill(-1e8) happens BEFORE the /sqrt(dk) divide; the scale
    # is folded into Wq on the host, so the equivalent fill value is -1e8*scale.
    neg_fill = jnp.float32(-1e8 * scale)

    wqk = wqk_ref[...]                   # (H, 2H) bf16 == [Wq^T * scale | Wk^T]
    wv = wv_ref[...]                     # (H, H)  bf16
    wo = wo_ref[...]                     # (H, H)  bf16

    def attention(q, k, v):
        """Per-head attention; contexts land in ctx_ref, then ONE Wo matmul."""
        # TODO(synk): once dk is 128-aligned, switch to lax.fori_loop with
        #   pl.ds(pl.multiple_of(h*dk, 128), dk) slices to bound vreg live
        #   ranges instead of the fully-unrolled Python loop.
        for h in range(n_splits):
            sl = slice(h * dk, (h + 1) * dk)
            # QK^T without materializing a transpose of K.
            s = jax.lax.dot_general(q[:, sl].astype(bf16), k[:, sl].astype(bf16),
                                    (((1,), (1,)), ((), ())),
                                    preferred_element_type=f32)      # (S, S)
            s = jnp.where(masked, neg_fill, s)
            s = s - jnp.max(s, axis=-1, keepdims=True)
            e = jnp.exp(s)
            p = e * pl.reciprocal(jnp.sum(e, axis=-1, keepdims=True),
                                  approx=True)
            ctx_ref[:, sl] = jnp.dot(p.astype(bf16), v[:, sl].astype(bf16),
                                     preferred_element_type=f32).astype(bf16)
        # Single K=H output projection (fills the MXU contraction depth).
        return jnp.dot(ctx_ref[...], wo, preferred_element_type=f32)  # (S, H)

    # ---- dual attention (shared attn weights, shared attn_norm) ----
    # Batched LN + batched QK projection over stacked [x; y].
    xy = jnp.concatenate([x, y], axis=0)                              # (2S, H)
    zxy = _layer_norm(xy, g1_ref[...], be1_ref[...])
    qk = jnp.dot(zxy.astype(bf16), wqk, preferred_element_type=f32)   # (2S, 2H)

    q_x, k_x = qk[:S, :H], qk[:S, H:]
    q_y, k_y = qk[S:, :H], qk[S:, H:]

    v_y = jnp.dot(zxy[S:].astype(bf16), wv, preferred_element_type=f32)
    z_y = y + attention(q_y, k_y, v_y)   # self-attention branch on y

    v_2 = jnp.dot(z_y.astype(bf16), wv, preferred_element_type=f32)
    z = x + attention(q_x, k_x, v_2)     # Q,K from norm(x); V from updated z_y

    # ---- pre-LN FFN + residual ----
    z2 = _layer_norm(z, g2_ref[...], be2_ref[...])
    h1 = jnp.dot(z2.astype(bf16), w1_ref[...],
                 preferred_element_type=f32) + b1_ref[...]
    if use_leakyrelu:
        a = jnp.where(h1 >= 0, h1, 0.01 * h1)                    # LeakyReLU(0.01)
    else:
        # Exact erf GELU to match nn.GELU() default.
        # TODO(synk): tanh-approx GELU runs on the EUP slot and is cheaper if
        #   the small accuracy delta is acceptable.
        a = 0.5 * h1 * (1.0 + jax.lax.erf(h1 * 0.7071067811865476))
    h2 = jnp.dot(a.astype(bf16), w2_ref[...],
                 preferred_element_type=f32) + b2_ref[...]

    o_ref[0] = z + h2


def dual_encoder_block(x, y, mask_bool, params, *, n_splits, use_leakyrelu):
    B, S, H = x.shape
    H4 = 4 * H
    dk = H // n_splits
    scale = 1.0 / float(dk) ** 0.5

    # int8 mask (4x smaller DMA than int32); weights cast to bf16 for the MXU.
    # TODO(synk): when the mask is batch-invariant / structural, drop the batch
    #   dim (index_map -> (0,0,0)) or build it in-kernel from broadcasted_iota.
    mask_i8 = mask_bool.astype(jnp.int8)
    # Fold 1/sqrt(dk) into Wq in f32 BEFORE the bf16 cast.
    wqk = jnp.concatenate([params["wq_t"] * scale, params["wk_t"]],
                          axis=1).astype(jnp.bfloat16)
    wv = params["wv_t"].astype(jnp.bfloat16)
    wo = params["wo_t"].astype(jnp.bfloat16)
    w1 = params["w1_t"].astype(jnp.bfloat16)
    w2 = params["w2_t"].astype(jnp.bfloat16)

    kernel = functools.partial(dual_encoder_kernel,
                               n_splits=n_splits, use_leakyrelu=use_leakyrelu)

    def build(single_buffer_consts):
        if single_buffer_consts:
            # Constant-index weight blocks never change: single-buffer them so
            # they don't reserve 2x their VMEM footprint.
            const = lambda shape: pl.BlockSpec(shape, lambda b: (0,) * len(shape),
                                               pipeline_mode=pl.Buffered(1))
        else:
            const = lambda shape: pl.BlockSpec(shape, lambda b: (0,) * len(shape))
        return pl.pallas_call(
            kernel,
            out_shape=jax.ShapeDtypeStruct((B, S, H), jnp.float32),
            grid=(B,),
            in_specs=[
                pl.BlockSpec((1, S, H), lambda b: (b, 0, 0)),   # x
                pl.BlockSpec((1, S, H), lambda b: (b, 0, 0)),   # y
                pl.BlockSpec((1, S, S), lambda b: (b, 0, 0)),   # mask (int8)
                const((H, 2 * H)),   # [Wq^T*scale | Wk^T]  bf16
                const((H, H)),       # Wv^T                 bf16
                const((H, H)),       # Wo^T                 bf16
                const((1, H)),       # attn_norm gamma
                const((1, H)),       # attn_norm beta
                const((1, H)),       # fc_norm gamma
                const((1, H)),       # fc_norm beta
                const((H, H4)),      # fc W1^T              bf16
                const((1, H4)),      # fc b1
                const((H4, H)),      # fc W2^T              bf16
                const((1, H)),       # fc b2
            ],
            out_specs=pl.BlockSpec((1, S, H), lambda b: (b, 0, 0)),
            scratch_shapes=[pltpu.VMEM((S, H), jnp.bfloat16)],   # head contexts
            compiler_params=pltpu.CompilerParams(
                dimension_semantics=("parallel",),
                # Above the 16/32 MiB default scoped limit; tune per generation
                # (<=128 MiB on v5e/v6e, <=64 MiB physical on v7x).
                vmem_limit_bytes=64 * 1024 * 1024),
        )

    args = (x, y, mask_i8, wqk, wv, wo,
            params["g1"], params["be1"], params["g2"], params["be2"],
            w1, params["b1"], w2, params["b2"])
    try:
        out = build(True)(*args)
    except Exception:
        # Fallback for jax builds without BlockSpec pipeline_mode / Buffered(1).
        out = build(False)(*args)

    # The torch module returns (z, mask); mask is passed through unchanged.
    return out, mask_bool


def ref_forward(x, y, mask_bool, p, *, n_splits, use_leakyrelu):
    """Pure-JAX f32 reference mirroring the PyTorch module (eval mode)."""
    def ln(v, g, b):
        mu = jnp.mean(v, axis=-1, keepdims=True)
        var = jnp.mean((v - mu) ** 2, axis=-1, keepdims=True)
        return (v - mu) / jnp.sqrt(var + 1e-5) * g + b

    B, S, H = x.shape
    dk = H // n_splits

    def mha(q_in, k_in, v_in):
        Q = q_in @ p["wq_t"]
        K = k_in @ p["wk_t"]
        V = v_in @ p["wv_t"]
        Qh = jnp.concatenate(jnp.split(Q, n_splits, axis=-1), axis=0)
        Kh = jnp.concatenate(jnp.split(K, n_splits, axis=-1), axis=0)
        Vh = jnp.concatenate(jnp.split(V, n_splits, axis=-1), axis=0)
        Mh = jnp.concatenate([mask_bool] * n_splits, axis=0)
        w = jnp.einsum("bqd,bkd->bqk", Qh, Kh)
        w = jnp.where(Mh, -1e8, w)
        w = jax.nn.softmax(w / dk ** 0.5, axis=-1)
        c = jnp.einsum("bqk,bkd->bqd", w, Vh)
        c = jnp.concatenate(jnp.split(c, n_splits, axis=0), axis=-1)
        return c @ p["wo_t"]

    zx = ln(x, p["g1"], p["be1"])
    zy = ln(y, p["g1"], p["be1"])
    z_y = y + mha(zy, zy, zy)
    z = x + mha(zx, zx, z_y)
    z2 = ln(z, p["g2"], p["be2"])
    h1 = z2 @ p["w1_t"] + p["b1"]
    if use_leakyrelu:
        a = jnp.where(h1 >= 0, h1, 0.01 * h1)
    else:
        a = 0.5 * h1 * (1.0 + jax.lax.erf(h1 / jnp.sqrt(2.0)))
    h2 = a @ p["w2_t"] + p["b2"]
    return z + h2, mask_bool


if __name__ == "__main__":
    B, S, H, n_splits = 2, 8, 32, 4
    use_leakyrelu = True
    H4 = 4 * H

    key = jax.random.PRNGKey(0)
    ks = jax.random.split(key, 14)
    init = lambda k, shape: (0.05 * jax.random.normal(k, shape)).astype(jnp.float32)

    params = {
        "wq_t": init(ks[0], (H, H)),
        "wk_t": init(ks[1], (H, H)),
        "wv_t": init(ks[2], (H, H)),
        "wo_t": init(ks[3], (H, H)),
        "g1": jnp.ones((1, H), jnp.float32) + init(ks[4], (1, H)),
        "be1": init(ks[5], (1, H)),
        "g2": jnp.ones((1, H), jnp.float32) + init(ks[6], (1, H)),
        "be2": init(ks[7], (1, H)),
        "w1_t": init(ks[8], (H, H4)),
        "b1": init(ks[9], (1, H4)),
        "w2_t": init(ks[10], (H4, H)),
        "b2": init(ks[11], (1, H)),
    }

    x = jax.random.normal(ks[12], (B, S, H), dtype=jnp.float32)
    y = jax.random.normal(ks[13], (B, S, H), dtype=jnp.float32)
    # causal-style boolean mask: True => masked (filled with -1e8)
    idx = jnp.arange(S)
    mask_bool = jnp.broadcast_to(idx[None, :] > idx[:, None], (B, S, S))

    out, out_mask = dual_encoder_block(x, y, mask_bool, params,
                                       n_splits=n_splits,
                                       use_leakyrelu=use_leakyrelu)
    out = jax.block_until_ready(out)

    ref, _ = ref_forward(x, y, mask_bool, params,
                         n_splits=n_splits, use_leakyrelu=use_leakyrelu)
    # bf16 MXU matmuls with f32 accumulation -> relaxed tolerance vs f32 ref.
    np.testing.assert_allclose(np.asarray(out), np.asarray(ref),
                               rtol=2e-2, atol=2e-2)
    print("KERNEL_OK")
</pallas_src>

<mosaic_0001>
module attributes {stable_mosaic.version = 11 : i64} {
  func.func @dual_encoder_kernel(%arg0: i32, %arg1: memref<1x8x32xf32, #tpu.memory_space<vmem>>, %arg2: memref<1x8x32xf32, #tpu.memory_space<vmem>>, %arg3: memref<1x8x8xi8, #tpu.memory_space<vmem>>, %arg4: memref<32x64xbf16, #tpu.memory_space<vmem>>, %arg5: memref<32x32xbf16, #tpu.memory_space<vmem>>, %arg6: memref<32x32xbf16, #tpu.memory_space<vmem>>, %arg7: memref<1x32xf32, #tpu.memory_space<vmem>>, %arg8: memref<1x32xf32, #tpu.memory_space<vmem>>, %arg9: memref<1x32xf32, #tpu.memory_space<vmem>>, %arg10: memref<1x32xf32, #tpu.memory_space<vmem>>, %arg11: memref<32x128xbf16, #tpu.memory_space<vmem>>, %arg12: memref<1x128xf32, #tpu.memory_space<vmem>>, %arg13: memref<128x32xbf16, #tpu.memory_space<vmem>>, %arg14: memref<1x32xf32, #tpu.memory_space<vmem>>, %arg15: memref<1x8x32xf32, #tpu.memory_space<vmem>>, %arg16: memref<8x32xbf16, #tpu.memory_space<vmem>>) attributes {dimension_semantics = [#tpu.dimension_semantics<parallel>], iteration_bounds = array<i64: 2>, scalar_prefetch = 0 : i64, scratch_operands = 1 : i64, tpu.core_type = #tpu.core_type<tc>, window_params = [{transform_indices = @transform_0, window_bounds = array<i64: 1, 8, 32>}, {transform_indices = @transform_1, window_bounds = array<i64: 1, 8, 32>}, {transform_indices = @transform_2, window_bounds = array<i64: 1, 8, 8>}, {pipeline_mode = #tpu.pipeline_mode<synchronous>, transform_indices = @transform_3, window_bounds = array<i64: 32, 64>}, {pipeline_mode = #tpu.pipeline_mode<synchronous>, transform_indices = @transform_4, window_bounds = array<i64: 32, 32>}, {pipeline_mode = #tpu.pipeline_mode<synchronous>, transform_indices = @transform_5, window_bounds = array<i64: 32, 32>}, {pipeline_mode = #tpu.pipeline_mode<synchronous>, transform_indices = @transform_6, window_bounds = array<i64: 1, 32>}, {pipeline_mode = #tpu.pipeline_mode<synchronous>, transform_indices = @transform_7, window_bounds = array<i64: 1, 32>}, {pipeline_mode = #tpu.pipeline_mode<synchronous>, transform_indices = @transform_8, window_bounds = array<i64: 1, 32>}, {pipeline_mode = #tpu.pipeline_mode<synchronous>, transform_indices = @transform_9, window_bounds = array<i64: 1, 32>}, {pipeline_mode = #tpu.pipeline_mode<synchronous>, transform_indices = @transform_10, window_bounds = array<i64: 32, 128>}, {pipeline_mode = #tpu.pipeline_mode<synchronous>, transform_indices = @transform_11, window_bounds = array<i64: 1, 128>}, {pipeline_mode = #tpu.pipeline_mode<synchronous>, transform_indices = @transform_12, window_bounds = array<i64: 128, 32>}, {pipeline_mode = #tpu.pipeline_mode<synchronous>, transform_indices = @transform_13, window_bounds = array<i64: 1, 32>}, {transform_indices = @transform_14, window_bounds = array<i64: 1, 8, 32>}]} {
    %c0 = arith.constant 0 : index
    %c0_0 = arith.constant 0 : index
    %c0_1 = arith.constant 0 : index
    %0 = vector.load %arg1[%c0, %c0_0, %c0_1] : memref<1x8x32xf32, #tpu.memory_space<vmem>>, vector<1x8x32xf32>
    %1 = vector.shape_cast %0 : vector<1x8x32xf32> to vector<8x32xf32>
    %c0_2 = arith.constant 0 : index
    %c0_3 = arith.constant 0 : index
    %c0_4 = arith.constant 0 : index
    %2 = vector.load %arg2[%c0_2, %c0_3, %c0_4] : memref<1x8x32xf32, #tpu.memory_space<vmem>>, vector<1x8x32xf32>
    %3 = vector.shape_cast %2 : vector<1x8x32xf32> to vector<8x32xf32>
    %c0_5 = arith.constant 0 : index
    %c0_6 = arith.constant 0 : index
    %c0_7 = arith.constant 0 : index
    %4 = vector.load %arg3[%c0_5, %c0_6, %c0_7] : memref<1x8x8xi8, #tpu.memory_space<vmem>>, vector<1x8x8xi8>
    %5 = vector.shape_cast %4 : vector<1x8x8xi8> to vector<8x8xi8>
    %c0_i8 = arith.constant 0 : i8
    %6 = vector.broadcast %c0_i8 : i8 to vector<8x8xi8>
    %7 = arith.cmpi ne, %5, %6 : vector<8x8xi8>
    %c0_8 = arith.constant 0 : index
    %c0_9 = arith.constant 0 : index
    %8 = vector.load %arg4[%c0_8, %c0_9] : memref<32x64xbf16, #tpu.memory_space<vmem>>, vector<32x64xbf16>
    %c0_10 = arith.constant 0 : index
    %c0_11 = arith.constant 0 : index
    %9 = vector.load %arg5[%c0_10, %c0_11] : memref<32x32xbf16, #tpu.memory_space<vmem>>, vector<32x32xbf16>
    %c0_12 = arith.constant 0 : index
    %c0_13 = arith.constant 0 : index
    %10 = vector.load %arg6[%c0_12, %c0_13] : memref<32x32xbf16, #tpu.memory_space<vmem>>, vector<32x32xbf16>
    %11 = tpu.concatenate %1, %3 in 0 : vector<8x32xf32>, vector<8x32xf32> -> vector<16x32xf32>
    %c0_14 = arith.constant 0 : index
    %c0_15 = arith.constant 0 : index
    %12 = vector.load %arg7[%c0_14, %c0_15] : memref<1x32xf32, #tpu.memory_space<vmem>>, vector<1x32xf32>
    %c0_16 = arith.constant 0 : index
    %c0_17 = arith.constant 0 : index
    %13 = vector.load %arg8[%c0_16, %c0_17] : memref<1x32xf32, #tpu.memory_space<vmem>>, vector<1x32xf32>
    %cst = arith.constant dense<0.000000e+00> : vector<16xf32>
    %14 = vector.multi_reduction <add>, %11, %cst [1] : vector<16x32xf32> to vector<16xf32>
    %15 = vector.shape_cast %14 : vector<16xf32> to vector<16x1xf32>
    %cst_18 = arith.constant 3.200000e+01 : f32
    %16 = vector.broadcast %cst_18 : f32 to vector<16x1xf32>
    %17 = arith.divf %15, %16 : vector<16x1xf32>
    %18 = vector.broadcast %17 : vector<16x1xf32> to vector<16x32xf32>
    %19 = arith.subf %11, %18 : vector<16x32xf32>
    %20 = arith.mulf %19, %19 : vector<16x32xf32>
    %cst_19 = arith.constant dense<0.000000e+00> : vector<16xf32>
    %21 = vector.multi_reduction <add>, %20, %cst_19 [1] : vector<16x32xf32> to vector<16xf32>
    %22 = vector.shape_cast %21 : vector<16xf32> to vector<16x1xf32>
    %cst_20 = arith.constant 3.200000e+01 : f32
    %23 = vector.broadcast %cst_20 : f32 to vector<16x1xf32>
    %24 = arith.divf %22, %23 : vector<16x1xf32>
    %25 = vector.broadcast %17 : vector<16x1xf32> to vector<16x32xf32>
    %26 = arith.subf %11, %25 : vector<16x32xf32>
    %cst_21 = arith.constant 9.99999974E-6 : f32
    %27 = vector.broadcast %cst_21 : f32 to vector<16x1xf32>
    %28 = arith.addf %24, %27 : vector<16x1xf32>
    %29 = math.rsqrt %28 : vector<16x1xf32>
    %30 = vector.broadcast %29 : vector<16x1xf32> to vector<16x32xf32>
    %31 = arith.mulf %26, %30 : vector<16x32xf32>
    %32 = vector.broadcast %12 : vector<1x32xf32> to vector<16x32xf32>
    %33 = arith.mulf %31, %32 : vector<16x32xf32>
    %34 = vector.broadcast %13 : vector<1x32xf32> to vector<16x32xf32>
    %35 = arith.addf %33, %34 : vector<16x32xf32>
    %36 = arith.truncf %35 : vector<16x32xf32> to vector<16x32xbf16>
    %cst_22 = arith.constant dense<0.000000e+00> : vector<16x64xf32>
    %37 = tpu.matmul %36, %8, %cst_22 {dimension_numbers = #tpu.dot_dimension_numbers<[1], [0], [0], [1], [0, 0, 1, 1], [], []>} : vector<16x32xbf16>, vector<32x64xbf16>, vector<16x64xf32> -> vector<16x64xf32>
    %38 = vector.extract_strided_slice %37 {offsets = [0, 0], sizes = [8, 32], strides = [1, 1]} : vector<16x64xf32> to vector<8x32xf32>
    %39 = vector.extract_strided_slice %37 {offsets = [0, 32], sizes = [8, 32], strides = [1, 1]} : vector<16x64xf32> to vector<8x32xf32>
    %40 = vector.extract_strided_slice %37 {offsets = [8, 0], sizes = [8, 32], strides = [1, 1]} : vector<16x64xf32> to vector<8x32xf32>
    %41 = vector.extract_strided_slice %37 {offsets = [8, 32], sizes = [8, 32], strides = [1, 1]} : vector<16x64xf32> to vector<8x32xf32>
    %42 = vector.extract_strided_slice %35 {offsets = [8, 0], sizes = [8, 32], strides = [1, 1]} : vector<16x32xf32> to vector<8x32xf32>
    %43 = arith.truncf %42 : vector<8x32xf32> to vector<8x32xbf16>
    %cst_23 = arith.constant dense<0.000000e+00> : vector<8x32xf32>
    %44 = tpu.matmul %43, %9, %cst_23 {dimension_numbers = #tpu.dot_dimension_numbers<[1], [0], [0], [1], [0, 0, 1, 1], [], []>} : vector<8x32xbf16>, vector<32x32xbf16>, vector<8x32xf32> -> vector<8x32xf32>
    %45 = vector.extract_strided_slice %40 {offsets = [0, 0], sizes = [8, 8], strides = [1, 1]} : vector<8x32xf32> to vector<8x8xf32>
    %46 = arith.truncf %45 : vector<8x8xf32> to vector<8x8xbf16>
    %47 = vector.extract_strided_slice %41 {offsets = [0, 0], sizes = [8, 8], strides = [1, 1]} : vector<8x32xf32> to vector<8x8xf32>
    %48 = arith.truncf %47 : vector<8x8xf32> to vector<8x8xbf16>
    %cst_24 = arith.constant dense<0.000000e+00> : vector<8x8xf32>
    %49 = tpu.matmul %46, %48, %cst_24 {dimension_numbers = #tpu.dot_dimension_numbers<[1], [1], [0], [0], [0, 0, 1, 0], [], []>} : vector<8x8xbf16>, vector<8x8xbf16>, vector<8x8xf32> -> vector<8x8xf32>
    %cst_25 = arith.constant 0xCC06DEB3 : f32
    %50 = vector.broadcast %cst_25 : f32 to vector<8x8xf32>
    %51 = arith.select %7, %50, %49 : vector<8x8xi1>, vector<8x8xf32>
    %cst_26 = arith.constant dense<0xFF800000> : vector<8xf32>
    %52 = vector.multi_reduction <maximumf>, %51, %cst_26 [1] : vector<8x8xf32> to vector<8xf32>
    %53 = vector.shape_cast %52 : vector<8xf32> to vector<8x1xf32>
    %54 = vector.broadcast %53 : vector<8x1xf32> to vector<8x8xf32>
    %55 = arith.subf %51, %54 : vector<8x8xf32>
    %56 = math.exp %55 : vector<8x8xf32>
    %cst_27 = arith.constant dense<0.000000e+00> : vector<8xf32>
    %57 = vector.multi_reduction <add>, %56, %cst_27 [1] : vector<8x8xf32> to vector<8xf32>
    %58 = vector.shape_cast %57 : vector<8xf32> to vector<8x1xf32>
    %59 = tpu.reciprocal %58 {approx = true} : vector<8x1xf32> -> vector<8x1xf32>
    %60 = vector.broadcast %59 : vector<8x1xf32> to vector<8x8xf32>
    %61 = arith.mulf %56, %60 : vector<8x8xf32>
    %62 = arith.truncf %61 : vector<8x8xf32> to vector<8x8xbf16>
    %63 = vector.extract_strided_slice %44 {offsets = [0, 0], sizes = [8, 8], strides = [1, 1]} : vector<8x32xf32> to vector<8x8xf32>
    %64 = arith.truncf %63 : vector<8x8xf32> to vector<8x8xbf16>
    %cst_28 = arith.constant dense<0.000000e+00> : vector<8x8xf32>
    %65 = tpu.matmul %62, %64, %cst_28 {dimension_numbers = #tpu.dot_dimension_numbers<[1], [0], [0], [1], [0, 0, 1, 1], [], []>} : vector<8x8xbf16>, vector<8x8xbf16>, vector<8x8xf32> -> vector<8x8xf32>
    %66 = arith.truncf %65 : vector<8x8xf32> to vector<8x8xbf16>
    %c0_29 = arith.constant 0 : index
    %c0_30 = arith.constant 0 : index
    %67 = vector.load %arg16[%c0_29, %c0_30] : memref<8x32xbf16, #tpu.memory_space<vmem>>, vector<8x8xbf16>
    tpu.vector_store %arg16[%c0_29, %c0_30], %66 {strides = array<i32>} : memref<8x32xbf16, #tpu.memory_space<vmem>>, vector<8x8xbf16>,
    %68 = vector.extract_strided_slice %40 {offsets = [0, 8], sizes = [8, 8], strides = [1, 1]} : vector<8x32xf32> to vector<8x8xf32>
    %69 = arith.truncf %68 : vector<8x8xf32> to vector<8x8xbf16>
    %70 = vector.extract_strided_slice %41 {offsets = [0, 8], sizes = [8, 8], strides = [1, 1]} : vector<8x32xf32> to vector<8x8xf32>
    %71 = arith.truncf %70 : vector<8x8xf32> to vector<8x8xbf16>
    %cst_31 = arith.constant dense<0.000000e+00> : vector<8x8xf32>
    %72 = tpu.matmul %69, %71, %cst_31 {dimension_numbers = #tpu.dot_dimension_numbers<[1], [1], [0], [0], [0, 0, 1, 0], [], []>} : vector<8x8xbf16>, vector<8x8xbf16>, vector<8x8xf32> -> vector<8x8xf32>
    %cst_32 = arith.constant 0xCC06DEB3 : f32
    %73 = vector.broadcast %cst_32 : f32 to vector<8x8xf32>
    %74 = arith.select %7, %73, %72 : vector<8x8xi1>, vector<8x8xf32>
    %cst_33 = arith.constant dense<0xFF800000> : vector<8xf32>
    %75 = vector.multi_reduction <maximumf>, %74, %cst_33 [1] : vector<8x8xf32> to vector<8xf32>
    %76 = vector.shape_cast %75 : vector<8xf32> to vector<8x1xf32>
    %77 = vector.broadcast %76 : vector<8x1xf32> to vector<8x8xf32>
    %78 = arith.subf %74, %77 : vector<8x8xf32>
    %79 = math.exp %78 : vector<8x8xf32>
    %cst_34 = arith.constant dense<0.000000e+00> : vector<8xf32>
    %80 = vector.multi_reduction <add>, %79, %cst_34 [1] : vector<8x8xf32> to vector<8xf32>
    %81 = vector.shape_cast %80 : vector<8xf32> to vector<8x1xf32>
    %82 = tpu.reciprocal %81 {approx = true} : vector<8x1xf32> -> vector<8x1xf32>
    %83 = vector.broadcast %82 : vector<8x1xf32> to vector<8x8xf32>
    %84 = arith.mulf %79, %83 : vector<8x8xf32>
    %85 = arith.truncf %84 : vector<8x8xf32> to vector<8x8xbf16>
    %86 = vector.extract_strided_slice %44 {offsets = [0, 8], sizes = [8, 8], strides = [1, 1]} : vector<8x32xf32> to vector<8x8xf32>
    %87 = arith.truncf %86 : vector<8x8xf32> to vector<8x8xbf16>
    %cst_35 = arith.constant dense<0.000000e+00> : vector<8x8xf32>
    %88 = tpu.matmul %85, %87, %cst_35 {dimension_numbers = #tpu.dot_dimension_numbers<[1], [0], [0], [1], [0, 0, 1, 1], [], []>} : vector<8x8xbf16>, vector<8x8xbf16>, vector<8x8xf32> -> vector<8x8xf32>
    %89 = arith.truncf %88 : vector<8x8xf32> to vector<8x8xbf16>
    %c0_36 = arith.constant 0 : index
    %c8 = arith.constant 8 : index
    %90 = vector.load %arg16[%c0_36, %c8] : memref<8x32xbf16, #tpu.memory_space<vmem>>, vector<8x8xbf16>
    tpu.vector_store %arg16[%c0_36, %c8], %89 {strides = array<i32>} : memref<8x32xbf16, #tpu.memory_space<vmem>>, vector<8x8xbf16>,
    %91 = vector.extract_strided_slice %40 {offsets = [0, 16], sizes = [8, 8], strides = [1, 1]} : vector<8x32xf32> to vector<8x8xf32>
    %92 = arith.truncf %91 : vector<8x8xf32> to vector<8x8xbf16>
    %93 = vector.extract_strided_slice %41 {offsets = [0, 16], sizes = [8, 8], strides = [1, 1]} : vector<8x32xf32> to vector<8x8xf32>
    %94 = arith.truncf %93 : vector<8x8xf32> to vector<8x8xbf16>
    %cst_37 = arith.constant dense<0.000000e+00> : vector<8x8xf32>
    %95 = tpu.matmul %92, %94, %cst_37 {dimension_numbers = #tpu.dot_dimension_numbers<[1], [1], [0], [0], [0, 0, 1, 0], [], []>} : vector<8x8xbf16>, vector<8x8xbf16>, vector<8x8xf32> -> vector<8x8xf32>
    %cst_38 = arith.constant 0xCC06DEB3 : f32
    %96 = vector.broadcast %cst_38 : f32 to vector<8x8xf32>
    %97 = arith.select %7, %96, %95 : vector<8x8xi1>, vector<8x8xf32>
    %cst_39 = arith.constant dense<0xFF800000> : vector<8xf32>
    %98 = vector.multi_reduction <maximumf>, %97, %cst_39 [1] : vector<8x8xf32> to vector<8xf32>
    %99 = vector.shape_cast %98 : vector<8xf32> to vector<8x1xf32>
    %100 = vector.broadcast %99 : vector<8x1xf32> to vector<8x8xf32>
    %101 = arith.subf %97, %100 : vector<8x8xf32>
    %102 = math.exp %101 : vector<8x8xf32>
    %cst_40 = arith.constant dense<0.000000e+00> : vector<8xf32>
    %103 = vector.multi_reduction <add>, %102, %cst_40 [1] : vector<8x8xf32> to vector<8xf32>
    %104 = vector.shape_cast %103 : vector<8xf32> to vector<8x1xf32>
    %105 = tpu.reciprocal %104 {approx = true} : vector<8x1xf32> -> vector<8x1xf32>
    %106 = vector.broadcast %105 : vector<8x1xf32> to vector<8x8xf32>
    %107 = arith.mulf %102, %106 : vector<8x8xf32>
    %108 = arith.truncf %107 : vector<8x8xf32> to vector<8x8xbf16>
    %109 = vector.extract_strided_slice %44 {offsets = [0, 16], sizes = [8, 8], strides = [1, 1]} : vector<8x32xf32> to vector<8x8xf32>
    %110 = arith.truncf %109 : vector<8x8xf32> to vector<8x8xbf16>
    %cst_41 = arith.constant dense<0.000000e+00> : vector<8x8xf32>
    %111 = tpu.matmul %108, %110, %cst_41 {dimension_numbers = #tpu.dot_dimension_numbers<[1], [0], [0], [1], [0, 0, 1, 1], [], []>} : vector<8x8xbf16>, vector<8x8xbf16>, vector<8x8xf32> -> vector<8x8xf32>
    %112 = arith.truncf %111 : vector<8x8xf32> to vector<8x8xbf16>
    %c0_42 = arith.constant 0 : index
    %c16 = arith.constant 16 : index
    %113 = vector.load %arg16[%c0_42, %c16] : memref<8x32xbf16, #tpu.memory_space<vmem>>, vector<8x8xbf16>
    tpu.vector_store %arg16[%c0_42, %c16], %112 {strides = array<i32>} : memref<8x32xbf16, #tpu.memory_space<vmem>>, vector<8x8xbf16>,
    %114 = vector.extract_strided_slice %40 {offsets = [0, 24], sizes = [8, 8], strides = [1, 1]} : vector<8x32xf32> to vector<8x8xf32>
    %115 = arith.truncf %114 : vector<8x8xf32> to vector<8x8xbf16>
    %116 = vector.extract_strided_slice %41 {offsets = [0, 24], sizes = [8, 8], strides = [1, 1]} : vector<8x32xf32> to vector<8x8xf32>
    %117 = arith.truncf %116 : vector<8x8xf32> to vector<8x8xbf16>
    %cst_43 = arith.constant dense<0.000000e+00> : vector<8x8xf32>
    %118 = tpu.matmul %115, %117, %cst_43 {dimension_numbers = #tpu.dot_dimension_numbers<[1], [1], [0], [0], [0, 0, 1, 0], [], []>} : vector<8x8xbf16>, vector<8x8xbf16>, vector<8x8xf32> -> vector<8x8xf32>
    %cst_44 = arith.constant 0xCC06DEB3 : f32
    %119 = vector.broadcast %cst_44 : f32 to vector<8x8xf32>
    %120 = arith.select %7, %119, %118 : vector<8x8xi1>, vector<8x8xf32>
    %cst_45 = arith.constant dense<0xFF800000> : vector<8xf32>
    %121 = vector.multi_reduction <maximumf>, %120, %cst_45 [1] : vector<8x8xf32> to vector<8xf32>
    %122 = vector.shape_cast %121 : vector<8xf32> to vector<8x1xf32>
    %123 = vector.broadcast %122 : vector<8x1xf32> to vector<8x8xf32>
    %124 = arith.subf %120, %123 : vector<8x8xf32>
    %125 = math.exp %124 : vector<8x8xf32>
    %cst_46 = arith.constant dense<0.000000e+00> : vector<8xf32>
    %126 = vector.multi_reduction <add>, %125, %cst_46 [1] : vector<8x8xf32> to vector<8xf32>
    %127 = vector.shape_cast %126 : vector<8xf32> to vector<8x1xf32>
    %128 = tpu.reciprocal %127 {approx = true} : vector<8x1xf32> -> vector<8x1xf32>
    %129 = vector.broadcast %128 : vector<8x1xf32> to vector<8x8xf32>
    %130 = arith.mulf %125, %129 : vector<8x8xf32>
    %131 = arith.truncf %130 : vector<8x8xf32> to vector<8x8xbf16>
    %132 = vector.extract_strided_slice %44 {offsets = [0, 24], sizes = [8, 8], strides = [1, 1]} : vector<8x32xf32> to vector<8x8xf32>
    %133 = arith.truncf %132 : vector<8x8xf32> to vector<8x8xbf16>
    %cst_47 = arith.constant dense<0.000000e+00> : vector<8x8xf32>
    %134 = tpu.matmul %131, %133, %cst_47 {dimension_numbers = #tpu.dot_dimension_numbers<[1], [0], [0], [1], [0, 0, 1, 1], [], []>} : vector<8x8xbf16>, vector<8x8xbf16>, vector<8x8xf32> -> vector<8x8xf32>
    %135 = arith.truncf %134 : vector<8x8xf32> to vector<8x8xbf16>
    %c0_48 = arith.constant 0 : index
    %c24 = arith.constant 24 : index
    %136 = vector.load %arg16[%c0_48, %c24] : memref<8x32xbf16, #tpu.memory_space<vmem>>, vector<8x8xbf16>
    tpu.vector_store %arg16[%c0_48, %c24], %135 {strides = array<i32>} : memref<8x32xbf16, #tpu.memory_space<vmem>>, vector<8x8xbf16>,
    %c0_49 = arith.constant 0 : index
    %c0_50 = arith.constant 0 : index
    %137 = vector.load %arg16[%c0_49, %c0_50] : memref<8x32xbf16, #tpu.memory_space<vmem>>, vector<8x32xbf16>
    %cst_51 = arith.constant dense<0.000000e+00> : vector<8x32xf32>
    %138 = tpu.matmul %137, %10, %cst_51 {dimension_numbers = #tpu.dot_dimension_numbers<[1], [0], [0], [1], [0, 0, 1, 1], [], []>} : vector<8x32xbf16>, vector<32x32xbf16>, vector<8x32xf32> -> vector<8x32xf32>
    %139 = arith.addf %3, %138 : vector<8x32xf32>
    %140 = arith.truncf %139 : vector<8x32xf32> to vector<8x32xbf16>
    %cst_52 = arith.constant dense<0.000000e+00> : vector<8x32xf32>
    %141 = tpu.matmul %140, %9, %cst_52 {dimension_numbers = #tpu.dot_dimension_numbers<[1], [0], [0], [1], [0, 0, 1, 1], [], []>} : vector<8x32xbf16>, vector<32x32xbf16>, vector<8x32xf32> -> vector<8x32xf32>
    %142 = vector.extract_strided_slice %38 {offsets = [0, 0], sizes = [8, 8], strides = [1, 1]} : vector<8x32xf32> to vector<8x8xf32>
    %143 = arith.truncf %142 : vector<8x8xf32> to vector<8x8xbf16>
    %144 = vector.extract_strided_slice %39 {offsets = [0, 0], sizes = [8, 8], strides = [1, 1]} : vector<8x32xf32> to vector<8x8xf32>
    %145 = arith.truncf %144 : vector<8x8xf32> to vector<8x8xbf16>
    %cst_53 = arith.constant dense<0.000000e+00> : vector<8x8xf32>
    %146 = tpu.matmul %143, %145, %cst_53 {dimension_numbers = #tpu.dot_dimension_numbers<[1], [1], [0], [0], [0, 0, 1, 0], [], []>} : vector<8x8xbf16>, vector<8x8xbf16>, vector<8x8xf32> -> vector<8x8xf32>
    %cst_54 = arith.constant 0xCC06DEB3 : f32
    %147 = vector.broadcast %cst_54 : f32 to vector<8x8xf32>
    %148 = arith.select %7, %147, %146 : vector<8x8xi1>, vector<8x8xf32>
    %cst_55 = arith.constant dense<0xFF800000> : vector<8xf32>
    %149 = vector.multi_reduction <maximumf>, %148, %cst_55 [1] : vector<8x8xf32> to vector<8xf32>
    %150 = vector.shape_cast %149 : vector<8xf32> to vector<8x1xf32>
    %151 = vector.broadcast %150 : vector<8x1xf32> to vector<8x8xf32>
    %152 = arith.subf %148, %151 : vector<8x8xf32>
    %153 = math.exp %152 : vector<8x8xf32>
    %cst_56 = arith.constant dense<0.000000e+00> : vector<8xf32>
    %154 = vector.multi_reduction <add>, %153, %cst_56 [1] : vector<8x8xf32> to vector<8xf32>
    %155 = vector.shape_cast %154 : vector<8xf32> to vector<8x1xf32>
    %156 = tpu.reciprocal %155 {approx = true} : vector<8x1xf32> -> vector<8x1xf32>
    %157 = vector.broadcast %156 : vector<8x1xf32> to vector<8x8xf32>
    %158 = arith.mulf %153, %157 : vector<8x8xf32>
    %159 = arith.truncf %158 : vector<8x8xf32> to vector<8x8xbf16>
    %160 = vector.extract_strided_slice %141 {offsets = [0, 0], sizes = [8, 8], strides = [1, 1]} : vector<8x32xf32> to vector<8x8xf32>
    %161 = arith.truncf %160 : vector<8x8xf32> to vector<8x8xbf16>
    %cst_57 = arith.constant dense<0.000000e+00> : vector<8x8xf32>
    %162 = tpu.matmul %159, %161, %cst_57 {dimension_numbers = #tpu.dot_dimension_numbers<[1], [0], [0], [1], [0, 0, 1, 1], [], []>} : vector<8x8xbf16>, vector<8x8xbf16>, vector<8x8xf32> -> vector<8x8xf32>
    %163 = arith.truncf %162 : vector<8x8xf32> to vector<8x8xbf16>
    %c0_58 = arith.constant 0 : index
    %c0_59 = arith.constant 0 : index
    %164 = vector.load %arg16[%c0_58, %c0_59] : memref<8x32xbf16, #tpu.memory_space<vmem>>, vector<8x8xbf16>
    tpu.vector_store %arg16[%c0_58, %c0_59], %163 {strides = array<i32>} : memref<8x32xbf16, #tpu.memory_space<vmem>>, vector<8x8xbf16>,
    %165 = vector.extract_strided_slice %38 {offsets = [0, 8], sizes = [8, 8], strides = [1, 1]} : vector<8x32xf32> to vector<8x8xf32>
    %166 = arith.truncf %165 : vector<8x8xf32> to vector<8x8xbf16>
    %167 = vector.extract_strided_slice %39 {offsets = [0, 8], sizes = [8, 8], strides = [1, 1]} : vector<8x32xf32> to vector<8x8xf32>
    %168 = arith.truncf %167 : vector<8x8xf32> to vector<8x8xbf16>
    %cst_60 = arith.constant dense<0.000000e+00> : vector<8x8xf32>
    %169 = tpu.matmul %166, %168, %cst_60 {dimension_numbers = #tpu.dot_dimension_numbers<[1], [1], [0], [0], [0, 0, 1, 0], [], []>} : vector<8x8xbf16>, vector<8x8xbf16>, vector<8x8xf32> -> vector<8x8xf32>
    %cst_61 = arith.constant 0xCC06DEB3 : f32
    %170 = vector.broadcast %cst_61 : f32 to vector<8x8xf32>
    %171 = arith.select %7, %170, %169 : vector<8x8xi1>, vector<8x8xf32>
    %cst_62 = arith.constant dense<0xFF800000> : vector<8xf32>
    %172 = vector.multi_reduction <maximumf>, %171, %cst_62 [1] : vector<8x8xf32> to vector<8xf32>
    %173 = vector.shape_cast %172 : vector<8xf32> to vector<8x1xf32>
    %174 = vector.broadcast %173 : vector<8x1xf32> to vector<8x8xf32>
    %175 = arith.subf %171, %174 : vector<8x8xf32>
    %176 = math.exp %175 : vector<8x8xf32>
    %cst_63 = arith.constant dense<0.000000e+00> : vector<8xf32>
    %177 = vector.multi_reduction <add>, %176, %cst_63 [1] : vector<8x8xf32> to vector<8xf32>
    %178 = vector.shape_cast %177 : vector<8xf32> to vector<8x1xf32>
    %179 = tpu.reciprocal %178 {approx = true} : vector<8x1xf32> -> vector<8x1xf32>
    %180 = vector.broadcast %179 : vector<8x1xf32> to vector<8x8xf32>
    %181 = arith.mulf %176, %180 : vector<8x8xf32>
    %182 = arith.truncf %181 : vector<8x8xf32> to vector<8x8xbf16>
    %183 = vector.extract_strided_slice %141 {offsets = [0, 8], sizes = [8, 8], strides = [1, 1]} : vector<8x32xf32> to vector<8x8xf32>
    %184 = arith.truncf %183 : vector<8x8xf32> to vector<8x8xbf16>
    %cst_64 = arith.constant dense<0.000000e+00> : vector<8x8xf32>
    %185 = tpu.matmul %182, %184, %cst_64 {dimension_numbers = #tpu.dot_dimension_numbers<[1], [0], [0], [1], [0, 0, 1, 1], [], []>} : vector<8x8xbf16>, vector<8x8xbf16>, vector<8x8xf32> -> vector<8x8xf32>
    %186 = arith.truncf %185 : vector<8x8xf32> to vector<8x8xbf16>
    %c0_65 = arith.constant 0 : index
    %c8_66 = arith.constant 8 : index
    %187 = vector.load %arg16[%c0_65, %c8_66] : memref<8x32xbf16, #tpu.memory_space<vmem>>, vector<8x8xbf16>
    tpu.vector_store %arg16[%c0_65, %c8_66], %186 {strides = array<i32>} : memref<8x32xbf16, #tpu.memory_space<vmem>>, vector<8x8xbf16>,
    %188 = vector.extract_strided_slice %38 {offsets = [0, 16], sizes = [8, 8], strides = [1, 1]} : vector<8x32xf32> to vector<8x8xf32>
    %189 = arith.truncf %188 : vector<8x8xf32> to vector<8x8xbf16>
    %190 = vector.extract_strided_slice %39 {offsets = [0, 16], sizes = [8, 8], strides = [1, 1]} : vector<8x32xf32> to vector<8x8xf32>
    %191 = arith.truncf %190 : vector<8x8xf32> to vector<8x8xbf16>
    %cst_67 = arith.constant dense<0.000000e+00> : vector<8x8xf32>
    %192 = tpu.matmul %189, %191, %cst_67 {dimension_numbers = #tpu.dot_dimension_numbers<[1], [1], [0], [0], [0, 0, 1, 0], [], []>} : vector<8x8xbf16>, vector<8x8xbf16>, vector<8x8xf32> -> vector<8x8xf32>
    %cst_68 = arith.constant 0xCC06DEB3 : f32
    %193 = vector.broadcast %cst_68 : f32 to vector<8x8xf32>
    %194 = arith.select %7, %193, %192 : vector<8x8xi1>, vector<8x8xf32>
    %cst_69 = arith.constant dense<0xFF800000> : vector<8xf32>
    %195 = vector.multi_reduction <maximumf>, %194, %cst_69 [1] : vector<8x8xf32> to vector<8xf32>
    %196 = vector.shape_cast %195 : vector<8xf32> to vector<8x1xf32>
    %197 = vector.broadcast %196 : vector<8x1xf32> to vector<8x8xf32>
    %198 = arith.subf %194, %197 : vector<8x8xf32>
    %199 = math.exp %198 : vector<8x8xf32>
    %cst_70 = arith.constant dense<0.000000e+00> : vector<8xf32>
    %200 = vector.multi_reduction <add>, %199, %cst_70 [1] : vector<8x8xf32> to vector<8xf32>
    %201 = vector.shape_cast %200 : vector<8xf32> to vector<8x1xf32>
    %202 = tpu.reciprocal %201 {approx = true} : vector<8x1xf32> -> vector<8x1xf32>
    %203 = vector.broadcast %202 : vector<8x1xf32> to vector<8x8xf32>
    %204 = arith.mulf %199, %203 : vector<8x8xf32>
    %205 = arith.truncf %204 : vector<8x8xf32> to vector<8x8xbf16>
    %206 = vector.extract_strided_slice %141 {offsets = [0, 16], sizes = [8, 8], strides = [1, 1]} : vector<8x32xf32> to vector<8x8xf32>
    %207 = arith.truncf %206 : vector<8x8xf32> to vector<8x8xbf16>
    %cst_71 = arith.constant dense<0.000000e+00> : vector<8x8xf32>
    %208 = tpu.matmul %205, %207, %cst_71 {dimension_numbers = #tpu.dot_dimension_numbers<[1], [0], [0], [1], [0, 0, 1, 1], [], []>} : vector<8x8xbf16>, vector<8x8xbf16>, vector<8x8xf32> -> vector<8x8xf32>
    %209 = arith.truncf %208 : vector<8x8xf32> to vector<8x8xbf16>
    %c0_72 = arith.constant 0 : index
    %c16_73 = arith.constant 16 : index
    %210 = vector.load %arg16[%c0_72, %c16_73] : memref<8x32xbf16, #tpu.memory_space<vmem>>, vector<8x8xbf16>
    tpu.vector_store %arg16[%c0_72, %c16_73], %209 {strides = array<i32>} : memref<8x32xbf16, #tpu.memory_space<vmem>>, vector<8x8xbf16>,
    %211 = vector.extract_strided_slice %38 {offsets = [0, 24], sizes = [8, 8], strides = [1, 1]} : vector<8x32xf32> to vector<8x8xf32>
    %212 = arith.truncf %211 : vector<8x8xf32> to vector<8x8xbf16>
    %213 = vector.extract_strided_slice %39 {offsets = [0, 24], sizes = [8, 8], strides = [1, 1]} : vector<8x32xf32> to vector<8x8xf32>
    %214 = arith.truncf %213 : vector<8x8xf32> to vector<8x8xbf16>
    %cst_74 = arith.constant dense<0.000000e+00> : vector<8x8xf32>
    %215 = tpu.matmul %212, %214, %cst_74 {dimension_numbers = #tpu.dot_dimension_numbers<[1], [1], [0], [0], [0, 0, 1, 0], [], []>} : vector<8x8xbf16>, vector<8x8xbf16>, vector<8x8xf32> -> vector<8x8xf32>
    %cst_75 = arith.constant 0xCC06DEB3 : f32
    %216 = vector.broadcast %cst_75 : f32 to vector<8x8xf32>
    %217 = arith.select %7, %216, %215 : vector<8x8xi1>, vector<8x8xf32>
    %cst_76 = arith.constant dense<0xFF800000> : vector<8xf32>
    %218 = vector.multi_reduction <maximumf>, %217, %cst_76 [1] : vector<8x8xf32> to vector<8xf32>
    %219 = vector.shape_cast %218 : vector<8xf32> to vector<8x1xf32>
    %220 = vector.broadcast %219 : vector<8x1xf32> to vector<8x8xf32>
    %221 = arith.subf %217, %220 : vector<8x8xf32>
    %222 = math.exp %221 : vector<8x8xf32>
    %cst_77 = arith.constant dense<0.000000e+00> : vector<8xf32>
    %223 = vector.multi_reduction <add>, %222, %cst_77 [1] : vector<8x8xf32> to vector<8xf32>
    %224 = vector.shape_cast %223 : vector<8xf32> to vector<8x1xf32>
    %225 = tpu.reciprocal %224 {approx = true} : vector<8x1xf32> -> vector<8x1xf32>
    %226 = vector.broadcast %225 : vector<8x1xf32> to vector<8x8xf32>
    %227 = arith.mulf %222, %226 : vector<8x8xf32>
    %228 = arith.truncf %227 : vector<8x8xf32> to vector<8x8xbf16>
    %229 = vector.extract_strided_slice %141 {offsets = [0, 24], sizes = [8, 8], strides = [1, 1]} : vector<8x32xf32> to vector<8x8xf32>
    %230 = arith.truncf %229 : vector<8x8xf32> to vector<8x8xbf16>
    %cst_78 = arith.constant dense<0.000000e+00> : vector<8x8xf32>
    %231 = tpu.matmul %228, %230, %cst_78 {dimension_numbers = #tpu.dot_dimension_numbers<[1], [0], [0], [1], [0, 0, 1, 1], [], []>} : vector<8x8xbf16>, vector<8x8xbf16>, vector<8x8xf32> -> vector<8x8xf32>
    %232 = arith.truncf %231 : vector<8x8xf32> to vector<8x8xbf16>
    %c0_79 = arith.constant 0 : index
    %c24_80 = arith.constant 24 : index
    %233 = vector.load %arg16[%c0_79, %c24_80] : memref<8x32xbf16, #tpu.memory_space<vmem>>, vector<8x8xbf16>
    tpu.vector_store %arg16[%c0_79, %c24_80], %232 {strides = array<i32>} : memref<8x32xbf16, #tpu.memory_space<vmem>>, vector<8x8xbf16>,
    %c0_81 = arith.constant 0 : index
    %c0_82 = arith.constant 0 : index
    %234 = vector.load %arg16[%c0_81, %c0_82] : memref<8x32xbf16, #tpu.memory_space<vmem>>, vector<8x32xbf16>
    %cst_83 = arith.constant dense<0.000000e+00> : vector<8x32xf32>
    %235 = tpu.matmul %234, %10, %cst_83 {dimension_numbers = #tpu.dot_dimension_numbers<[1], [0], [0], [1], [0, 0, 1, 1], [], []>} : vector<8x32xbf16>, vector<32x32xbf16>, vector<8x32xf32> -> vector<8x32xf32>
    %236 = arith.addf %1, %235 : vector<8x32xf32>
    %c0_84 = arith.constant 0 : index
    %c0_85 = arith.constant 0 : index
    %237 = vector.load %arg9[%c0_84, %c0_85] : memref<1x32xf32, #tpu.memory_space<vmem>>, vector<1x32xf32>
    %c0_86 = arith.constant 0 : index
    %c0_87 = arith.constant 0 : index
    %238 = vector.load %arg10[%c0_86, %c0_87] : memref<1x32xf32, #tpu.memory_space<vmem>>, vector<1x32xf32>
    %cst_88 = arith.constant dense<0.000000e+00> : vector<8xf32>
    %239 = vector.multi_reduction <add>, %236, %cst_88 [1] : vector<8x32xf32> to vector<8xf32>
    %240 = vector.shape_cast %239 : vector<8xf32> to vector<8x1xf32>
    %cst_89 = arith.constant 3.200000e+01 : f32
    %241 = vector.broadcast %cst_89 : f32 to vector<8x1xf32>
    %242 = arith.divf %240, %241 : vector<8x1xf32>
    %243 = vector.broadcast %242 : vector<8x1xf32> to vector<8x32xf32>
    %244 = arith.subf %236, %243 : vector<8x32xf32>
    %245 = arith.mulf %244, %244 : vector<8x32xf32>
    %cst_90 = arith.constant dense<0.000000e+00> : vector<8xf32>
    %246 = vector.multi_reduction <add>, %245, %cst_90 [1] : vector<8x32xf32> to vector<8xf32>
    %247 = vector.shape_cast %246 : vector<8xf32> to vector<8x1xf32>
    %cst_91 = arith.constant 3.200000e+01 : f32
    %248 = vector.broadcast %cst_91 : f32 to vector<8x1xf32>
    %249 = arith.divf %247, %248 : vector<8x1xf32>
    %250 = vector.broadcast %242 : vector<8x1xf32> to vector<8x32xf32>
    %251 = arith.subf %236, %250 : vector<8x32xf32>
    %cst_92 = arith.constant 9.99999974E-6 : f32
    %252 = vector.broadcast %cst_92 : f32 to vector<8x1xf32>
    %253 = arith.addf %249, %252 : vector<8x1xf32>
    %254 = math.rsqrt %253 : vector<8x1xf32>
    %255 = vector.broadcast %254 : vector<8x1xf32> to vector<8x32xf32>
    %256 = arith.mulf %251, %255 : vector<8x32xf32>
    %257 = vector.broadcast %237 : vector<1x32xf32> to vector<8x32xf32>
    %258 = arith.mulf %256, %257 : vector<8x32xf32>
    %259 = vector.broadcast %238 : vector<1x32xf32> to vector<8x32xf32>
    %260 = arith.addf %258, %259 : vector<8x32xf32>
    %261 = arith.truncf %260 : vector<8x32xf32> to vector<8x32xbf16>
    %c0_93 = arith.constant 0 : index
    %c0_94 = arith.constant 0 : index
    %262 = vector.load %arg11[%c0_93, %c0_94] : memref<32x128xbf16, #tpu.memory_space<vmem>>, vector<32x128xbf16>
    %cst_95 = arith.constant dense<0.000000e+00> : vector<8x128xf32>
    %263 = tpu.matmul %261, %262, %cst_95 {dimension_numbers = #tpu.dot_dimension_numbers<[1], [0], [0], [1], [0, 0, 1, 1], [], []>} : vector<8x32xbf16>, vector<32x128xbf16>, vector<8x128xf32> -> vector<8x128xf32>
    %c0_96 = arith.constant 0 : index
    %c0_97 = arith.constant 0 : index
    %264 = vector.load %arg12[%c0_96, %c0_97] : memref<1x128xf32, #tpu.memory_space<vmem>>, vector<1x128xf32>
    %265 = vector.broadcast %264 : vector<1x128xf32> to vector<8x128xf32>
    %266 = arith.addf %263, %265 : vector<8x128xf32>
    %cst_98 = arith.constant 0.000000e+00 : f32
    %267 = vector.broadcast %cst_98 : f32 to vector<8x128xf32>
    %268 = arith.cmpf oge, %266, %267 : vector<8x128xf32>
    %cst_99 = arith.constant 0.00999999977 : f32
    %269 = vector.broadcast %cst_99 : f32 to vector<8x128xf32>
    %270 = arith.mulf %269, %266 : vector<8x128xf32>
    %271 = arith.select %268, %266, %270 : vector<8x128xi1>, vector<8x128xf32>
    %272 = arith.truncf %271 : vector<8x128xf32> to vector<8x128xbf16>
    %c0_100 = arith.constant 0 : index
    %c0_101 = arith.constant 0 : index
    %273 = vector.load %arg13[%c0_100, %c0_101] : memref<128x32xbf16, #tpu.memory_space<vmem>>, vector<128x32xbf16>
    %cst_102 = arith.constant dense<0.000000e+00> : vector<8x32xf32>
    %274 = tpu.matmul %272, %273, %cst_102 {dimension_numbers = #tpu.dot_dimension_numbers<[1], [0], [0], [1], [0, 0, 1, 1], [], []>} : vector<8x128xbf16>, vector<128x32xbf16>, vector<8x32xf32> -> vector<8x32xf32>
    %c0_103 = arith.constant 0 : index
    %c0_104 = arith.constant 0 : index
    %275 = vector.load %arg14[%c0_103, %c0_104] : memref<1x32xf32, #tpu.memory_space<vmem>>, vector<1x32xf32>
    %276 = vector.broadcast %275 : vector<1x32xf32> to vector<8x32xf32>
    %277 = arith.addf %274, %276 : vector<8x32xf32>
    %278 = arith.addf %236, %277 : vector<8x32xf32>
    %c0_105 = arith.constant 0 : index
    %c0_106 = arith.constant 0 : index
    %c0_107 = arith.constant 0 : index
    %279 = vector.load %arg15[%c0_105, %c0_106, %c0_107] : memref<1x8x32xf32, #tpu.memory_space<vmem>>, vector<1x8x32xf32>
    %280 = vector.shape_cast %279 : vector<1x8x32xf32> to vector<8x32xf32>
    %281 = vector.shape_cast %278 : vector<8x32xf32> to vector<1x8x32xf32>
    tpu.vector_store %arg15[%c0_105, %c0_106, %c0_107], %281 {strides = array<i32>} : memref<1x8x32xf32, #tpu.memory_space<vmem>>, vector<1x8x32xf32>,
    return
  }
  func.func @transform_0(%arg0: i32) -> (i32, i32, i32) {
    %c0_i32 = arith.constant 0 : i32
    %c0_i32_0 = arith.constant 0 : i32
    %c0_i32_1 = arith.constant 0 : i32
    return %arg0, %c0_i32, %c0_i32_0 : i32, i32, i32
  }
  func.func @transform_1(%arg0: i32) -> (i32, i32, i32) {
    %c0_i32 = arith.constant 0 : i32
    %c0_i32_0 = arith.constant 0 : i32
    %c0_i32_1 = arith.constant 0 : i32
    return %arg0, %c0_i32, %c0_i32_0 : i32, i32, i32
  }
  func.func @transform_2(%arg0: i32) -> (i32, i32, i32) {
    %c0_i32 = arith.constant 0 : i32
    %c0_i32_0 = arith.constant 0 : i32
    %c0_i32_1 = arith.constant 0 : i32
    return %arg0, %c0_i32, %c0_i32_0 : i32, i32, i32
  }
  func.func @transform_3(%arg0: i32) -> (i32, i32) {
    %c0_i32 = arith.constant 0 : i32
    %c0_i32_0 = arith.constant 0 : i32
    %c0_i32_1 = arith.constant 0 : i32
    return %c0_i32, %c0_i32_0 : i32, i32
  }
  func.func @transform_4(%arg0: i32) -> (i32, i32) {
    %c0_i32 = arith.constant 0 : i32
    %c0_i32_0 = arith.constant 0 : i32
    %c0_i32_1 = arith.constant 0 : i32
    return %c0_i32, %c0_i32_0 : i32, i32
  }
  func.func @transform_5(%arg0: i32) -> (i32, i32) {
    %c0_i32 = arith.constant 0 : i32
    %c0_i32_0 = arith.constant 0 : i32
    %c0_i32_1 = arith.constant 0 : i32
    return %c0_i32, %c0_i32_0 : i32, i32
  }
  func.func @transform_6(%arg0: i32) -> (i32, i32) {
    %c0_i32 = arith.constant 0 : i32
    %c0_i32_0 = arith.constant 0 : i32
    %c0_i32_1 = arith.constant 0 : i32
    return %c0_i32, %c0_i32_0 : i32, i32
  }
  func.func @transform_7(%arg0: i32) -> (i32, i32) {
    %c0_i32 = arith.constant 0 : i32
    %c0_i32_0 = arith.constant 0 : i32
    %c0_i32_1 = arith.constant 0 : i32
    return %c0_i32, %c0_i32_0 : i32, i32
  }
  func.func @transform_8(%arg0: i32) -> (i32, i32) {
    %c0_i32 = arith.constant 0 : i32
    %c0_i32_0 = arith.constant 0 : i32
    %c0_i32_1 = arith.constant 0 : i32
    return %c0_i32, %c0_i32_0 : i32, i32
  }
  func.func @transform_9(%arg0: i32) -> (i32, i32) {
    %c0_i32 = arith.constant 0 : i32
    %c0_i32_0 = arith.constant 0 : i32
    %c0_i32_1 = arith.constant 0 : i32
    return %c0_i32, %c0_i32_0 : i32, i32
  }
  func.func @transform_10(%arg0: i32) -> (i32, i32) {
    %c0_i32 = arith.constant 0 : i32
    %c0_i32_0 = arith.constant 0 : i32
    %c0_i32_1 = arith.constant 0 : i32
    return %c0_i32, %c0_i32_0 : i32, i32
  }
  func.func @transform_11(%arg0: i32) -> (i32, i32) {
    %c0_i32 = arith.constant 0 : i32
    %c0_i32_0 = arith.constant 0 : i32
    %c0_i32_1 = arith.constant 0 : i32
    return %c0_i32, %c0_i32_0 : i32, i32
  }
  func.func @transform_12(%arg0: i32) -> (i32, i32) {
    %c0_i32 = arith.constant 0 : i32
    %c0_i32_0 = arith.constant 0 : i32
    %c0_i32_1 = arith.constant 0 : i32
    return %c0_i32, %c0_i32_0 : i32, i32
  }
  func.func @transform_13(%arg0: i32) -> (i32, i32) {
    %c0_i32 = arith.constant 0 : i32
    %c0_i32_0 = arith.constant 0 : i32
    %c0_i32_1 = arith.constant 0 : i32
    return %c0_i32, %c0_i32_0 : i32, i32
  }
  func.func @transform_14(%arg0: i32) -> (i32, i32, i32) {
    %c0_i32 = arith.constant 0 : i32
    %c0_i32_0 = arith.constant 0 : i32
    %c0_i32_1 = arith.constant 0 : i32
    return %arg0, %c0_i32, %c0_i32_0 : i32, i32, i32
  }
}

module attributes {stable_mosaic.version = 11 : i64} {
  func.func @dual_encoder_kernel(%arg0: i32, %arg1: memref<1x8x32xf32, #tpu.memory_space<vmem>>, %arg2: memref<1x8x32xf32, #tpu.memory_space<vmem>>, %arg3: memref<1x8x8xi8, #tpu.memory_space<vmem>>, %arg4: memref<32x64xbf16, #tpu.memory_space<vmem>>, %arg5: memref<32x32xbf16, #tpu.memory_space<vmem>>, %arg6: memref<32x32xbf16, #tpu.memory_space<vmem>>, %arg7: memref<1x32xf32, #tpu.memory_space<vmem>>, %arg8: memref<1x32xf32, #tpu.memory_space<vmem>>, %arg9: memref<1x32xf32, #tpu.memory_space<vmem>>, %arg10: memref<1x32xf32, #tpu.memory_space<vmem>>, %arg11: memref<32x128xbf16, #tpu.memory_space<vmem>>, %arg12: memref<1x128xf32, #tpu.memory_space<vmem>>, %arg13: memref<128x32xbf16, #tpu.memory_space<vmem>>, %arg14: memref<1x32xf32, #tpu.memory_space<vmem>>, %arg15: memref<1x8x32xf32, #tpu.memory_space<vmem>>, %arg16: memref<8x32xbf16, #tpu.memory_space<vmem>>) attributes {dimension_semantics = [#tpu.dimension_semantics<parallel>], iteration_bounds = array<i64: 2>, scalar_prefetch = 0 : i64, scratch_operands = 1 : i64, tpu.core_type = #tpu.core_type<tc>, window_params = [{transform_indices = @transform_0, window_bounds = array<i64: 1, 8, 32>}, {transform_indices = @transform_1, window_bounds = array<i64: 1, 8, 32>}, {transform_indices = @transform_2, window_bounds = array<i64: 1, 8, 8>}, {pipeline_mode = #tpu.pipeline_mode<synchronous>, transform_indices = @transform_3, window_bounds = array<i64: 32, 64>}, {pipeline_mode = #tpu.pipeline_mode<synchronous>, transform_indices = @transform_4, window_bounds = array<i64: 32, 32>}, {pipeline_mode = #tpu.pipeline_mode<synchronous>, transform_indices = @transform_5, window_bounds = array<i64: 32, 32>}, {pipeline_mode = #tpu.pipeline_mode<synchronous>, transform_indices = @transform_6, window_bounds = array<i64: 1, 32>}, {pipeline_mode = #tpu.pipeline_mode<synchronous>, transform_indices = @transform_7, window_bounds = array<i64: 1, 32>}, {pipeline_mode = #tpu.pipeline_mode<synchronous>, transform_indices = @transform_8, window_bounds = array<i64: 1, 32>}, {pipeline_mode = #tpu.pipeline_mode<synchronous>, transform_indices = @transform_9, window_bounds = array<i64: 1, 32>}, {pipeline_mode = #tpu.pipeline_mode<synchronous>, transform_indices = @transform_10, window_bounds = array<i64: 32, 128>}, {pipeline_mode = #tpu.pipeline_mode<synchronous>, transform_indices = @transform_11, window_bounds = array<i64: 1, 128>}, {pipeline_mode = #tpu.pipeline_mode<synchronous>, transform_indices = @transform_12, window_bounds = array<i64: 128, 32>}, {pipeline_mode = #tpu.pipeline_mode<synchronous>, transform_indices = @transform_13, window_bounds = array<i64: 1, 32>}, {transform_indices = @transform_14, window_bounds = array<i64: 1, 8, 32>}]} {
    %c0 = arith.constant 0 : index
    %c0_0 = arith.constant 0 : index
    %c0_1 = arith.constant 0 : index
    %0 = vector.load %arg1[%c0, %c0_0, %c0_1] : memref<1x8x32xf32, #tpu.memory_space<vmem>>, vector<1x8x32xf32>
    %1 = vector.shape_cast %0 : vector<1x8x32xf32> to vector<8x32xf32>
    %c0_2 = arith.constant 0 : index
    %c0_3 = arith.constant 0 : index
    %c0_4 = arith.constant 0 : index
    %2 = vector.load %arg2[%c0_2, %c0_3, %c0_4] : memref<1x8x32xf32, #tpu.memory_space<vmem>>, vector<1x8x32xf32>
    %3 = vector.shape_cast %2 : vector<1x8x32xf32> to vector<8x32xf32>
    %c0_5 = arith.constant 0 : index
    %c0_6 = arith.constant 0 : index
    %c0_7 = arith.constant 0 : index
    %4 = vector.load %arg3[%c0_5, %c0_6, %c0_7] : memref<1x8x8xi8, #tpu.memory_space<vmem>>, vector<1x8x8xi8>
    %5 = vector.shape_cast %4 : vector<1x8x8xi8> to vector<8x8xi8>
    %c0_i8 = arith.constant 0 : i8
    %6 = vector.broadcast %c0_i8 : i8 to vector<8x8xi8>
    %7 = arith.cmpi ne, %5, %6 : vector<8x8xi8>
    %c0_8 = arith.constant 0 : index
    %c0_9 = arith.constant 0 : index
    %8 = vector.load %arg4[%c0_8, %c0_9] : memref<32x64xbf16, #tpu.memory_space<vmem>>, vector<32x64xbf16>
    %c0_10 = arith.constant 0 : index
    %c0_11 = arith.constant 0 : index
    %9 = vector.load %arg5[%c0_10, %c0_11] : memref<32x32xbf16, #tpu.memory_space<vmem>>, vector<32x32xbf16>
    %c0_12 = arith.constant 0 : index
    %c0_13 = arith.constant 0 : index
    %10 = vector.load %arg6[%c0_12, %c0_13] : memref<32x32xbf16, #tpu.memory_space<vmem>>, vector<32x32xbf16>
    %11 = tpu.concatenate %1, %3 in 0 : vector<8x32xf32>, vector<8x32xf32> -> vector<16x32xf32>
    %c0_14 = arith.constant 0 : index
    %c0_15 = arith.constant 0 : index
    %12 = vector.load %arg7[%c0_14, %c0_15] : memref<1x32xf32, #tpu.memory_space<vmem>>, vector<1x32xf32>
    %c0_16 = arith.constant 0 : index
    %c0_17 = arith.constant 0 : index
    %13 = vector.load %arg8[%c0_16, %c0_17] : memref<1x32xf32, #tpu.memory_space<vmem>>, vector<1x32xf32>
    %cst = arith.constant dense<0.000000e+00> : vector<16xf32>
    %14 = vector.multi_reduction <add>, %11, %cst [1] : vector<16x32xf32> to vector<16xf32>
    %15 = vector.shape_cast %14 : vector<16xf32> to vector<16x1xf32>
    %cst_18 = arith.constant 3.200000e+01 : f32
    %16 = vector.broadcast %cst_18 : f32 to vector<16x1xf32>
    %17 = arith.divf %15, %16 : vector<16x1xf32>
    %18 = vector.broadcast %17 : vector<16x1xf32> to vector<16x32xf32>
    %19 = arith.subf %11, %18 : vector<16x32xf32>
    %20 = arith.mulf %19, %19 : vector<16x32xf32>
    %cst_19 = arith.constant dense<0.000000e+00> : vector<16xf32>
    %21 = vector.multi_reduction <add>, %20, %cst_19 [1] : vector<16x32xf32> to vector<16xf32>
    %22 = vector.shape_cast %21 : vector<16xf32> to vector<16x1xf32>
    %cst_20 = arith.constant 3.200000e+01 : f32
    %23 = vector.broadcast %cst_20 : f32 to vector<16x1xf32>
    %24 = arith.divf %22, %23 : vector<16x1xf32>
    %25 = vector.broadcast %17 : vector<16x1xf32> to vector<16x32xf32>
    %26 = arith.subf %11, %25 : vector<16x32xf32>
    %cst_21 = arith.constant 9.99999974E-6 : f32
    %27 = vector.broadcast %cst_21 : f32 to vector<16x1xf32>
    %28 = arith.addf %24, %27 : vector<16x1xf32>
    %29 = math.rsqrt %28 : vector<16x1xf32>
    %30 = vector.broadcast %29 : vector<16x1xf32> to vector<16x32xf32>
    %31 = arith.mulf %26, %30 : vector<16x32xf32>
    %32 = vector.broadcast %12 : vector<1x32xf32> to vector<16x32xf32>
    %33 = arith.mulf %31, %32 : vector<16x32xf32>
    %34 = vector.broadcast %13 : vector<1x32xf32> to vector<16x32xf32>
    %35 = arith.addf %33, %34 : vector<16x32xf32>
    %36 = arith.truncf %35 : vector<16x32xf32> to vector<16x32xbf16>
    %cst_22 = arith.constant dense<0.000000e+00> : vector<16x64xf32>
    %37 = tpu.matmul %36, %8, %cst_22 {dimension_numbers = #tpu.dot_dimension_numbers<[1], [0], [0], [1], [0, 0, 1, 1], [], []>} : vector<16x32xbf16>, vector<32x64xbf16>, vector<16x64xf32> -> vector<16x64xf32>
    %38 = vector.extract_strided_slice %37 {offsets = [0, 0], sizes = [8, 32], strides = [1, 1]} : vector<16x64xf32> to vector<8x32xf32>
    %39 = vector.extract_strided_slice %37 {offsets = [0, 32], sizes = [8, 32], strides = [1, 1]} : vector<16x64xf32> to vector<8x32xf32>
    %40 = vector.extract_strided_slice %37 {offsets = [8, 0], sizes = [8, 32], strides = [1, 1]} : vector<16x64xf32> to vector<8x32xf32>
    %41 = vector.extract_strided_slice %37 {offsets = [8, 32], sizes = [8, 32], strides = [1, 1]} : vector<16x64xf32> to vector<8x32xf32>
    %42 = vector.extract_strided_slice %35 {offsets = [8, 0], sizes = [8, 32], strides = [1, 1]} : vector<16x32xf32> to vector<8x32xf32>
    %43 = arith.truncf %42 : vector<8x32xf32> to vector<8x32xbf16>
    %cst_23 = arith.constant dense<0.000000e+00> : vector<8x32xf32>
    %44 = tpu.matmul %43, %9, %cst_23 {dimension_numbers = #tpu.dot_dimension_numbers<[1], [0], [0], [1], [0, 0, 1, 1], [], []>} : vector<8x32xbf16>, vector<32x32xbf16>, vector<8x32xf32> -> vector<8x32xf32>
    %45 = vector.extract_strided_slice %40 {offsets = [0, 0], sizes = [8, 8], strides = [1, 1]} : vector<8x32xf32> to vector<8x8xf32>
    %46 = arith.truncf %45 : vector<8x8xf32> to vector<8x8xbf16>
    %47 = vector.extract_strided_slice %41 {offsets = [0, 0], sizes = [8, 8], strides = [1, 1]} : vector<8x32xf32> to vector<8x8xf32>
    %48 = arith.truncf %47 : vector<8x8xf32> to vector<8x8xbf16>
    %cst_24 = arith.constant dense<0.000000e+00> : vector<8x8xf32>
    %49 = tpu.matmul %46, %48, %cst_24 {dimension_numbers = #tpu.dot_dimension_numbers<[1], [1], [0], [0], [0, 0, 1, 0], [], []>} : vector<8x8xbf16>, vector<8x8xbf16>, vector<8x8xf32> -> vector<8x8xf32>
    %cst_25 = arith.constant 0xCC06DEB3 : f32
    %50 = vector.broadcast %cst_25 : f32 to vector<8x8xf32>
    %51 = arith.select %7, %50, %49 : vector<8x8xi1>, vector<8x8xf32>
    %cst_26 = arith.constant dense<0xFF800000> : vector<8xf32>
    %52 = vector.multi_reduction <maximumf>, %51, %cst_26 [1] : vector<8x8xf32> to vector<8xf32>
    %53 = vector.shape_cast %52 : vector<8xf32> to vector<8x1xf32>
    %54 = vector.broadcast %53 : vector<8x1xf32> to vector<8x8xf32>
    %55 = arith.subf %51, %54 : vector<8x8xf32>
    %56 = math.exp %55 : vector<8x8xf32>
    %cst_27 = arith.constant dense<0.000000e+00> : vector<8xf32>
    %57 = vector.multi_reduction <add>, %56, %cst_27 [1] : vector<8x8xf32> to vector<8xf32>
    %58 = vector.shape_cast %57 : vector<8xf32> to vector<8x1xf32>
    %59 = tpu.reciprocal %58 {approx = true} : vector<8x1xf32> -> vector<8x1xf32>
    %60 = vector.broadcast %59 : vector<8x1xf32> to vector<8x8xf32>
    %61 = arith.mulf %56, %60 : vector<8x8xf32>
    %62 = arith.truncf %61 : vector<8x8xf32> to vector<8x8xbf16>
    %63 = vector.extract_strided_slice %44 {offsets = [0, 0], sizes = [8, 8], strides = [1, 1]} : vector<8x32xf32> to vector<8x8xf32>
    %64 = arith.truncf %63 : vector<8x8xf32> to vector<8x8xbf16>
    %cst_28 = arith.constant dense<0.000000e+00> : vector<8x8xf32>
    %65 = tpu.matmul %62, %64, %cst_28 {dimension_numbers = #tpu.dot_dimension_numbers<[1], [0], [0], [1], [0, 0, 1, 1], [], []>} : vector<8x8xbf16>, vector<8x8xbf16>, vector<8x8xf32> -> vector<8x8xf32>
    %66 = arith.truncf %65 : vector<8x8xf32> to vector<8x8xbf16>
    %c0_29 = arith.constant 0 : index
    %c0_30 = arith.constant 0 : index
    %67 = vector.load %arg16[%c0_29, %c0_30] : memref<8x32xbf16, #tpu.memory_space<vmem>>, vector<8x8xbf16>
    tpu.vector_store %arg16[%c0_29, %c0_30], %66 {strides = array<i32>} : memref<8x32xbf16, #tpu.memory_space<vmem>>, vector<8x8xbf16>,
    %68 = vector.extract_strided_slice %40 {offsets = [0, 8], sizes = [8, 8], strides = [1, 1]} : vector<8x32xf32> to vector<8x8xf32>
    %69 = arith.truncf %68 : vector<8x8xf32> to vector<8x8xbf16>
    %70 = vector.extract_strided_slice %41 {offsets = [0, 8], sizes = [8, 8], strides = [1, 1]} : vector<8x32xf32> to vector<8x8xf32>
    %71 = arith.truncf %70 : vector<8x8xf32> to vector<8x8xbf16>
    %cst_31 = arith.constant dense<0.000000e+00> : vector<8x8xf32>
    %72 = tpu.matmul %69, %71, %cst_31 {dimension_numbers = #tpu.dot_dimension_numbers<[1], [1], [0], [0], [0, 0, 1, 0], [], []>} : vector<8x8xbf16>, vector<8x8xbf16>, vector<8x8xf32> -> vector<8x8xf32>
    %cst_32 = arith.constant 0xCC06DEB3 : f32
    %73 = vector.broadcast %cst_32 : f32 to vector<8x8xf32>
    %74 = arith.select %7, %73, %72 : vector<8x8xi1>, vector<8x8xf32>
    %cst_33 = arith.constant dense<0xFF800000> : vector<8xf32>
    %75 = vector.multi_reduction <maximumf>, %74, %cst_33 [1] : vector<8x8xf32> to vector<8xf32>
    %76 = vector.shape_cast %75 : vector<8xf32> to vector<8x1xf32>
    %77 = vector.broadcast %76 : vector<8x1xf32> to vector<8x8xf32>
    %78 = arith.subf %74, %77 : vector<8x8xf32>
    %79 = math.exp %78 : vector<8x8xf32>
    %cst_34 = arith.constant dense<0.000000e+00> : vector<8xf32>
    %80 = vector.multi_reduction <add>, %79, %cst_34 [1] : vector<8x8xf32> to vector<8xf32>
    %81 = vector.shape_cast %80 : vector<8xf32> to vector<8x1xf32>
    %82 = tpu.reciprocal %81 {approx = true} : vector<8x1xf32> -> vector<8x1xf32>
    %83 = vector.broadcast %82 : vector<8x1xf32> to vector<8x8xf32>
    %84 = arith.mulf %79, %83 : vector<8x8xf32>
    %85 = arith.truncf %84 : vector<8x8xf32> to vector<8x8xbf16>
    %86 = vector.extract_strided_slice %44 {offsets = [0, 8], sizes = [8, 8], strides = [1, 1]} : vector<8x32xf32> to vector<8x8xf32>
    %87 = arith.truncf %86 : vector<8x8xf32> to vector<8x8xbf16>
    %cst_35 = arith.constant dense<0.000000e+00> : vector<8x8xf32>
    %88 = tpu.matmul %85, %87, %cst_35 {dimension_numbers = #tpu.dot_dimension_numbers<[1], [0], [0], [1], [0, 0, 1, 1], [], []>} : vector<8x8xbf16>, vector<8x8xbf16>, vector<8x8xf32> -> vector<8x8xf32>
    %89 = arith.truncf %88 : vector<8x8xf32> to vector<8x8xbf16>
    %c0_36 = arith.constant 0 : index
    %c8 = arith.constant 8 : index
    %90 = vector.load %arg16[%c0_36, %c8] : memref<8x32xbf16, #tpu.memory_space<vmem>>, vector<8x8xbf16>
    tpu.vector_store %arg16[%c0_36, %c8], %89 {strides = array<i32>} : memref<8x32xbf16, #tpu.memory_space<vmem>>, vector<8x8xbf16>,
    %91 = vector.extract_strided_slice %40 {offsets = [0, 16], sizes = [8, 8], strides = [1, 1]} : vector<8x32xf32> to vector<8x8xf32>
    %92 = arith.truncf %91 : vector<8x8xf32> to vector<8x8xbf16>
    %93 = vector.extract_strided_slice %41 {offsets = [0, 16], sizes = [8, 8], strides = [1, 1]} : vector<8x32xf32> to vector<8x8xf32>
    %94 = arith.truncf %93 : vector<8x8xf32> to vector<8x8xbf16>
    %cst_37 = arith.constant dense<0.000000e+00> : vector<8x8xf32>
    %95 = tpu.matmul %92, %94, %cst_37 {dimension_numbers = #tpu.dot_dimension_numbers<[1], [1], [0], [0], [0, 0, 1, 0], [], []>} : vector<8x8xbf16>, vector<8x8xbf16>, vector<8x8xf32> -> vector<8x8xf32>
    %cst_38 = arith.constant 0xCC06DEB3 : f32
    %96 = vector.broadcast %cst_38 : f32 to vector<8x8xf32>
    %97 = arith.select %7, %96, %95 : vector<8x8xi1>, vector<8x8xf32>
    %cst_39 = arith.constant dense<0xFF800000> : vector<8xf32>
    %98 = vector.multi_reduction <maximumf>, %97, %cst_39 [1] : vector<8x8xf32> to vector<8xf32>
    %99 = vector.shape_cast %98 : vector<8xf32> to vector<8x1xf32>
    %100 = vector.broadcast %99 : vector<8x1xf32> to vector<8x8xf32>
    %101 = arith.subf %97, %100 : vector<8x8xf32>
    %102 = math.exp %101 : vector<8x8xf32>
    %cst_40 = arith.constant dense<0.000000e+00> : vector<8xf32>
    %103 = vector.multi_reduction <add>, %102, %cst_40 [1] : vector<8x8xf32> to vector<8xf32>
    %104 = vector.shape_cast %103 : vector<8xf32> to vector<8x1xf32>
    %105 = tpu.reciprocal %104 {approx = true} : vector<8x1xf32> -> vector<8x1xf32>
    %106 = vector.broadcast %105 : vector<8x1xf32> to vector<8x8xf32>
    %107 = arith.mulf %102, %106 : vector<8x8xf32>
    %108 = arith.truncf %107 : vector<8x8xf32> to vector<8x8xbf16>
    %109 = vector.extract_strided_slice %44 {offsets = [0, 16], sizes = [8, 8], strides = [1, 1]} : vector<8x32xf32> to vector<8x8xf32>
    %110 = arith.truncf %109 : vector<8x8xf32> to vector<8x8xbf16>
    %cst_41 = arith.constant dense<0.000000e+00> : vector<8x8xf32>
    %111 = tpu.matmul %108, %110, %cst_41 {dimension_numbers = #tpu.dot_dimension_numbers<[1], [0], [0], [1], [0, 0, 1, 1], [], []>} : vector<8x8xbf16>, vector<8x8xbf16>, vector<8x8xf32> -> vector<8x8xf32>
    %112 = arith.truncf %111 : vector<8x8xf32> to vector<8x8xbf16>
    %c0_42 = arith.constant 0 : index
    %c16 = arith.constant 16 : index
    %113 = vector.load %arg16[%c0_42, %c16] : memref<8x32xbf16, #tpu.memory_space<vmem>>, vector<8x8xbf16>
    tpu.vector_store %arg16[%c0_42, %c16], %112 {strides = array<i32>} : memref<8x32xbf16, #tpu.memory_space<vmem>>, vector<8x8xbf16>,
    %114 = vector.extract_strided_slice %40 {offsets = [0, 24], sizes = [8, 8], strides = [1, 1]} : vector<8x32xf32> to vector<8x8xf32>
    %115 = arith.truncf %114 : vector<8x8xf32> to vector<8x8xbf16>
    %116 = vector.extract_strided_slice %41 {offsets = [0, 24], sizes = [8, 8], strides = [1, 1]} : vector<8x32xf32> to vector<8x8xf32>
    %117 = arith.truncf %116 : vector<8x8xf32> to vector<8x8xbf16>
    %cst_43 = arith.constant dense<0.000000e+00> : vector<8x8xf32>
    %118 = tpu.matmul %115, %117, %cst_43 {dimension_numbers = #tpu.dot_dimension_numbers<[1], [1], [0], [0], [0, 0, 1, 0], [], []>} : vector<8x8xbf16>, vector<8x8xbf16>, vector<8x8xf32> -> vector<8x8xf32>
    %cst_44 = arith.constant 0xCC06DEB3 : f32
    %119 = vector.broadcast %cst_44 : f32 to vector<8x8xf32>
    %120 = arith.select %7, %119, %118 : vector<8x8xi1>, vector<8x8xf32>
    %cst_45 = arith.constant dense<0xFF800000> : vector<8xf32>
    %121 = vector.multi_reduction <maximumf>, %120, %cst_45 [1] : vector<8x8xf32> to vector<8xf32>
    %122 = vector.shape_cast %121 : vector<8xf32> to vector<8x1xf32>
    %123 = vector.broadcast %122 : vector<8x1xf32> to vector<8x8xf32>
    %124 = arith.subf %120, %123 : vector<8x8xf32>
    %125 = math.exp %124 : vector<8x8xf32>
    %cst_46 = arith.constant dense<0.000000e+00> : vector<8xf32>
    %126 = vector.multi_reduction <add>, %125, %cst_46 [1] : vector<8x8xf32> to vector<8xf32>
    %127 = vector.shape_cast %126 : vector<8xf32> to vector<8x1xf32>
    %128 = tpu.reciprocal %127 {approx = true} : vector<8x1xf32> -> vector<8x1xf32>
    %129 = vector.broadcast %128 : vector<8x1xf32> to vector<8x8xf32>
    %130 = arith.mulf %125, %129 : vector<8x8xf32>
    %131 = arith.truncf %130 : vector<8x8xf32> to vector<8x8xbf16>
    %132 = vector.extract_strided_slice %44 {offsets = [0, 24], sizes = [8, 8], strides = [1, 1]} : vector<8x32xf32> to vector<8x8xf32>
    %133 = arith.truncf %132 : vector<8x8xf32> to vector<8x8xbf16>
    %cst_47 = arith.constant dense<0.000000e+00> : vector<8x8xf32>
    %134 = tpu.matmul %131, %133, %cst_47 {dimension_numbers = #tpu.dot_dimension_numbers<[1], [0], [0], [1], [0, 0, 1, 1], [], []>} : vector<8x8xbf16>, vector<8x8xbf16>, vector<8x8xf32> -> vector<8x8xf32>
    %135 = arith.truncf %134 : vector<8x8xf32> to vector<8x8xbf16>
    %c0_48 = arith.constant 0 : index
    %c24 = arith.constant 24 : index
    %136 = vector.load %arg16[%c0_48, %c24] : memref<8x32xbf16, #tpu.memory_space<vmem>>, vector<8x8xbf16>
    tpu.vector_store %arg16[%c0_48, %c24], %135 {strides = array<i32>} : memref<8x32xbf16, #tpu.memory_space<vmem>>, vector<8x8xbf16>,
    %c0_49 = arith.constant 0 : index
    %c0_50 = arith.constant 0 : index
    %137 = vector.load %arg16[%c0_49, %c0_50] : memref<8x32xbf16, #tpu.memory_space<vmem>>, vector<8x32xbf16>
    %cst_51 = arith.constant dense<0.000000e+00> : vector<8x32xf32>
    %138 = tpu.matmul %137, %10, %cst_51 {dimension_numbers = #tpu.dot_dimension_numbers<[1], [0], [0], [1], [0, 0, 1, 1], [], []>} : vector<8x32xbf16>, vector<32x32xbf16>, vector<8x32xf32> -> vector<8x32xf32>
    %139 = arith.addf %3, %138 : vector<8x32xf32>
    %140 = arith.truncf %139 : vector<8x32xf32> to vector<8x32xbf16>
    %cst_52 = arith.constant dense<0.000000e+00> : vector<8x32xf32>
    %141 = tpu.matmul %140, %9, %cst_52 {dimension_numbers = #tpu.dot_dimension_numbers<[1], [0], [0], [1], [0, 0, 1, 1], [], []>} : vector<8x32xbf16>, vector<32x32xbf16>, vector<8x32xf32> -> vector<8x32xf32>
    %142 = vector.extract_strided_slice %38 {offsets = [0, 0], sizes = [8, 8], strides = [1, 1]} : vector<8x32xf32> to vector<8x8xf32>
    %143 = arith.truncf %142 : vector<8x8xf32> to vector<8x8xbf16>
    %144 = vector.extract_strided_slice %39 {offsets = [0, 0], sizes = [8, 8], strides = [1, 1]} : vector<8x32xf32> to vector<8x8xf32>
    %145 = arith.truncf %144 : vector<8x8xf32> to vector<8x8xbf16>
    %cst_53 = arith.constant dense<0.000000e+00> : vector<8x8xf32>
    %146 = tpu.matmul %143, %145, %cst_53 {dimension_numbers = #tpu.dot_dimension_numbers<[1], [1], [0], [0], [0, 0, 1, 0], [], []>} : vector<8x8xbf16>, vector<8x8xbf16>, vector<8x8xf32> -> vector<8x8xf32>
    %cst_54 = arith.constant 0xCC06DEB3 : f32
    %147 = vector.broadcast %cst_54 : f32 to vector<8x8xf32>
    %148 = arith.select %7, %147, %146 : vector<8x8xi1>, vector<8x8xf32>
    %cst_55 = arith.constant dense<0xFF800000> : vector<8xf32>
    %149 = vector.multi_reduction <maximumf>, %148, %cst_55 [1] : vector<8x8xf32> to vector<8xf32>
    %150 = vector.shape_cast %149 : vector<8xf32> to vector<8x1xf32>
    %151 = vector.broadcast %150 : vector<8x1xf32> to vector<8x8xf32>
    %152 = arith.subf %148, %151 : vector<8x8xf32>
    %153 = math.exp %152 : vector<8x8xf32>
    %cst_56 = arith.constant dense<0.000000e+00> : vector<8xf32>
    %154 = vector.multi_reduction <add>, %153, %cst_56 [1] : vector<8x8xf32> to vector<8xf32>
    %155 = vector.shape_cast %154 : vector<8xf32> to vector<8x1xf32>
    %156 = tpu.reciprocal %155 {approx = true} : vector<8x1xf32> -> vector<8x1xf32>
    %157 = vector.broadcast %156 : vector<8x1xf32> to vector<8x8xf32>
    %158 = arith.mulf %153, %157 : vector<8x8xf32>
    %159 = arith.truncf %158 : vector<8x8xf32> to vector<8x8xbf16>
    %160 = vector.extract_strided_slice %141 {offsets = [0, 0], sizes = [8, 8], strides = [1, 1]} : vector<8x32xf32> to vector<8x8xf32>
    %161 = arith.truncf %160 : vector<8x8xf32> to vector<8x8xbf16>
    %cst_57 = arith.constant dense<0.000000e+00> : vector<8x8xf32>
    %162 = tpu.matmul %159, %161, %cst_57 {dimension_numbers = #tpu.dot_dimension_numbers<[1], [0], [0], [1], [0, 0, 1, 1], [], []>} : vector<8x8xbf16>, vector<8x8xbf16>, vector<8x8xf32> -> vector<8x8xf32>
    %163 = arith.truncf %162 : vector<8x8xf32> to vector<8x8xbf16>
    %c0_58 = arith.constant 0 : index
    %c0_59 = arith.constant 0 : index
    %164 = vector.load %arg16[%c0_58, %c0_59] : memref<8x32xbf16, #tpu.memory_space<vmem>>, vector<8x8xbf16>
    tpu.vector_store %arg16[%c0_58, %c0_59], %163 {strides = array<i32>} : memref<8x32xbf16, #tpu.memory_space<vmem>>, vector<8x8xbf16>,
    %165 = vector.extract_strided_slice %38 {offsets = [0, 8], sizes = [8, 8], strides = [1, 1]} : vector<8x32xf32> to vector<8x8xf32>
    %166 = arith.truncf %165 : vector<8x8xf32> to vector<8x8xbf16>
    %167 = vector.extract_strided_slice %39 {offsets = [0, 8], sizes = [8, 8], strides = [1, 1]} : vector<8x32xf32> to vector<8x8xf32>
    %168 = arith.truncf %167 : vector<8x8xf32> to vector<8x8xbf16>
    %cst_60 = arith.constant dense<0.000000e+00> : vector<8x8xf32>
    %169 = tpu.matmul %166, %168, %cst_60 {dimension_numbers = #tpu.dot_dimension_numbers<[1], [1], [0], [0], [0, 0, 1, 0], [], []>} : vector<8x8xbf16>, vector<8x8xbf16>, vector<8x8xf32> -> vector<8x8xf32>
    %cst_61 = arith.constant 0xCC06DEB3 : f32
    %170 = vector.broadcast %cst_61 : f32 to vector<8x8xf32>
    %171 = arith.select %7, %170, %169 : vector<8x8xi1>, vector<8x8xf32>
    %cst_62 = arith.constant dense<0xFF800000> : vector<8xf32>
    %172 = vector.multi_reduction <maximumf>, %171, %cst_62 [1] : vector<8x8xf32> to vector<8xf32>
    %173 = vector.shape_cast %172 : vector<8xf32> to vector<8x1xf32>
    %174 = vector.broadcast %173 : vector<8x1xf32> to vector<8x8xf32>
    %175 = arith.subf %171, %174 : vector<8x8xf32>
    %176 = math.exp %175 : vector<8x8xf32>
    %cst_63 = arith.constant dense<0.000000e+00> : vector<8xf32>
    %177 = vector.multi_reduction <add>, %176, %cst_63 [1] : vector<8x8xf32> to vector<8xf32>
    %178 = vector.shape_cast %177 : vector<8xf32> to vector<8x1xf32>
    %179 = tpu.reciprocal %178 {approx = true} : vector<8x1xf32> -> vector<8x1xf32>
    %180 = vector.broadcast %179 : vector<8x1xf32> to vector<8x8xf32>
    %181 = arith.mulf %176, %180 : vector<8x8xf32>
    %182 = arith.truncf %181 : vector<8x8xf32> to vector<8x8xbf16>
    %183 = vector.extract_strided_slice %141 {offsets = [0, 8], sizes = [8, 8], strides = [1, 1]} : vector<8x32xf32> to vector<8x8xf32>
    %184 = arith.truncf %183 : vector<8x8xf32> to vector<8x8xbf16>
    %cst_64 = arith.constant dense<0.000000e+00> : vector<8x8xf32>
    %185 = tpu.matmul %182, %184, %cst_64 {dimension_numbers = #tpu.dot_dimension_numbers<[1], [0], [0], [1], [0, 0, 1, 1], [], []>} : vector<8x8xbf16>, vector<8x8xbf16>, vector<8x8xf32> -> vector<8x8xf32>
    %186 = arith.truncf %185 : vector<8x8xf32> to vector<8x8xbf16>
    %c0_65 = arith.constant 0 : index
    %c8_66 = arith.constant 8 : index
    %187 = vector.load %arg16[%c0_65, %c8_66] : memref<8x32xbf16, #tpu.memory_space<vmem>>, vector<8x8xbf16>
    tpu.vector_store %arg16[%c0_65, %c8_66], %186 {strides = array<i32>} : memref<8x32xbf16, #tpu.memory_space<vmem>>, vector<8x8xbf16>,
    %188 = vector.extract_strided_slice %38 {offsets = [0, 16], sizes = [8, 8], strides = [1, 1]} : vector<8x32xf32> to vector<8x8xf32>
    %189 = arith.truncf %188 : vector<8x8xf32> to vector<8x8xbf16>
    %190 = vector.extract_strided_slice %39 {offsets = [0, 16], sizes = [8, 8], strides = [1, 1]} : vector<8x32xf32> to vector<8x8xf32>
    %191 = arith.truncf %190 : vector<8x8xf32> to vector<8x8xbf16>
    %cst_67 = arith.constant dense<0.000000e+00> : vector<8x8xf32>
    %192 = tpu.matmul %189, %191, %cst_67 {dimension_numbers = #tpu.dot_dimension_numbers<[1], [1], [0], [0], [0, 0, 1, 0], [], []>} : vector<8x8xbf16>, vector<8x8xbf16>, vector<8x8xf32> -> vector<8x8xf32>
    %cst_68 = arith.constant 0xCC06DEB3 : f32
    %193 = vector.broadcast %cst_68 : f32 to vector<8x8xf32>
    %194 = arith.select %7, %193, %192 : vector<8x8xi1>, vector<8x8xf32>
    %cst_69 = arith.constant dense<0xFF800000> : vector<8xf32>
    %195 = vector.multi_reduction <maximumf>, %194, %cst_69 [1] : vector<8x8xf32> to vector<8xf32>
    %196 = vector.shape_cast %195 : vector<8xf32> to vector<8x1xf32>
    %197 = vector.broadcast %196 : vector<8x1xf32> to vector<8x8xf32>
    %198 = arith.subf %194, %197 : vector<8x8xf32>
    %199 = math.exp %198 : vector<8x8xf32>
    %cst_70 = arith.constant dense<0.000000e+00> : vector<8xf32>
    %200 = vector.multi_reduction <add>, %199, %cst_70 [1] : vector<8x8xf32> to vector<8xf32>
    %201 = vector.shape_cast %200 : vector<8xf32> to vector<8x1xf32>
    %202 = tpu.reciprocal %201 {approx = true} : vector<8x1xf32> -> vector<8x1xf32>
    %203 = vector.broadcast %202 : vector<8x1xf32> to vector<8x8xf32>
    %204 = arith.mulf %199, %203 : vector<8x8xf32>
    %205 = arith.truncf %204 : vector<8x8xf32> to vector<8x8xbf16>
    %206 = vector.extract_strided_slice %141 {offsets = [0, 16], sizes = [8, 8], strides = [1, 1]} : vector<8x32xf32> to vector<8x8xf32>
    %207 = arith.truncf %206 : vector<8x8xf32> to vector<8x8xbf16>
    %cst_71 = arith.constant dense<0.000000e+00> : vector<8x8xf32>
    %208 = tpu.matmul %205, %207, %cst_71 {dimension_numbers = #tpu.dot_dimension_numbers<[1], [0], [0], [1], [0, 0, 1, 1], [], []>} : vector<8x8xbf16>, vector<8x8xbf16>, vector<8x8xf32> -> vector<8x8xf32>
    %209 = arith.truncf %208 : vector<8x8xf32> to vector<8x8xbf16>
    %c0_72 = arith.constant 0 : index
    %c16_73 = arith.constant 16 : index
    %210 = vector.load %arg16[%c0_72, %c16_73] : memref<8x32xbf16, #tpu.memory_space<vmem>>, vector<8x8xbf16>
    tpu.vector_store %arg16[%c0_72, %c16_73], %209 {strides = array<i32>} : memref<8x32xbf16, #tpu.memory_space<vmem>>, vector<8x8xbf16>,
    %211 = vector.extract_strided_slice %38 {offsets = [0, 24], sizes = [8, 8], strides = [1, 1]} : vector<8x32xf32> to vector<8x8xf32>
    %212 = arith.truncf %211 : vector<8x8xf32> to vector<8x8xbf16>
    %213 = vector.extract_strided_slice %39 {offsets = [0, 24], sizes = [8, 8], strides = [1, 1]} : vector<8x32xf32> to vector<8x8xf32>
    %214 = arith.truncf %213 : vector<8x8xf32> to vector<8x8xbf16>
    %cst_74 = arith.constant dense<0.000000e+00> : vector<8x8xf32>
    %215 = tpu.matmul %212, %214, %cst_74 {dimension_numbers = #tpu.dot_dimension_numbers<[1], [1], [0], [0], [0, 0, 1, 0], [], []>} : vector<8x8xbf16>, vector<8x8xbf16>, vector<8x8xf32> -> vector<8x8xf32>
    %cst_75 = arith.constant 0xCC06DEB3 : f32
    %216 = vector.broadcast %cst_75 : f32 to vector<8x8xf32>
    %217 = arith.select %7, %216, %215 : vector<8x8xi1>, vector<8x8xf32>
    %cst_76 = arith.constant dense<0xFF800000> : vector<8xf32>
    %218 = vector.multi_reduction <maximumf>, %217, %cst_76 [1] : vector<8x8xf32> to vector<8xf32>
    %219 = vector.shape_cast %218 : vector<8xf32> to vector<8x1xf32>
    %220 = vector.broadcast %219 : vector<8x1xf32> to vector<8x8xf32>
    %221 = arith.subf %217, %220 : vector<8x8xf32>
    %222 = math.exp %221 : vector<8x8xf32>
    %cst_77 = arith.constant dense<0.000000e+00> : vector<8xf32>
    %223 = vector.multi_reduction <add>, %222, %cst_77 [1] : vector<8x8xf32> to vector<8xf32>
    %224 = vector.shape_cast %223 : vector<8xf32> to vector<8x1xf32>
    %225 = tpu.reciprocal %224 {approx = true} : vector<8x1xf32> -> vector<8x1xf32>
    %226 = vector.broadcast %225 : vector<8x1xf32> to vector<8x8xf32>
    %227 = arith.mulf %222, %226 : vector<8x8xf32>
    %228 = arith.truncf %227 : vector<8x8xf32> to vector<8x8xbf16>
    %229 = vector.extract_strided_slice %141 {offsets = [0, 24], sizes = [8, 8], strides = [1, 1]} : vector<8x32xf32> to vector<8x8xf32>
    %230 = arith.truncf %229 : vector<8x8xf32> to vector<8x8xbf16>
    %cst_78 = arith.constant dense<0.000000e+00> : vector<8x8xf32>
    %231 = tpu.matmul %228, %230, %cst_78 {dimension_numbers = #tpu.dot_dimension_numbers<[1], [0], [0], [1], [0, 0, 1, 1], [], []>} : vector<8x8xbf16>, vector<8x8xbf16>, vector<8x8xf32> -> vector<8x8xf32>
    %232 = arith.truncf %231 : vector<8x8xf32> to vector<8x8xbf16>
    %c0_79 = arith.constant 0 : index
    %c24_80 = arith.constant 24 : index
    %233 = vector.load %arg16[%c0_79, %c24_80] : memref<8x32xbf16, #tpu.memory_space<vmem>>, vector<8x8xbf16>
    tpu.vector_store %arg16[%c0_79, %c24_80], %232 {strides = array<i32>} : memref<8x32xbf16, #tpu.memory_space<vmem>>, vector<8x8xbf16>,
    %c0_81 = arith.constant 0 : index
    %c0_82 = arith.constant 0 : index
    %234 = vector.load %arg16[%c0_81, %c0_82] : memref<8x32xbf16, #tpu.memory_space<vmem>>, vector<8x32xbf16>
    %cst_83 = arith.constant dense<0.000000e+00> : vector<8x32xf32>
    %235 = tpu.matmul %234, %10, %cst_83 {dimension_numbers = #tpu.dot_dimension_numbers<[1], [0], [0], [1], [0, 0, 1, 1], [], []>} : vector<8x32xbf16>, vector<32x32xbf16>, vector<8x32xf32> -> vector<8x32xf32>
    %236 = arith.addf %1, %235 : vector<8x32xf32>
    %c0_84 = arith.constant 0 : index
    %c0_85 = arith.constant 0 : index
    %237 = vector.load %arg9[%c0_84, %c0_85] : memref<1x32xf32, #tpu.memory_space<vmem>>, vector<1x32xf32>
    %c0_86 = arith.constant 0 : index
    %c0_87 = arith.constant 0 : index
    %238 = vector.load %arg10[%c0_86, %c0_87] : memref<1x32xf32, #tpu.memory_space<vmem>>, vector<1x32xf32>
    %cst_88 = arith.constant dense<0.000000e+00> : vector<8xf32>
    %239 = vector.multi_reduction <add>, %236, %cst_88 [1] : vector<8x32xf32> to vector<8xf32>
    %240 = vector.shape_cast %239 : vector<8xf32> to vector<8x1xf32>
    %cst_89 = arith.constant 3.200000e+01 : f32
    %241 = vector.broadcast %cst_89 : f32 to vector<8x1xf32>
    %242 = arith.divf %240, %241 : vector<8x1xf32>
    %243 = vector.broadcast %242 : vector<8x1xf32> to vector<8x32xf32>
    %244 = arith.subf %236, %243 : vector<8x32xf32>
    %245 = arith.mulf %244, %244 : vector<8x32xf32>
    %cst_90 = arith.constant dense<0.000000e+00> : vector<8xf32>
    %246 = vector.multi_reduction <add>, %245, %cst_90 [1] : vector<8x32xf32> to vector<8xf32>
    %247 = vector.shape_cast %246 : vector<8xf32> to vector<8x1xf32>
    %cst_91 = arith.constant 3.200000e+01 : f32
    %248 = vector.broadcast %cst_91 : f32 to vector<8x1xf32>
    %249 = arith.divf %247, %248 : vector<8x1xf32>
    %250 = vector.broadcast %242 : vector<8x1xf32> to vector<8x32xf32>
    %251 = arith.subf %236, %250 : vector<8x32xf32>
    %cst_92 = arith.constant 9.99999974E-6 : f32
    %252 = vector.broadcast %cst_92 : f32 to vector<8x1xf32>
    %253 = arith.addf %249, %252 : vector<8x1xf32>
    %254 = math.rsqrt %253 : vector<8x1xf32>
    %255 = vector.broadcast %254 : vector<8x1xf32> to vector<8x32xf32>
    %256 = arith.mulf %251, %255 : vector<8x32xf32>
    %257 = vector.broadcast %237 : vector<1x32xf32> to vector<8x32xf32>
    %258 = arith.mulf %256, %257 : vector<8x32xf32>
    %259 = vector.broadcast %238 : vector<1x32xf32> to vector<8x32xf32>
    %260 = arith.addf %258, %259 : vector<8x32xf32>
    %261 = arith.truncf %260 : vector<8x32xf32> to vector<8x32xbf16>
    %c0_93 = arith.constant 0 : index
    %c0_94 = arith.constant 0 : index
    %262 = vector.load %arg11[%c0_93, %c0_94] : memref<32x128xbf16, #tpu.memory_space<vmem>>, vector<32x128xbf16>
    %cst_95 = arith.constant dense<0.000000e+00> : vector<8x128xf32>
    %263 = tpu.matmul %261, %262, %cst_95 {dimension_numbers = #tpu.dot_dimension_numbers<[1], [0], [0], [1], [0, 0, 1, 1], [], []>} : vector<8x32xbf16>, vector<32x128xbf16>, vector<8x128xf32> -> vector<8x128xf32>
    %c0_96 = arith.constant 0 : index
    %c0_97 = arith.constant 0 : index
    %264 = vector.load %arg12[%c0_96, %c0_97] : memref<1x128xf32, #tpu.memory_space<vmem>>, vector<1x128xf32>
    %265 = vector.broadcast %264 : vector<1x128xf32> to vector<8x128xf32>
    %266 = arith.addf %263, %265 : vector<8x128xf32>
    %cst_98 = arith.constant 0.000000e+00 : f32
    %267 = vector.broadcast %cst_98 : f32 to vector<8x128xf32>
    %268 = arith.cmpf oge, %266, %267 : vector<8x128xf32>
    %cst_99 = arith.constant 0.00999999977 : f32
    %269 = vector.broadcast %cst_99 : f32 to vector<8x128xf32>
    %270 = arith.mulf %269, %266 : vector<8x128xf32>
    %271 = arith.select %268, %266, %270 : vector<8x128xi1>, vector<8x128xf32>
    %272 = arith.truncf %271 : vector<8x128xf32> to vector<8x128xbf16>
    %c0_100 = arith.constant 0 : index
    %c0_101 = arith.constant 0 : index
    %273 = vector.load %arg13[%c0_100, %c0_101] : memref<128x32xbf16, #tpu.memory_space<vmem>>, vector<128x32xbf16>
    %cst_102 = arith.constant dense<0.000000e+00> : vector<8x32xf32>
    %274 = tpu.matmul %272, %273, %cst_102 {dimension_numbers = #tpu.dot_dimension_numbers<[1], [0], [0], [1], [0, 0, 1, 1], [], []>} : vector<8x128xbf16>, vector<128x32xbf16>, vector<8x32xf32> -> vector<8x32xf32>
    %c0_103 = arith.constant 0 : index
    %c0_104 = arith.constant 0 : index
    %275 = vector.load %arg14[%c0_103, %c0_104] : memref<1x32xf32, #tpu.memory_space<vmem>>, vector<1x32xf32>
    %276 = vector.broadcast %275 : vector<1x32xf32> to vector<8x32xf32>
    %277 = arith.addf %274, %276 : vector<8x32xf32>
    %278 = arith.addf %236, %277 : vector<8x32xf32>
    %c0_105 = arith.constant 0 : index
    %c0_106 = arith.constant 0 : index
    %c0_107 = arith.constant 0 : index
    %279 = vector.load %arg15[%c0_105, %c0_106, %c0_107] : memref<1x8x32xf32, #tpu.memory_space<vmem>>, vector<1x8x32xf32>
    %280 = vector.shape_cast %279 : vector<1x8x32xf32> to vector<8x32xf32>
    %281 = vector.shape_cast %278 : vector<8x32xf32> to vector<1x8x32xf32>
    tpu.vector_store %arg15[%c0_105, %c0_106, %c0_107], %281 {strides = array<i32>} : memref<1x8x32xf32, #tpu.memory_space<vmem>>, vector<1x8x32xf32>,
    return
  }
  func.func @transform_0(%arg0: i32) -> (i32, i32, i32) {
    %c0_i32 = arith.constant 0 : i32
    %c0_i32_0 = arith.constant 0 : i32
    %c0_i32_1 = arith.constant 0 : i32
    return %arg0, %c0_i32, %c0_i32_0 : i32, i32, i32
  }
  func.func @transform_1(%arg0: i32) -> (i32, i32, i32) {
    %c0_i32 = arith.constant 0 : i32
    %c0_i32_0 = arith.constant 0 : i32
    %c0_i32_1 = arith.constant 0 : i32
    return %arg0, %c0_i32, %c0_i32_0 : i32, i32, i32
  }
  func.func @transform_2(%arg0: i32) -> (i32, i32, i32) {
    %c0_i32 = arith.constant 0 : i32
    %c0_i32_0 = arith.constant 0 : i32
    %c0_i32_1 = arith.constant 0 : i32
    return %arg0, %c0_i32, %c0_i32_0 : i32, i32, i32
  }
  func.func @transform_3(%arg0: i32) -> (i32, i32) {
    %c0_i32 = arith.constant 0 : i32
    %c0_i32_0 = arith.constant 0 : i32
    %c0_i32_1 = arith.constant 0 : i32
    return %c0_i32, %c0_i32_0 : i32, i32
  }
  func.func @transform_4(%arg0: i32) -> (i32, i32) {
    %c0_i32 = arith.constant 0 : i32
    %c0_i32_0 = arith.constant 0 : i32
    %c0_i32_1 = arith.constant 0 : i32
    return %c0_i32, %c0_i32_0 : i32, i32
  }
  func.func @transform_5(%arg0: i32) -> (i32, i32) {
    %c0_i32 = arith.constant 0 : i32
    %c0_i32_0 = arith.constant 0 : i32
    %c0_i32_1 = arith.constant 0 : i32
    return %c0_i32, %c0_i32_0 : i32, i32
  }
  func.func @transform_6(%arg0: i32) -> (i32, i32) {
    %c0_i32 = arith.constant 0 : i32
    %c0_i32_0 = arith.constant 0 : i32
    %c0_i32_1 = arith.constant 0 : i32
    return %c0_i32, %c0_i32_0 : i32, i32
  }
  func.func @transform_7(%arg0: i32) -> (i32, i32) {
    %c0_i32 = arith.constant 0 : i32
    %c0_i32_0 = arith.constant 0 : i32
    %c0_i32_1 = arith.constant 0 : i32
    return %c0_i32, %c0_i32_0 : i32, i32
  }
  func.func @transform_8(%arg0: i32) -> (i32, i32) {
    %c0_i32 = arith.constant 0 : i32
    %c0_i32_0 = arith.constant 0 : i32
    %c0_i32_1 = arith.constant 0 : i32
    return %c0_i32, %c0_i32_0 : i32, i32
  }
  func.func @transform_9(%arg0: i32) -> (i32, i32) {
    %c0_i32 = arith.constant 0 : i32
    %c0_i32_0 = arith.constant 0 : i32
    %c0_i32_1 = arith.constant 0 : i32
    return %c0_i32, %c0_i32_0 : i32, i32
  }
  func.func @transform_10(%arg0: i32) -> (i32, i32) {
    %c0_i32 = arith.constant 0 : i32
    %c0_i32_0 = arith.constant 0 : i32
    %c0_i32_1 = arith.constant 0 : i32
    return %c0_i32, %c0_i32_0 : i32, i32
  }
  func.func @transform_11(%arg0: i32) -> (i32, i32) {
    %c0_i32 = arith.constant 0 : i32
    %c0_i32_0 = arith.constant 0 : i32
    %c0_i32_1 = arith.constant 0 : i32
    return %c0_i32, %c0_i32_0 : i32, i32
  }
  func.func @transform_12(%arg0: i32) -> (i32, i32) {
    %c0_i32 = arith.constant 0 : i32
    %c0_i32_0 = arith.constant 0 : i32
    %c0_i32_1 = arith.constant 0 : i32
    return %c0_i32, %c0_i32_0 : i32, i32
  }
  func.func @transform_13(%arg0: i32) -> (i32, i32) {
    %c0_i32 = arith.constant 0 : i32
    %c0_i32_0 = arith.constant 0 : i32
    %c0_i32_1 = arith.constant 0 : i32
    return %c0_i32, %c0_i32_0 : i32, i32
  }
  func.func @transform_14(%arg0: i32) -> (i32, i32, i32) {
    %c0_i32 = arith.constant 0 : i32
    %c0_i32_0 = arith.constant 0 : i32
    %c0_i32_1 = arith.constant 0 : i32
    return %arg0, %c0_i32, %c0_i32_0 : i32, i32, i32
  }
}

</mosaic_0001>

<bundles_post_ra>
// kernel: tpu_custom_call.1
= control target key start
LH: loop header
LB: loop body
LE: loop exit
PB: predicated region body
PF: predicated region fallthrough
CT: control target
= control target key end

     0   :  { %s4318_s0 = inlined_call_operand.hbm [shape: f32[2,8,32], index: 0, kind: input, shape index: {}]   ;;  %s4319_s1 = inlined_call_operand.hbm [shape: f32[2,8,32], index: 1, kind: input, shape index: {}]   ;;  %s4320_s2 = inlined_call_operand.hbm [shape: s8[2,8,8], index: 2, kind: input, shape index: {}]   ;;  %s4321_s3 = inlined_call_operand.hbm [shape: bf16[32,64], index: 3, kind: input, shape index: {}]   ;;  %s4322_s4 = inlined_call_operand.hbm [shape: bf16[32,32], index: 4, kind: input, shape index: {}]   ;;  %s4323_s5 = inlined_call_operand.hbm [shape: bf16[32,32], index: 5, kind: input, shape index: {}]   ;;  %s4324_s6 = inlined_call_operand.hbm [shape: f32[1,32], index: 6, kind: input, shape index: {}]   ;;  %s4325_s7 = inlined_call_operand.hbm [shape: f32[1,32], index: 7, kind: input, shape index: {}]   ;;  %s4326_s8 = inlined_call_operand.hbm [shape: f32[1,32], index: 8, kind: input, shape index: {}]   ;;  %s4327_s9 = inlined_call_operand.hbm [shape: f32[1,32], index: 9, kind: input, shape index: {}]   ;;  %s4328_s10 = inlined_call_operand.hbm [shape: bf16[32,128], index: 10, kind: input, shape index: {}]   ;;  %s4329_s11 = inlined_call_operand.hbm [shape: f32[1,128], index: 11, kind: input, shape index: {}]   ;;  %s4330_s12 = inlined_call_operand.hbm [shape: bf16[128,32], index: 12, kind: input, shape index: {}]   ;;  %s4331_s13 = inlined_call_operand.hbm [shape: f32[1,32], index: 13, kind: input, shape index: {}]   ;;  %s4332_s14 = inlined_call_operand.hbm [shape: f32[2,8,32], index: 14, kind: output, shape index: {}]  }
   0x1   :  { %4360 = sst [smem:[#allocation40_spill]] %s4318_s0 }
   0x2   :  { %4361 = sst [smem:[#allocation41_spill]] %s4319_s1 }
   0x3   :  { %4362 = sst [smem:[#allocation42_spill]] %s4320_s2 }
   0x4   :  { %4363 = sst [smem:[#allocation43_spill]] %s4321_s3 }
   0x5   :  { %4364 = sst [smem:[#allocation44_spill]] %s4322_s4 }
   0x6   :  { %4365 = sst [smem:[#allocation45_spill]] %s4323_s5 }
   0x7   :  { %4366 = sst [smem:[#allocation46_spill]] %s4324_s6 }
   0x8   :  { %4367 = sst [smem:[#allocation47_spill]] %s4325_s7 }
   0x9   :  { %4368 = sst [smem:[#allocation48_spill]] %s4326_s8 }
   0xa   :  { %4369 = sst [smem:[#allocation49_spill]] %s4327_s9 }
   0xb   :  { %4370 = sst [smem:[#allocation50_spill]] %s4329_s11 }
   0xc   :  { %4371 = sst [smem:[#allocation51_spill]] %s4330_s12 }
   0xd   :  { %4372 = sst [smem:[#allocation52_spill]] %s4331_s13 }
   0xe   :  { %4373 = sst [smem:[#allocation53_spill]] %s4332_s14 }
   0xf   :  { %19 = vsyncpa [#allocation4], 0 }
  0x10   :  { %21 = vsyncpa [#allocation4 + $0x1], 0 }
  0x11   :  { %22 = vsyncpa [#allocation7], 0 }
  0x12   :  { %24 = vsyncpa [#allocation7 + $0x1], 0 }
  0x13   :  { %25 = vsyncpa [#allocation10], 0 }
  0x14   :  { %26 = vsyncpa [#allocation13], 0 }
  0x15   :  { %27 = vsyncpa [#allocation16], 0 }
  0x16   :  { %28 = vsyncpa [#allocation19], 0 }
  0x17   :  { %29 = vsyncpa [#allocation22], 0 }
  0x18   :  { %30 = vsyncpa [#allocation25], 0 }
  0x19   :  { %31 = vsyncpa [#allocation5], 0 }
  0x1a   :  { %33 = vsyncpa [#allocation5 + $0x1], 0  ;;  %s3574_s29 = smov 0   ;;  %s3576_s30 = smov 0  }
  0x1b   :  { %s3578_s15 = smov 0   ;;  %s3580_s16 = smov 0  }
  0x1c LB: > { %4374 = sst [smem:[#allocation36_spill]] %s3463_s15  ;;  %s3469_s17 = smov [#allocation9]   ;;  %s3467_s16 = sphi %s3580_s16, %s4431_s16   ;;  %s3463_s15 = sphi %s3578_s15, %s4436_s15   ;;  %s3459_s30 = sphi %s3576_s30, %s4435_s30   ;;  %s3455_s29 = sphi %s3574_s29, %s4434_s29  }
  0x1d   : > { %s391_s18 = sshll.u32 %s3469_s17, 4  ;;  %s3595_s19 = sadd.s32 4294967295, %s3467_s16   ;;  %s3600_s18 = int_to_ptr.vmem [resolvable:$true] %s391_s18 }
  0x1e   : > { %p2421_p0 = scmp.ge.s32.totalorder %s3467_s16, 1  ;;  %p4341_p1 = scmp.eq.s32.totalorder %s3595_s19, 0 }
  0x1f   : > { %p379_p2 = scmp.lt.s32.totalorder %s3467_s16, 3  ;;  %s3470_s21 = smov [#allocation12]  }
  0x20   : > { %s417_s22 = sshll.u32 %s3470_s21, 4  ;;  %s3471_s24 = smov [#allocation15]   ;;  %s3615_s22 = int_to_ptr.vmem [resolvable:$true] %s417_s22 }
  0x21   : > { %p3602_p3 = pnand %p2421_p0, %p379_p2  ;;  %s442_s25 = sshll.u32 %s3471_s24, 4  ;;  %s3617_s25 = int_to_ptr.vmem [resolvable:$true] %s442_s25 }
  0x22   : > { %s4378_s3 = sld [smem:[#allocation43_spill]] }
  0x23   : > { %s4375_s20 = scalar_select %p3602_p3, 1, 0 }
  0x24   : > { %p2791_p5 = pneg %p3602_p3 }
  0x25   : > { %4376 = sst [smem:[#allocation37_spill]] %s4375_s20 }
  0x26   : > { %p3611_p6 = pnand %p2791_p5, %p4341_p1 }
  0x28   : > { %s4377_s23 = scalar_select %p3611_p6, 1, 0 }
  0x29   : > { %s2975_s28 = scalar_lea.hbm %s4378_s3, 256  ;;  %p3627_p8 = pneg %p3611_p6 }
  0x2a   : > { %p2976_p7 = scmp.ne.s32.totalorder %s4378_s3, %s2975_s28  ;;  %p2982_p11 = scmp.lt.u32.totalorder %s2975_s28, %s4378_s3 }
  0x2b   : > { %s4379_s21 = scalar_select %p3627_p8, 1, 0 }
  0x2c   : > { %p2978_p9 = pnand %p3627_p8, %p2976_p7 }
  0x2e   : > { %p2979_p10 = pneg %p2978_p9 }
  0x30   : > { %p2984_p12 = pnand %p2982_p11, %p2979_p10 }
  0x32   : > { %2987 = shalt.err (!%p2984_p12)
}
  0x33   : > { %s2988_s14 = scalar_lea.vmem %s3600_s18, 256  ;;  %p2996_p5 = scmp.lt.s32.totalorder %s3600_s18, %s3600_s18 }
  0x34   : > { %p2989_p13 = scmp.ne.s32.totalorder %s3600_s18, %s2988_s14  ;;  %p2997_p4 = scmp.lt.s32.totalorder %s2988_s14, %s2988_s14 }
  0x36   : > { %p2991_p0 = pnand %p2989_p13, %p3627_p8  ;;  %p2998_p7 = por %p2997_p4, %p2996_p5 }
  0x38   : > { %p2992_p2 = pneg %p2991_p0 }
  0x3a   : > { %p2999_p9 = pnand %p2998_p7, %p2992_p2 }
  0x3c   : > { %3002 = shalt.err (!%p2999_p9)
}
  0x3d   : > { %s4339_s26 = smov 64   ;;  %s4343_s20 = smov 4  }
  0x3e   : > { %2794 = dma.hbm_to_vmem [thread:$0]  (!%p3611_p6), %s4378_s3, 256, %s3600_s18, [#allocation10], %s4339_s26, %s4339_s26, %s4343_s20  }
  0x3f   : > { %s4380_s5 = sld [smem:[#allocation45_spill]] }
  0x45   : > { %s3003_s14 = scalar_lea.hbm %s4380_s5, 256 }
  0x46   : > { %p3004_p4 = scmp.ne.s32.totalorder %s4380_s5, %s3003_s14  ;;  %p3010_p12 = scmp.lt.u32.totalorder %s3003_s14, %s4380_s5 }
  0x48   : > { %p3006_p10 = pnand %p3004_p4, %p3627_p8 }
  0x4a   : > { %p3007_p11 = pneg %p3006_p10 }
  0x4c   : > { %p3012_p13 = pnand %p3010_p12, %p3007_p11 }
  0x4e   : > { %3015 = shalt.err (!%p3012_p13)
}
  0x4f   : > { %s3016_s18 = scalar_lea.vmem %s3615_s22, 256  ;;  %p3024_p7 = scmp.lt.s32.totalorder %s3615_s22, %s3615_s22 }
  0x50   : > { %p3017_p0 = scmp.ne.s32.totalorder %s3615_s22, %s3016_s18  ;;  %p3025_p9 = scmp.lt.s32.totalorder %s3016_s18, %s3016_s18 }
  0x52   : > { %p3019_p2 = pnand %p3017_p0, %p3627_p8  ;;  %p3026_p4 = por %p3025_p9, %p3024_p7 }
  0x54   : > { %p3020_p5 = pneg %p3019_p2 }
  0x56   : > { %p3027_p10 = pnand %p3026_p4, %p3020_p5 }
  0x58   : > { %3030 = shalt.err (!%p3027_p10)
}
  0x59   : > { %2800 = dma.hbm_to_vmem [thread:$0]  (!%p3611_p6), %s4380_s5, 256, %s3615_s22, [#allocation13], %s4339_s26, %s4339_s26, %s4343_s20  }
  0x5a   : > { %s4381_s7 = sld [smem:[#allocation47_spill]] }
  0x60   : > { %s3031_s27 = scalar_lea.hbm %s4381_s7, 16 }
  0x61   : > { %p3032_p11 = scmp.ne.s32.totalorder %s4381_s7, %s3031_s27  ;;  %p3038_p0 = scmp.lt.u32.totalorder %s3031_s27, %s4381_s7 }
  0x63   : > { %p3034_p12 = pnand %p3032_p11, %p3627_p8 }
  0x65   : > { %p3035_p13 = pneg %p3034_p12 }
  0x67   : > { %p3040_p2 = pnand %p3038_p0, %p3035_p13 }
  0x69   : > { %3043 = shalt.err (!%p3040_p2)
}
  0x6a   : > { %s3044_s22 = scalar_lea.vmem %s3617_s25, 16  ;;  %s3051_s18 = scalar_lea.vmem %s3617_s25, 32 }
  0x6b   : > { %p3045_p5 = scmp.ne.s32.totalorder %s3617_s25, %s3044_s22  ;;  %p3052_p4 = scmp.lt.s32.totalorder %s3617_s25, %s3617_s25 }
  0x6c   : > { %p3053_p10 = scmp.lt.s32.totalorder %s3051_s18, %s3044_s22 }
  0x6d   : > { %p3047_p7 = pnand %p3045_p5, %p3627_p8 }
  0x6e   : > { %p3054_p11 = por %p3053_p10, %p3052_p4 }
  0x6f   : > { %p3048_p9 = pneg %p3047_p7 }
  0x71   : > { %p3055_p12 = pnand %p3054_p11, %p3048_p9 }
  0x73   : > { %3058 = shalt.err (!%p3055_p12)
}
  0x74   : > { %2806 = dma.hbm_to_vmem [thread:$0]  (!%p3611_p6), %s4381_s7, 16, %s3617_s25, [#allocation16]  }
  0x75   : > { %s3474_s12 = smov [#allocation18]   ;;  %s3475_s27 = smov [#allocation21]  }
  0x76   : > { %s464_s13 = sshll.u32 %s3474_s12, 4  ;;  %s488_s28 = sshll.u32 %s3475_s27, 4  ;;  %s465_s13 = int_to_ptr.vmem [resolvable:$true] %s464_s13  ;;  %s489_s28 = int_to_ptr.vmem [resolvable:$true] %s488_s28 }
  0x77   : > { %s4382_s9 = sld [smem:[#allocation49_spill]] }
  0x7d   : > { %s3059_s14 = scalar_lea.hbm %s4382_s9, 16 }
  0x7e   : > { %p3060_p13 = scmp.ne.s32.totalorder %s4382_s9, %s3059_s14  ;;  %p3066_p5 = scmp.lt.u32.totalorder %s3059_s14, %s4382_s9 }
  0x80   : > { %p3062_p0 = pnand %p3060_p13, %p3627_p8 }
  0x82   : > { %p3063_p2 = pneg %p3062_p0 }
  0x84   : > { %p3068_p7 = pnand %p3066_p5, %p3063_p2 }
  0x86   : > { %3071 = shalt.err (!%p3068_p7)
}
  0x87   : > { %s3072_s25 = scalar_lea.vmem %s465_s13, 16  ;;  %s3079_s2 = scalar_lea.vmem %s465_s13, 32 }
  0x88   : > { %p3073_p9 = scmp.ne.s32.totalorder %s465_s13, %s3072_s25  ;;  %p3080_p11 = scmp.lt.s32.totalorder %s465_s13, %s465_s13 }
  0x89   : > { %p3081_p12 = scmp.lt.s32.totalorder %s3079_s2, %s3072_s25 }
  0x8a   : > { %p3075_p4 = pnand %p3073_p9, %p3627_p8 }
  0x8b   : > { %p3082_p1 = por %p3081_p12, %p3080_p11 }
  0x8c   : > { %p3076_p10 = pneg %p3075_p4 }
  0x8e   : > { %p3083_p3 = pnand %p3082_p1, %p3076_p10 }
  0x90   : > { %3086 = shalt.err (!%p3083_p3)
}
  0x91   : > { %2812 = dma.hbm_to_vmem [thread:$0]  (!%p3611_p6), %s4382_s9, 16, %s465_s13, [#allocation19]  }
  0x92   : > { %s4383_s11 = sld [smem:[#allocation50_spill]] }
  0x98   : > { %s3087_s24 = scalar_lea.hbm %s4383_s11, 16 }
  0x99   : > { %p3088_p13 = scmp.ne.s32.totalorder %s4383_s11, %s3087_s24  ;;  %p3094_p3 = scmp.lt.u32.totalorder %s3087_s24, %s4383_s11 }
  0x9b   : > { %p3090_p0 = pnand %p3088_p13, %p3627_p8 }
  0x9d   : > { %p3091_p1 = pneg %p3090_p0 }
  0x9f   : > { %p3096_p2 = pnand %p3094_p3, %p3091_p1 }
  0xa1   : > { %3099 = shalt.err (!%p3096_p2)
}
  0xa2   : > { %s3100_s25 = scalar_lea.vmem %s489_s28, 16  ;;  %s3107_s13 = scalar_lea.vmem %s489_s28, 32 }
  0xa3   : > { %p3101_p5 = scmp.ne.s32.totalorder %s489_s28, %s3100_s25  ;;  %p3108_p4 = scmp.lt.s32.totalorder %s489_s28, %s489_s28 }
  0xa4   : > { %p3109_p10 = scmp.lt.s32.totalorder %s3107_s13, %s3100_s25 }
  0xa5   : > { %p3103_p7 = pnand %p3101_p5, %p3627_p8 }
  0xa6   : > { %p3110_p11 = por %p3109_p10, %p3108_p4 }
  0xa7   : > { %p3104_p9 = pneg %p3103_p7 }
  0xa9   : > { %p3111_p12 = pnand %p3110_p11, %p3104_p9 }
  0xab   : > { %3114 = shalt.err (!%p3111_p12)
}
  0xac   : > { %2818 = dma.hbm_to_vmem [thread:$0]  (!%p3611_p6), %s4383_s11, 16, %s489_s28, [#allocation22]  }
  0xad   : > { %s2420_s27 = sadd.s32 4294967294, %s3467_s16   ;;  %s3739_s26 = sadd.s32 1, %s3467_s16  }
  0xae   : > { %4384 = sst [smem:[#allocation38_spill]] %s3739_s26  ;;  %s46_s17 = sadd.s32 1, %s3463_s15 }
  0xaf   : > { %s43_s24 = ssub.s32 %s3467_s16, %s3739_s26  ;;  %p53_p13 = scmp.ne.s32.totalorder %s3463_s15, %s3459_s30 }
  0xb0   : > { %p44_p0 = scmp.eq.s32.totalorder %s43_s24, 0  ;;  %p54_p1 = scmp.eq.s32.totalorder %s3467_s16, 0 }
  0xb1   : > { %p59_p3 = scmp.ne.s32.totalorder %s3459_s30, %s3455_s29  ;;  %p366_p2 = scmp.eq.s32.totalorder %s3595_s19, 1 }
  0xb2   : > { %s3751_s14 = scalar_select %p44_p0, %s3463_s15, %s46_s17  }
  0xb3   : > { %p55_p5 = por %p54_p1, %p53_p13  ;;  %p4386_p7 = scmp.eq.s32.totalorder %s3595_s19, 0 }
  0xb4   : > { %4385 = sst [smem:[#allocation39_spill]] %s3751_s14  ;;  %p3759_p4 = por %p366_p2, %p53_p13 }
  0xb5   : > { %p3755_p9 = por %p4386_p7, %p59_p3  ;;  %p372_p10 = scmp.eq.s32.totalorder %s2420_s27, 1 }
  0xb6   : > { %s4388_s22 = scalar_select %p3759_p4, 1, 0 }
  0xb7   : > { %s4387_s28 = scalar_select %p3755_p9, 1, 0 }
  0xb8   : > { %p2850_p11 = scmp.lt.s32.totalorder %s3467_s16, 2  ;;  %s3765_s18 = sand.u32 1, %s3463_s15  }
  0xb9   : > { %p3767_p12 = por %p372_p10, %p59_p3  ;;  %s4345_s25 = sshll.u32 %s3765_s18, 3 }
  0xba   : > { %s4346_s13 = sshll.u32 %s3467_s16, 7  ;;  %p3773_p0 = pnand %p2850_p11, %p55_p5 }
  0xbb   : > { %s4389_s0 = scalar_select %p3767_p12, 1, 0 }
  0xbc   : > { %s4390_s2 = scalar_select %p3773_p0, 1, 0 }
  0xbd   : > { %s541_s12 = sand.u32 1, %s3467_s16   ;;  %s4391_s1 = sld [smem:[#allocation41_spill]] }
  0xbe   : > { %s545_s20 = scalar_lea.vmem [#allocation6], %s4345_s25  ;;  %s3789_s5 = scalar_lea.sflag [#allocation7], %s541_s12 }
  0xbf   : > { %s552_s3 = sshll.u32 %s545_s20, 4  ;;  %p3795_p1 = pneg %p3773_p0  ;;  %s3787_s3 = int_to_ptr.vmem [resolvable:$true] %s552_s3 }
  0xc1   : > { %s4392_s9 = scalar_select %p3795_p1, 1, 0 }
  0xc3   : > { %s3783_s24 = scalar_lea.hbm %s4391_s1, %s4346_s13  ;;  %s3120_s25 = scalar_lea.hbm %s4391_s1, 256 }
  0xc4   : > { %s3115_s7 = scalar_lea.hbm %s3783_s24, 128  ;;  %p3121_p5 = scmp.lt.u32.totalorder %s3783_s24, %s4391_s1 }
  0xc5   : > { %p3116_p13 = scmp.ne.s32.totalorder %s3783_s24, %s3115_s7  ;;  %p3122_p7 = scmp.lt.u32.totalorder %s3120_s25, %s3115_s7 }
  0xc6   : > { %p3124_p11 = scmp.lt.u32.totalorder %s3115_s7, %s3783_s24 }
  0xc7   : > { %p3118_p3 = pnand %p3795_p1, %p3116_p13  ;;  %p3123_p10 = por %p3122_p7, %p3121_p5 }
  0xc9   : > { %p3119_p2 = pneg %p3118_p3  ;;  %p3125_p12 = por %p3124_p11, %p3123_p10 }
  0xcb   : > { %p3126_p4 = pnand %p3125_p12, %p3119_p2 }
  0xcd   : > { %3129 = shalt.err (!%p3126_p4)
}
  0xce   : > { %s3130_s12 = scalar_lea.vmem %s3787_s3, 128  ;;  %s3476_s17 = smov [#allocation6]  }
  0xcf   : > { %p3131_p13 = scmp.ne.s32.totalorder %s3787_s3, %s3130_s12  ;;  %s3135_s27 = sshll.u32 %s3476_s17, 4  ;;  %s3136_s27 = int_to_ptr.vmem [resolvable:$false] %s3135_s27 }
  0xd0   : > { %s3137_s13 = scalar_lea.vmem %s3136_s27, 256  ;;  %p3138_p6 = scmp.lt.s32.totalorder %s3787_s3, %s3136_s27 }
  0xd1   : > { %p3133_p3 = pnand %p3131_p13, %p3795_p1  ;;  %p3139_p8 = scmp.lt.s32.totalorder %s3137_s13, %s3130_s12 }
  0xd3   : > { %p3134_p9 = pneg %p3133_p3  ;;  %p3140_p5 = por %p3139_p8, %p3138_p6 }
  0xd5   : > { %p3141_p7 = pnand %p3140_p5, %p3134_p9 }
  0xd7   : > { %3144 = shalt.err (!%p3141_p7)
}
  0xd8   : > { %2831 = dma.hbm_to_vmem [thread:$0]  (!%p3773_p0), %s3783_s24, 128, %s3787_s3, %s3789_s5  }
  0xd9   : > { %s3477_s7 = smov [#allocation11]   ;;  %s3478_s20 = smov [#allocation14]  }
  0xda   : > { %s404_s25 = sshll.u32 %s3477_s7, 4  ;;  %s431_s1 = sshll.u32 %s3478_s20, 4  ;;  %s405_s25 = int_to_ptr.vmem [resolvable:$true] %s404_s25  ;;  %s432_s1 = int_to_ptr.vmem [resolvable:$true] %s431_s1 }
  0xdb   : > { %s4393_s4 = sld [smem:[#allocation44_spill]]  ;;  %p4394_p8 = scmp.ne.s32.totalorder %s4379_s21, 0 }
  0xe1   : > { %s3145_s27 = scalar_lea.hbm %s4393_s4, 256 }
  0xe2   : > { %p3146_p6 = scmp.ne.s32.totalorder %s4393_s4, %s3145_s27  ;;  %p3152_p12 = scmp.lt.u32.totalorder %s3145_s27, %s4393_s4 }
  0xe4   : > { %p3148_p9 = pnand %p3146_p6, %p4394_p8 }
  0xe6   : > { %p3149_p4 = pneg %p3148_p9 }
  0xe8   : > { %p3154_p2 = pnand %p3152_p12, %p3149_p4 }
  0xea   : > { %3157 = shalt.err (!%p3154_p2)
}
  0xeb   : > { %s3158_s3 = scalar_lea.vmem %s405_s25, 256  ;;  %p3166_p3 = scmp.lt.s32.totalorder %s405_s25, %s405_s25 }
  0xec   : > { %p3159_p10 = scmp.ne.s32.totalorder %s405_s25, %s3158_s3  ;;  %p3167_p5 = scmp.lt.s32.totalorder %s3158_s3, %s3158_s3 }
  0xee   : > { %p3161_p11 = pnand %p3159_p10, %p4394_p8  ;;  %p3168_p7 = por %p3167_p5, %p3166_p3 }
  0xf0   : > { %p3162_p13 = pneg %p3161_p11 }
  0xf2   : > { %p3169_p0 = pnand %p3168_p7, %p3162_p13 }
  0xf4   : > { %3172 = shalt.err (!%p3169_p0)
}
  0xf5   : > { %p4395_p6 = scmp.ne.s32.totalorder %s4377_s23, 0  ;;  %s4396_s11 = smov 4  }
  0xf6   : > { %s4397_s24 = smov 64   ;;  %s4398_s6 = sld [smem:[#allocation46_spill]] }
  0xf7   : > { %2797 = dma.hbm_to_vmem [thread:$0]  (!%p4395_p6), %s4393_s4, 256, %s405_s25, [#allocation10], %s4397_s24, %s4397_s24, %s4396_s11  }
  0xfc   : > { %s3173_s17 = scalar_lea.hbm %s4398_s6, 16 }
  0xfd   : > { %p3174_p9 = scmp.ne.s32.totalorder %s4398_s6, %s3173_s17  ;;  %p3180_p12 = scmp.lt.u32.totalorder %s3173_s17, %s4398_s6 }
  0xff   : > { %p3176_p0 = pnand %p3174_p9, %p4394_p8 }
 0x101   : > { %p3177_p4 = pneg %p3176_p0 }
 0x103   : > { %p3182_p2 = pnand %p3180_p12, %p3177_p4 }
 0x105   : > { %3185 = shalt.err (!%p3182_p2)
}
 0x106   : > { %s3186_s15 = scalar_lea.vmem %s432_s1, 16  ;;  %s3193_s25 = scalar_lea.vmem %s432_s1, 32 }
 0x107   : > { %p3187_p10 = scmp.ne.s32.totalorder %s432_s1, %s3186_s15  ;;  %p3194_p3 = scmp.lt.s32.totalorder %s432_s1, %s432_s1 }
 0x108   : > { %p3195_p5 = scmp.lt.s32.totalorder %s3193_s25, %s3186_s15 }
 0x109   : > { %p3189_p11 = pnand %p3187_p10, %p4394_p8 }
 0x10a   : > { %p3196_p7 = por %p3195_p5, %p3194_p3 }
 0x10b   : > { %p3190_p13 = pneg %p3189_p11 }
 0x10d   : > { %p3197_p1 = pnand %p3196_p7, %p3190_p13 }
 0x10f   : > { %3200 = shalt.err (!%p3197_p1)
}
 0x110   : > { %2803 = dma.hbm_to_vmem [thread:$0]  (!%p4395_p6), %s4398_s6, 16, %s432_s1, [#allocation13]  }
 0x111   : > { %s3479_s20 = smov [#allocation17]   ;;  %s3480_s27 = smov [#allocation20]  }
 0x112   : > { %s453_s17 = sshll.u32 %s3479_s20, 4  ;;  %s474_s12 = sshll.u32 %s3480_s27, 4  ;;  %s454_s17 = int_to_ptr.vmem [resolvable:$true] %s453_s17  ;;  %s475_s12 = int_to_ptr.vmem [resolvable:$true] %s474_s12 }
 0x113   : > { %s4399_s8 = sld [smem:[#allocation48_spill]] }
 0x119   : > { %s3201_s4 = scalar_lea.hbm %s4399_s8, 16 }
 0x11a   : > { %p3202_p1 = scmp.ne.s32.totalorder %s4399_s8, %s3201_s4  ;;  %p3208_p4 = scmp.lt.u32.totalorder %s3201_s4, %s4399_s8 }
 0x11c   : > { %p3204_p9 = pnand %p3202_p1, %p4394_p8 }
 0x11e   : > { %p3205_p0 = pneg %p3204_p9 }
 0x120   : > { %p3210_p12 = pnand %p3208_p4, %p3205_p0 }
 0x122   : > { %3213 = shalt.err (!%p3210_p12)
}
 0x123   : > { %s3214_s1 = scalar_lea.vmem %s454_s17, 16  ;;  %s3221_s7 = scalar_lea.vmem %s454_s17, 32 }
 0x124   : > { %p3215_p2 = scmp.ne.s32.totalorder %s454_s17, %s3214_s1  ;;  %p3222_p13 = scmp.lt.s32.totalorder %s454_s17, %s454_s17 }
 0x125   : > { %p3223_p3 = scmp.lt.s32.totalorder %s3221_s7, %s3214_s1 }
 0x126   : > { %p3217_p10 = pnand %p3215_p2, %p4394_p8 }
 0x127   : > { %p3224_p5 = por %p3223_p3, %p3222_p13 }
 0x128   : > { %p3218_p11 = pneg %p3217_p10 }
 0x12a   : > { %p3225_p7 = pnand %p3224_p5, %p3218_p11 }
 0x12c   : > { %3228 = shalt.err (!%p3225_p7)
}
 0x12d   : > { %2809 = dma.hbm_to_vmem [thread:$0]  (!%p4395_p6), %s4399_s8, 16, %s454_s17, [#allocation16]  }
 0x12e   : > { %s3229_s13 = scalar_lea.hbm %s4328_s10, 256 }
 0x12f   : > { %p3230_p1 = scmp.ne.s32.totalorder %s4328_s10, %s3229_s13  ;;  %p3236_p4 = scmp.lt.u32.totalorder %s3229_s13, %s4328_s10 }
 0x131   : > { %p3232_p9 = pnand %p3230_p1, %p4394_p8 }
 0x133   : > { %p3233_p0 = pneg %p3232_p9 }
 0x135   : > { %p3238_p12 = pnand %p3236_p4, %p3233_p0 }
 0x137   : > { %3241 = shalt.err (!%p3238_p12)
}
 0x138   : > { %s3242_s1 = scalar_lea.vmem %s475_s12, 256  ;;  %p3250_p13 = scmp.lt.s32.totalorder %s475_s12, %s475_s12 }
 0x139   : > { %p3243_p2 = scmp.ne.s32.totalorder %s475_s12, %s3242_s1  ;;  %p3251_p3 = scmp.lt.s32.totalorder %s3242_s1, %s3242_s1 }
 0x13b   : > { %p3245_p10 = pnand %p3243_p2, %p4394_p8  ;;  %p3252_p5 = por %p3251_p3, %p3250_p13 }
 0x13d   : > { %p3246_p11 = pneg %p3245_p10 }
 0x13f   : > { %p3253_p7 = pnand %p3252_p5, %p3246_p11 }
 0x141   : > { %3256 = shalt.err (!%p3253_p7)
}
 0x142   : > { %2815 = dma.hbm_to_vmem [thread:$0]  (!%p4395_p6), %s4328_s10, 256, %s475_s12, [#allocation19], %s4397_s24, %s4397_s24, %s4396_s11  }
 0x143   : > { %s3481_s20 = smov [#allocation23]   ;;  %s3482_s4 = smov [#allocation24]  }
 0x144   : > { %s498_s27 = sshll.u32 %s3481_s20, 4  ;;  %s512_s26 = sshll.u32 %s3482_s4, 4  ;;  %s499_s27 = int_to_ptr.vmem [resolvable:$true] %s498_s27  ;;  %s513_s26 = int_to_ptr.vmem [resolvable:$true] %s512_s26 }
 0x145   : > { %s4400_s15 = sld [smem:[#allocation51_spill]] }
 0x14b   : > { %s4401_s25 = smov %s4400_s15  ;;  %s3257_s14 = scalar_lea.hbm %s4400_s15, 1024 }
 0x14c   : > { %p3258_p1 = scmp.ne.s32.totalorder %s4401_s25, %s3257_s14  ;;  %p3264_p4 = scmp.lt.u32.totalorder %s3257_s14, %s4401_s25 }
 0x14e   : > { %p3260_p9 = pnand %p3258_p1, %p4394_p8 }
 0x150   : > { %p3261_p0 = pneg %p3260_p9 }
 0x152   : > { %p3266_p12 = pnand %p3264_p4, %p3261_p0 }
 0x154   : > { %3269 = shalt.err (!%p3266_p12)
}
 0x155   : > { %s3270_s12 = scalar_lea.vmem %s499_s27, 1024  ;;  %p3278_p13 = scmp.lt.s32.totalorder %s499_s27, %s499_s27 }
 0x156   : > { %p3271_p2 = scmp.ne.s32.totalorder %s499_s27, %s3270_s12  ;;  %p3279_p3 = scmp.lt.s32.totalorder %s3270_s12, %s3270_s12 }
 0x158   : > { %p3273_p10 = pnand %p3271_p2, %p4394_p8  ;;  %p3280_p5 = por %p3279_p3, %p3278_p13 }
 0x15a   : > { %p3274_p11 = pneg %p3273_p10 }
 0x15c   : > { %p3281_p7 = pnand %p3280_p5, %p3274_p11 }
 0x15e   : > { %3284 = shalt.err (!%p3281_p7)
}
 0x15f   : > { %2821 = dma.hbm_to_vmem [thread:$0]  (!%p4395_p6), %s4401_s25, 1024, %s499_s27, [#allocation22], %s4397_s24, %s4397_s24, %s4396_s11  }
 0x160   : > { %s4402_s4 = sld [smem:[#allocation52_spill]] }
 0x166   : > { %s3285_s13 = scalar_lea.hbm %s4402_s4, 16 }
 0x167   : > { %p3286_p1 = scmp.ne.s32.totalorder %s4402_s4, %s3285_s13  ;;  %p3292_p4 = scmp.lt.u32.totalorder %s3285_s13, %s4402_s4 }
 0x169   : > { %p3288_p9 = pnand %p3286_p1, %p4394_p8 }
 0x16b   : > { %p3289_p0 = pneg %p3288_p9 }
 0x16d   : > { %p3294_p12 = pnand %p3292_p4, %p3289_p0 }
 0x16f   : > { %3297 = shalt.err (!%p3294_p12)
}
 0x170   : > { %s3298_s17 = scalar_lea.vmem %s513_s26, 16  ;;  %s3305_s11 = scalar_lea.vmem %s513_s26, 32 }
 0x171   : > { %p3299_p2 = scmp.ne.s32.totalorder %s513_s26, %s3298_s17  ;;  %p3306_p13 = scmp.lt.s32.totalorder %s513_s26, %s513_s26 }
 0x172   : > { %p3307_p3 = scmp.lt.s32.totalorder %s3305_s11, %s3298_s17 }
 0x173   : > { %p3301_p10 = pnand %p3299_p2, %p4394_p8 }
 0x174   : > { %p3308_p5 = por %p3307_p3, %p3306_p13 }
 0x175   : > { %p3302_p11 = pneg %p3301_p10 }
 0x177   : > { %p3309_p7 = pnand %p3308_p5, %p3302_p11 }
 0x179   : > { %3312 = shalt.err (!%p3309_p7)
}
 0x17a   : > { %2824 = dma.hbm_to_vmem [thread:$0]  (!%p4395_p6), %s4402_s4, 16, %s513_s26, [#allocation25]  }
 0x17b   : > { %s4403_s21 = sshll.u32 %s3467_s16, 7  ;;  %s4404_s8 = sld [smem:[#allocation40_spill]] }
 0x17c   : > { %s4405_s20 = sshll.u32 %s3765_s18, 3  ;;  %s2438_s3 = sshll.u32 %s3765_s18, 1 }
 0x17d   : > { %s527_s23 = scalar_lea.vmem [#allocation3], %s4405_s20  ;;  %s524_s15 = scalar_lea.sflag [#allocation4], %s3765_s18 }
 0x17e   : > { %s534_s13 = sshll.u32 %s527_s23, 4  ;;  %p4406_p1 = scmp.ne.s32.totalorder %s4392_s9, 0  ;;  %s535_s13 = int_to_ptr.vmem [resolvable:$true] %s534_s13 }
 0x181   : > { %s3941_s7 = scalar_lea.hbm %s4404_s8, %s4403_s21  ;;  %s3318_s17 = scalar_lea.hbm %s4404_s8, 256 }
 0x182   : > { %s3313_s14 = scalar_lea.hbm %s3941_s7, 128  ;;  %p3319_p0 = scmp.lt.u32.totalorder %s3941_s7, %s4404_s8 }
 0x183   : > { %p3314_p8 = scmp.ne.s32.totalorder %s3941_s7, %s3313_s14  ;;  %p3320_p4 = scmp.lt.u32.totalorder %s3318_s17, %s3313_s14 }
 0x184   : > { %p3322_p2 = scmp.lt.u32.totalorder %s3313_s14, %s3941_s7 }
 0x185   : > { %p3316_p6 = pnand %p3314_p8, %p4406_p1  ;;  %p3321_p12 = por %p3320_p4, %p3319_p0 }
 0x187   : > { %p3317_p9 = pneg %p3316_p6  ;;  %p3323_p10 = por %p3322_p2, %p3321_p12 }
 0x189   : > { %p3324_p11 = pnand %p3323_p10, %p3317_p9 }
 0x18b   : > { %3327 = shalt.err (!%p3324_p11)
}
 0x18c   : > { %s3328_s27 = scalar_lea.vmem %s535_s13, 128  ;;  %s3483_s21 = smov [#allocation3]  }
 0x18d   : > { %p3329_p13 = scmp.ne.s32.totalorder %s535_s13, %s3328_s27  ;;  %s3333_s12 = sshll.u32 %s3483_s21, 4  ;;  %s3334_s12 = int_to_ptr.vmem [resolvable:$false] %s3333_s12 }
 0x18e   : > { %s3335_s6 = scalar_lea.vmem %s3334_s12, 256  ;;  %p3336_p7 = scmp.lt.s32.totalorder %s535_s13, %s3334_s12 }
 0x18f   : > { %p3331_p3 = pnand %p3329_p13, %p4406_p1  ;;  %p3337_p8 = scmp.lt.s32.totalorder %s3335_s6, %s3328_s27 }
 0x191   : > { %p3332_p5 = pneg %p3331_p3  ;;  %p3338_p6 = por %p3337_p8, %p3336_p7 }
 0x193   : > { %p3339_p0 = pnand %p3338_p6, %p3332_p5 }
 0x195   : > { %3342 = shalt.err (!%p3339_p0)
}
 0x196   : > { %p4407_p4 = scmp.ne.s32.totalorder %s4390_s2, 0  ;;  %s2439_s20 = sshll.u32 %s3467_s16, 5 }
 0x197   : > { %s563_s23 = scalar_lea.vmem [#allocation8], %s2438_s3  ;;  %s4408_s17 = sld [smem:[#allocation42_spill]] }
 0x198   : > { %2828 = dma.hbm_to_vmem [thread:$0]  (!%p4407_p4), %s3941_s7, 128, %s535_s13, %s524_s15  }
 0x199   : > { %s570_s14 = sshll.u32 %s563_s23, 4  ;;  %s571_s14 = int_to_ptr.vmem [resolvable:$true] %s570_s14 }
 0x19d   : > { %s568_s11 = scalar_lea.hbm %s4408_s17, %s2439_s20  ;;  %s3348_s12 = scalar_lea.hbm %s4408_s17, 64 }
 0x19e   : > { %s3343_s24 = scalar_lea.hbm %s568_s11, 32  ;;  %p3349_p10 = scmp.lt.u32.totalorder %s568_s11, %s4408_s17 }
 0x19f   : > { %p3344_p9 = scmp.ne.s32.totalorder %s568_s11, %s3343_s24  ;;  %p3350_p11 = scmp.lt.u32.totalorder %s3348_s12, %s3343_s24 }
 0x1a0   : > { %p3352_p3 = scmp.lt.u32.totalorder %s3343_s24, %s568_s11 }
 0x1a1   : > { %p3346_p12 = pnand %p3344_p9, %p4406_p1  ;;  %p3351_p13 = por %p3350_p11, %p3349_p10 }
 0x1a3   : > { %p3347_p2 = pneg %p3346_p12  ;;  %p3353_p5 = por %p3352_p3, %p3351_p13 }
 0x1a5   : > { %p3354_p7 = pnand %p3353_p5, %p3347_p2 }
 0x1a7   : > { %3357 = shalt.err (!%p3354_p7)
}
 0x1a8   : > { %s3358_s18 = scalar_lea.vmem %s571_s14, 32  ;;  %s3484_s13 = smov [#allocation8]  }
 0x1a9   : > { %p3359_p8 = scmp.ne.s32.totalorder %s571_s14, %s3358_s18  ;;  %s3363_s3 = sshll.u32 %s3484_s13, 4  ;;  %s3364_s3 = int_to_ptr.vmem [resolvable:$false] %s3363_s3 }
 0x1aa   : > { %s3365_s15 = scalar_lea.vmem %s3364_s3, 64  ;;  %p3366_p9 = scmp.lt.s32.totalorder %s571_s14, %s3364_s3 }
 0x1ab   : > { %p3361_p6 = pnand %p3359_p8, %p4406_p1  ;;  %p3367_p12 = scmp.lt.s32.totalorder %s3365_s15, %s3358_s18 }
 0x1ad   : > { %p3362_p0 = pneg %p3361_p6  ;;  %p3368_p4 = por %p3367_p12, %p3366_p9 }
 0x1af   : > { %p3369_p10 = pnand %p3368_p4, %p3362_p0 }
 0x1b1   : > { %3372 = shalt.err (!%p3369_p10)
}
 0x1b2   : > { %p4409_p11 = scmp.ne.s32.totalorder %s4390_s2, 0  ;;  %s4410_s20 = sld [smem:[#allocation37_spill]] }
 0x1b4   : > { %2834 = dma.hbm_to_vmem [thread:$0]  (!%p4409_p11), %s568_s11, 32, %s571_s14, %s3789_s5  }
 0x1b8   : > { %p4411_p2 = scmp.ne.s32.totalorder %s4410_s20, 0 }
 0x1b9   : > { %s3986_s9 = sand.u32 (!%p4411_p2), 1, %s3459_s30   ;;  %p4412_p1 = scmp.ne.s32.totalorder (!%p4411_p2), %s4387_s28, 0 }
 0x1ba   : > { %579 = sbr.rel (%p4411_p2) target bundleno = 3939 (0xf63), region = 76  ;;  %s3989_s23 = sshll.u32 (!%p4411_p2), %s3986_s9, 3 }
 0x1bb   : > { %s582_s26 = scalar_lea.sflag (!%p4411_p2), [#allocation4], %s3986_s9  ;;  %s585_s1 = scalar_lea.vmem (!%p4411_p2), [#allocation3], %s3989_s23 }
 0x1c1   : > { %3418 = dma.done.wait (%p4412_p1), %s582_s26, 128  }
 0x1c2   : > { %3420 = vsyncadd (%p4412_p1), %s582_s26, 4294967168  ;;  %s590_s5 = sand.u32 1, %s3595_s19   ;;  %s594_s14 = scalar_lea.vmem [#allocation6], %s3989_s23 }
 0x1c3   : > { %s591_s2 = scalar_lea.sflag [#allocation7], %s590_s5 }
 0x1c4   : > { %3422 = dma.done.wait (%p4412_p1), %s591_s2, 160  }
 0x1c5   : > { %3424 = vsyncadd (%p4412_p1), %s591_s2, 4294967136  ;;  %s2443_s11 = sshll.u32 %s3986_s9, 1  ;;  %p4413_p4 = scmp.eq.s32.totalorder %s3595_s19, 0 }
 0x1c6   : > { %s4004_s24 = scalar_lea.vmem [#allocation8], %s2443_s11 }
 0x1c7   : > { %3426 = dma.done.wait (%p4413_p4), [#allocation10], 512   ;;  %p4414_p13 = pmov %p4413_p4 }
 0x1c8   : > { %p4415_p3 = pmov %p4413_p4 }
 0x1c9   : > { %3428 = vsyncadd (%p4414_p13), [#allocation10], 4294966784 }
 0x1ca   : > { %3430 = dma.done.wait (%p4415_p3), [#allocation13], 272   ;;  %p4416_p5 = pmov %p4415_p3 }
 0x1cb   : > { %p4417_p7 = pmov %p4415_p3 }
 0x1cc   : > { %3432 = vsyncadd (%p4416_p5), [#allocation13], 4294967024 }
 0x1cd   : > { %3434 = dma.done.wait (%p4417_p7), [#allocation16], 32   ;;  %p4418_p8 = pmov %p4415_p3 }
 0x1ce   : > { %p4419_p6 = pmov %p4415_p3 }
 0x1cf   : > { %3436 = vsyncadd (%p4418_p8), [#allocation16], 4294967264 }
 0x1d0   : > { %3438 = dma.done.wait (%p4419_p6), [#allocation19], 272   ;;  %p4420_p0 = pmov %p4415_p3 }
 0x1d2   : > { %3440 = vsyncadd (%p4420_p0), [#allocation19], 4294967024  ;;  %p4421_p9 = pmov %p4420_p0 }
 0x1d3   : > { %p4422_p12 = pmov %p4420_p0 }
 0x1d4   : > { %3442 = dma.done.wait (%p4421_p9), [#allocation22], 1040  }
 0x1d5   : > { %3444 = vsyncadd (%p4422_p12), [#allocation22], 4294966256  ;;  %p4423_p10 = pmov %p4420_p0 }
 0x1d6   : > { %p4424_p11 = pmov %p4420_p0 }
 0x1d7   : > { %3446 = dma.done.wait (%p4423_p10), [#allocation25], 16  }
 0x1d8   : > { %3448 = vsyncadd (%p4424_p11), [#allocation25], 4294967280  ;;  %vm723_vm0 = vcmask 261120   ;;  %v4030_v0 = vld [vmem:[%s585_s1] sm:$0xff]  ;;  %v4032_v1 = vld [vmem:[%s594_s14] sm:$0xff]  ;;  %v3485_v15 = vmov 0.0  }
 0x1d9   : > { %v724_v2 = vsel %vm723_vm0, %v4030_v0, 0.0  ;;  %v727_v3 = vsel %vm723_vm0, %v4032_v1, 0.0  ;;  %v2921_v14 = vld [vmem:[#allocation9] sm:$0xff]   ;;  %2575 = vmatprep.subr.bf16.mxu1 %v3485_v15  ;;  %2603 = vmatprep.subr.bf16.mxu0 %v3485_v15  ;;  %v2922_v16 = vld [vmem:[#allocation9 + $0x8] sm:$0xff]   ;;  %vm3486_vm1 = vmmov 0   ;;  %v4050_v33 = vld [vmem:[#allocation11] sm:$0xff]  }
 0x1da   : > { %725 = vadd.xlane.f32.xlu0 %v724_v2  ;;  %2576 = vmatpush3.bf16.msra.mxu1 %v2921_v14  ;;  %v2456_v25 = vld [vmem:[#allocation14] ss:$0 sm:$0xff]  ;;  %v2457_v29 = vld [vmem:[#allocation15] ss:$0 sm:$0xff]  ;;  %v4054_v35 = vld [vmem:[#allocation11 + $0x8] sm:$0xff]   ;;  %s3487_s28 = smov 88  }
 0x1db   : > { %2579 = vmatprep.mubr.msk.bf16.mxu1 %vm3486_vm1, %v3485_v15  ;;  %2577 = vmatprep.subr.bf16.mxu1 %v3485_v15  ;;  %s3488_s27 = smov 96   ;;  %s3489_s21 = smov 120   ;;  %vm884_vm2 = vcmask 64512   ;;  %vm951_vm3 = vcmask 1043456   ;;  %v707_v59 = vld [vmem:[%s4004_s24] sm:$0x3] }
 0x1dc   : > { %2605 = vmatprep.mubr.msk.bf16.mxu0 %vm3486_vm1, %v3485_v15  ;;  %s3490_s12 = smov 112   ;;  %s3491_s6 = smov 80   ;;  %vm708_vm4 = vnez %v707_v59  ;;  %v3494_v60 = vmov 0   ;;  %vm996_vm6 = vcmask 60416   ;;  %vm1117_vm7 = vcmask 126016  }
 0x1dd   : > { %s3492_s7 = smov 104   ;;  %s3493_s18 = smov 72   ;;  %v931_v61 = vsel %vm708_vm4, 16843009, %v3494_v60  ;;  %vm1237_vm8 = vcmask 191616   ;;  %vm1357_vm9 = vcmask 257216  }
 0x1de   : > { %728 = vadd.xlane.f32.xlu0 %v727_v3  ;;  %2578 = vmatpush3.bf16.msra.mxu1 %v2922_v16  ;;  %v932_v62 = vunpack.c.0.s8 %v931_v61  ;;  %s3495_s13 = smov 8   ;;  %s3496_s3 = smov 16  }
 0x1df   : > { %2583 = vmatprep.subr.bf16.mxu1 %v3485_v15  ;;  %s3497_s15 = smov 24   ;;  %s2507_s20 = sshll.u32 %s3595_s19, 7 }
 0x1e0   : > { %vm4099_vm5 = vcmp.ne.s32.totalorder %v932_v62, 0  ;;  %s701_s26 = scalar_lea.vmem [#allocation26], %s3989_s23  ;;  %s4427_s14 = sld [smem:[#allocation53_spill]] }
 0x1e1   : > { %s2202_s1 = sshll.u32 %s701_s26, 4  ;;  %s2189_s19 = scalar_lea.sflag [#allocation5], %s3986_s9  ;;  %s4275_s1 = int_to_ptr.vmem [resolvable:$true] %s2202_s1 }
 0x1e2   : > { %s3373_s23 = scalar_lea.vmem %s4275_s1, 128  ;;  %p4428_p1 = scmp.ne.s32.totalorder %s4388_s22, 0 }
 0x1e3   : > { %p3374_p2 = scmp.ne.s32.totalorder %s4275_s1, %s3373_s23  ;;  %s3498_s24 = smov [#allocation26]  }
 0x1e5   : > { %p3375_p4 = pnand %p3374_p2, %p4428_p1 }
 0x1e6   : > { %s4273_s11 = scalar_lea.hbm %s4427_s14, %s2507_s20 }
 0x1e7   : > { %p3376_p13 = pneg %p3375_p4 }
 0x267   : > { %v726_v4 = vpop.xlane.xlu0 %725 }
 0x268   : > { %v731_v5 = vmul.f32 0.03125, %v726_v4 }
 0x26a   : > { %v733_v6 = vsub.f32 %v4030_v0, %v731_v5 }
 0x26b   : > { %v729_v7 = vpop.xlane.xlu0 %728 }
 0x26c   : > { %v732_v8 = vmul.f32 0.03125, %v729_v7  ;;  %v735_v9 = vmul.f32 %v733_v6, %v733_v6 }
 0x26e   : > { %v734_v10 = vsub.f32 %v4032_v1, %v732_v8  ;;  %v737_v11 = vsel %vm723_vm0, %v735_v9, 0.0 }
 0x26f   : > { %738 = vadd.xlane.f32.xlu1 %v737_v11 }
 0x270   : > { %v736_v12 = vmul.f32 %v734_v10, %v734_v10 }
 0x272   : > { %v740_v13 = vsel %vm723_vm0, %v736_v12, 0.0 }
 0x273   : > { %741 = vadd.xlane.f32.xlu1 %v740_v13 }
 0x2fc   : > { %v739_v17 = vpop.xlane.xlu1 %738 }
 0x2fd   : > { %v743_v18 = vmul.f32 0.03125, %v739_v17 }
 0x2ff   : > { %v745_v19 = vadd.f32 1e-05, %v743_v18 }
 0x300   : > { %v742_v20 = vpop.xlane.xlu1 %741 }
 0x301   : > { %2937 = vrsqrt.f32 %v745_v19  ;;  %v744_v21 = vmul.f32 0.03125, %v742_v20 }
 0x303   : > { %v746_v22 = vadd.f32 1e-05, %v744_v21 }
 0x305   : > { %2939 = vrsqrt.f32 %v746_v22 }
 0x30b   : > { %v2938_v23 = vpop.eup %2937 }
 0x30c   : > { %v749_v24 = vmul.f32 %v2938_v23, %v733_v6 }
 0x30e   : > { %v757_v28 = vmul.f32 %v2456_v25, %v749_v24 }
 0x30f   : > { %v2940_v26 = vpop.eup %2939 }
 0x310   : > { %v750_v27 = vmul.f32 %v2940_v26, %v734_v10  ;;  %v765_v31 = vadd.f32 %v2457_v29, %v757_v28 }
 0x312   : > { %v758_v30 = vmul.f32 %v2456_v25, %v750_v27 }
 0x314   : > { %v766_v32 = vadd.f32 %v2457_v29, %v758_v30 }
 0x316   : > { %v767_v34 = vpack.c.bf16 %v766_v32, %v765_v31  ;;  %v824_v36 = vpack.c.bf16 %v766_v32, %v766_v32 }
 0x318   : > { %2580 = vmatmul.mubr.msk.bf16.vlgmr.msra.gmra.mrb[0].mxu1 %vm723_vm0, %v767_v34 }
 0x319   : > { %2584 = vmatpush3.bf16.msra.mxu1 %v4050_v33  ;;  %2587 = vmatprep.mubr.msk.bf16.mxu1 %vm3486_vm1, %v3485_v15 }
 0x31a   : > { %2585 = vmatprep.subr.bf16.mxu1 %v3485_v15 }
 0x31d   : > { %2586 = vmatpush3.bf16.msra.mxu1 %v4054_v35 }
 0x31e   : > { %2591 = vmatprep.subr.bf16.mxu1 %v3485_v15 }
 0x320   : > { %2588 = vmatmul.mubr.msk.bf16.vlgmr.msra.gmra.mrb[4].mxu1 %vm723_vm0, %v824_v36 }
 0x321   : > { %2593 = vmatprep.mubr.msk.bf16.mxu1 %vm3486_vm1, %v3485_v15 }
 0x3eb   : > { %v4064_v37 = vpop.f32.mrb[0].mxu1 }
 0x3ec   : > { %v2581_v38 = vpop.f32.mrb[1].mxu1 }
 0x3ed   : > { %v820_v39 = vpop.f32.mrb[2].mxu1 }
 0x3ee   : > { %v880_v40 = vpack.c.bf16 %v820_v39, %v820_v39  ;;  %v2582_v41 = vpop.f32.mrb[3].mxu1 }
 0x3f0   : > { %1000 = vrot.lane.b32.xlu1 %v880_v40, %s3487_s28  ;;  %882 = vrot.lane.b32.xlu0 %v880_v40, %s3488_s27 }
 0x3f3   : > { %v874_v42 = vpop.f32.mrb[4].mxu1 }
 0x3f4   : > { %998 = vrot.lane.b32.xlu1 %v880_v40, %s3489_s21  ;;  %1119 = vrot.lane.b32.xlu0 %v880_v40, %s3490_s12  ;;  %v2589_v43 = vpop.f32.mrb[5].mxu1  ;;  %v4077_v51 = vpack.c.bf16 %v874_v42, %v874_v42 }
 0x3f5   : > { %v877_v44 = vpop.f32.mrb[6].mxu1 }
 0x3f6   : > { %v2590_v45 = vpop.f32.mrb[7].mxu1  ;;  %v953_v54 = vsel %vm951_vm3, %v4077_v51, 0 }
 0x3f8   : > { %1121 = vrot.lane.b32.xlu1 %v880_v40, %s3491_s6  ;;  %1239 = vrot.lane.b32.xlu0 %v880_v40, %s3492_s7 }
 0x3fc   : > { %1241 = vrot.lane.b32.xlu1 %v880_v40, %s3493_s18 }
 0x462   : > { %v1001_v46 = vpop.permute.xlu1 %1000  ;;  %v883_v47 = vpop.permute.xlu0 %882 }
 0x463   : > { %v889_v48 = vsel %vm884_vm2, %v883_v47, 0  ;;  %v1006_v49 = vsel %vm884_vm2, %v1001_v46, 0 }
 0x464   : > { %2592 = vmatpush3.bf16.xpose.msra.mxu1 %v889_v48  ;;  %2604 = vmatpush3.bf16.xpose.msra.mxu0 %v1006_v49 }
 0x465   : > { %2597 = vmatprep.subr.bf16.mxu1 %v3485_v15  ;;  %2615 = vmatprep.subr.bf16.mxu0 %v3485_v15 }
 0x466   : > { %v999_v50 = vpop.permute.xlu1 %998  ;;  %v1120_v56 = vpop.permute.xlu0 %1119 }
 0x46a   : > { %v1122_v52 = vpop.permute.xlu1 %1121  ;;  %v1240_v58 = vpop.permute.xlu0 %1239 }
 0x46b   : > { %v1127_v53 = vsel %vm884_vm2, %v1122_v52, 0  ;;  %2594 = vmatmul.mubr.msk.bf16.vlgmr.msra.gmra.mrb[8].mxu1 %vm884_vm2, %v880_v40  ;;  %2606 = vmatmul.mubr.msk.bf16.vlgmr.msra.gmra.mrb[0].mxu0 %vm884_vm2, %v999_v50 }
 0x46c   : > { %2598 = vmatpush3.bf16.msra.mxu1 %v953_v54  ;;  %2616 = vmatpush3.bf16.xpose.msra.mxu0 %v1127_v53 }
 0x46d   : > { %2617 = vmatprep.mubr.msk.bf16.mxu0 %vm3486_vm1, %v3485_v15  ;;  %2627 = vmatprep.subr.bf16.mxu0 %v3485_v15 }
 0x46e   : > { %2599 = vmatprep.mubr.msk.bf16.mxu1 %vm3486_vm1, %v3485_v15  ;;  %2609 = vmatprep.subr.bf16.mxu1 %v3485_v15  ;;  %v1242_v55 = vpop.permute.xlu1 %1241 }
 0x46f   : > { %v1247_v57 = vsel %vm884_vm2, %v1242_v55, 0 }
 0x473   : > { %2618 = vmatmul.mubr.msk.bf16.vlgmr.msra.gmra.mrb[4].mxu0 %vm884_vm2, %v1120_v56 }
 0x474   : > { %2628 = vmatpush3.bf16.xpose.msra.mxu0 %v1247_v57  ;;  %2629 = vmatprep.mubr.msk.bf16.mxu0 %vm3486_vm1, %v3485_v15 }
 0x475   : > { %2639 = vmatprep.subr.bf16.mxu0 %v3485_v15 }
 0x47b   : > { %2630 = vmatmul.mubr.msk.bf16.vlgmr.msra.gmra.mrb[8].mxu0 %vm884_vm2, %v1240_v58 }
 0x47c   : > { %2643 = vmatprep.mubr.msk.bf16.mxu0 %vm3486_vm1, %v3485_v15 }
 0x53e   : > { %v925_v2 = vpop.f32.mrb[8].mxu1  ;;  %v1042_v3 = vpop.f32.mrb[0].mxu0 }
 0x53f   : > { %v934_v4 = vsel %vm4099_vm5, -35355340.0, %v925_v2  ;;  %v1048_v5 = vsel %vm4099_vm5, -35355340.0, %v1042_v3  ;;  %v2595_v6 = vpop.f32.mrb[9].mxu1  ;;  %v2607_v7 = vpop.f32.mrb[1].mxu0 }
 0x540   : > { %v928_v8 = vpop.f32.mrb[10].mxu1  ;;  %v1045_v9 = vpop.f32.mrb[2].mxu0  ;;  %v1049_v10 = vsel %vm884_vm2, %v1048_v5, -inf  ;;  %v935_v11 = vsel %vm884_vm2, %v934_v4, -inf }
 0x541   : > { %v2608_v12 = vpop.f32.mrb[3].mxu0  ;;  %1050 = vmax.xlane.f32.xlu0 %v1049_v10  ;;  %936 = vmax.xlane.f32.xlu1 %v935_v11  ;;  %v2596_v13 = vpop.f32.mrb[11].mxu1 }
 0x546   : > { %v1163_v14 = vpop.f32.mrb[4].mxu0 }
 0x547   : > { %v1169_v16 = vsel %vm4099_vm5, -35355340.0, %v1163_v14  ;;  %v2619_v17 = vpop.f32.mrb[5].mxu0 }
 0x548   : > { %v1166_v18 = vpop.f32.mrb[6].mxu0  ;;  %v1170_v19 = vsel %vm884_vm2, %v1169_v16, -inf }
 0x549   : > { %1171 = vmax.xlane.f32.xlu0 %v1170_v19  ;;  %v2620_v20 = vpop.f32.mrb[7].mxu0 }
 0x54e   : > { %v1283_v21 = vpop.f32.mrb[8].mxu0 }
 0x54f   : > { %v1289_v22 = vsel %vm4099_vm5, -35355340.0, %v1283_v21  ;;  %v2631_v23 = vpop.f32.mrb[9].mxu0  ;;  %v4149_v21 = vld [vmem:[#allocation12] sm:$0xff]  }
 0x550   : > { %v1286_v24 = vpop.f32.mrb[10].mxu0  ;;  %v1290_v25 = vsel %vm884_vm2, %v1289_v22, -inf  ;;  %2640 = vmatpush3.bf16.msra.mxu0 %v4149_v21 }
 0x551   : > { %1291 = vmax.xlane.f32.xlu0 %v1290_v25  ;;  %v2632_v26 = vpop.f32.mrb[11].mxu0  ;;  %2641 = vmatprep.subr.bf16.mxu0 %v3485_v15 }
 0x5ce   : > { %v1051_v27 = vpop.xlane.xlu0 %1050  ;;  %v937_v28 = vpop.xlane.xlu1 %936 }
 0x5cf   : > { %v1052_v29 = vsub.f32 %v1048_v5, %v1051_v27  ;;  %v938_v30 = vsub.f32 %v934_v4, %v937_v28  ;;  %v1460_v27 = vpack.c.bf16 %v4064_v37, %v4064_v37 }
 0x5d1   : > { %v1053_v31 = vmul.f32 1.442695, %v1052_v29  ;;  %v939_v32 = vmul.f32 1.442695, %v938_v30 }
 0x5d3   : > { %2941 = vpow2.f32 %v1053_v31 }
 0x5d4   : > { %2943 = vpow2.f32 %v939_v32 }
 0x5d6   : > { %v1172_v34 = vpop.xlane.xlu0 %1171 }
 0x5d7   : > { %v1173_v46 = vsub.f32 %v1169_v16, %v1172_v34 }
 0x5d9   : > { %v1174_v47 = vmul.f32 1.442695, %v1173_v46 }
 0x5dd   : > { %v2942_v36 = vpop.eup %2941 }
 0x5de   : > { %v2944_v38 = vpop.eup %2943  ;;  %v1292_v39 = vpop.xlane.xlu0 %1291  ;;  %v1055_v40 = vsel %vm884_vm2, %v2942_v36, 0.0 }
 0x5df   : > { %v1293_v41 = vsub.f32 %v1289_v22, %v1292_v39  ;;  %1056 = vadd.xlane.f32.xlu0 %v1055_v40  ;;  %v941_v42 = vsel %vm884_vm2, %v2944_v38, 0.0 }
 0x5e0   : > { %942 = vadd.xlane.f32.xlu1 %v941_v42 }
 0x5e1   : > { %v1294_v43 = vmul.f32 1.442695, %v1293_v41 }
 0x5e3   : > { %2945 = vpow2.f32 %v1294_v43 }
 0x5e4   : > { %2947 = vpow2.f32 %v1174_v47 }
 0x5ed   : > { %v2946_v44 = vpop.eup %2945 }
 0x5ee   : > { %v1296_v45 = vsel %vm884_vm2, %v2946_v44, 0.0  ;;  %v2948_v48 = vpop.eup %2947 }
 0x5ef   : > { %1297 = vadd.xlane.f32.xlu0 %v1296_v45  ;;  %v1176_v49 = vsel %vm884_vm2, %v2948_v48, 0.0 }
 0x5f1   : > { %1062 = vrot.lane.b32.xlu1 %v4077_v51, %s3489_s21 }
 0x605   : > { %1182 = vrot.lane.b32.xlu0 %v4077_v51, %s3490_s12 }
 0x615   : > { %1177 = vadd.xlane.f32.xlu1 %v1176_v49 }
 0x626   : > { %1302 = vrot.lane.b32.xlu1 %v4077_v51, %s3492_s7 }
 0x66c   : > { %v1057_v52 = vpop.xlane.xlu0 %1056 }
 0x66d   : > { %v943_v50 = vpop.xlane.xlu1 %942 }
 0x66e   : > { %2949 = vrcp.f32 %v943_v50 }
 0x66f   : > { %2951 = vrcp.f32 %v1057_v52 }
 0x671   : > { %v1063_v55 = vpop.permute.xlu1 %1062 }
 0x672   : > { %v1068_v59 = vsel %vm951_vm3, %v1063_v55, 0 }
 0x678   : > { %v2950_v53 = vpop.eup %2949 }
 0x679   : > { %v945_v54 = vmul.f32 %v2950_v53, %v2944_v38  ;;  %v2952_v57 = vpop.eup %2951 }
 0x67a   : > { %v1059_v60 = vmul.f32 %v2952_v57, %v2942_v36 }
 0x67b   : > { %v946_v56 = vpack.c.bf16 %v945_v54, %v945_v54 }
 0x67c   : > { %v1298_v58 = vpop.xlane.xlu0 %1297  ;;  %v1060_v61 = vpack.c.bf16 %v1059_v60, %v1059_v60 }
 0x67d   : > { %2600 = vmatmul.mubr.msk.bf16.vlgmr.msra.gmra.mrb[12].mxu1 %vm884_vm2, %v946_v56 }
 0x67e   : > { %2610 = vmatpush3.bf16.msra.mxu1 %v1068_v59  ;;  %2611 = vmatprep.mubr.msk.bf16.mxu1 %vm3486_vm1, %v3485_v15 }
 0x67f   : > { %2621 = vmatprep.subr.bf16.mxu1 %v3485_v15 }
 0x680   : > { %v1183_v51 = vpop.permute.xlu0 %1182 }
 0x681   : > { %v1188_v62 = vsel %vm951_vm3, %v1183_v51, 0 }
 0x685   : > { %2612 = vmatmul.mubr.msk.bf16.vlgmr.msra.gmra.mrb[16].mxu1 %vm884_vm2, %v1060_v61 }
 0x686   : > { %2622 = vmatpush3.bf16.msra.mxu1 %v1188_v62  ;;  %2623 = vmatprep.mubr.msk.bf16.mxu1 %vm3486_vm1, %v3485_v15 }
 0x687   : > { %2633 = vmatprep.subr.bf16.mxu1 %v3485_v15 }
 0x6a2   : > { %v1178_v2 = vpop.xlane.xlu1 %1177 }
 0x6a3   : > { %2953 = vrcp.f32 %v1178_v2 }
 0x6a4   : > { %2955 = vrcp.f32 %v1298_v58 }
 0x6a6   : > { %v1303_v5 = vpop.permute.xlu1 %1302 }
 0x6a7   : > { %v1308_v8 = vsel %vm951_vm3, %v1303_v5, 0 }
 0x6ad   : > { %v2954_v3 = vpop.eup %2953 }
 0x6ae   : > { %v1180_v4 = vmul.f32 %v2954_v3, %v2948_v48  ;;  %v2956_v7 = vpop.eup %2955 }
 0x6af   : > { %v1300_v9 = vmul.f32 %v2956_v7, %v2946_v44 }
 0x6b0   : > { %v1181_v6 = vpack.c.bf16 %v1180_v4, %v1180_v4 }
 0x6b1   : > { %v1301_v10 = vpack.c.bf16 %v1300_v9, %v1300_v9 }
 0x6b2   : > { %2624 = vmatmul.mubr.msk.bf16.vlgmr.msra.gmra.mrb[20].mxu1 %vm884_vm2, %v1181_v6 }
 0x6b3   : > { %2634 = vmatpush3.bf16.msra.mxu1 %v1308_v8  ;;  %2635 = vmatprep.mubr.msk.bf16.mxu1 %vm3486_vm1, %v3485_v15 }
 0x6b4   : > { %2647 = vmatprep.subr.bf16.mxu1 %v3485_v15 }
 0x6ba   : > { %2636 = vmatmul.mubr.msk.bf16.vlgmr.msra.gmra.mrb[24].mxu1 %vm884_vm2, %v1301_v10 }
 0x6bb   : > { %2648 = vmatpush3.bf16.msra.mxu1 %v4050_v33  ;;  %2651 = vmatprep.mubr.msk.bf16.mxu1 %vm3486_vm1, %v3485_v15 }
 0x6bc   : > { %2649 = vmatprep.subr.bf16.mxu1 %v3485_v15 }
 0x6bf   : > { %2650 = vmatpush3.bf16.msra.mxu1 %v4054_v35  ;;  %v4153_v35 = vld [vmem:[#allocation12 + $0x8] sm:$0xff]  }
 0x6c0   : > { %2661 = vmatprep.subr.bf16.mxu1 %v3485_v15  ;;  %2642 = vmatpush3.bf16.msra.mxu0 %v4153_v35 }
 0x6c1   : > { %2655 = vmatprep.subr.bf16.mxu0 %v3485_v15 }
 0x750   : > { %v989_v11 = vpop.f32.mrb[12].mxu1 }
 0x751   : > { %v995_v12 = vpack.c.bf16 %v989_v11, %v989_v11  ;;  %v2601_v13 = vpop.f32.mrb[13].mxu1 }
 0x752   : > { %v992_v14 = vpop.f32.mrb[14].mxu1 }
 0x753   : > { %997 = vst.msk [vmem:[#allocation2] sm:$0xf] %vm996_vm6, %v995_v12  ;;  %v2602_v16 = vpop.f32.mrb[15].mxu1 }
 0x758   : > { %v1104_v17 = vpop.f32.mrb[16].mxu1 }
 0x759   : > { %v2510_v18 = vpack.c.bf16 %v1104_v17, %v1104_v17  ;;  %v2613_v33 = vpop.f32.mrb[17].mxu1 }
 0x75a   : > { %v1107_v19 = vpop.f32.mrb[18].mxu1 }
 0x75b   : > { %1114 = vrot.lane.b32.xlu1 %v2510_v18, %s3495_s13  ;;  %v2614_v20 = vpop.f32.mrb[19].mxu1 }
 0x785   : > { %v1224_v22 = vpop.f32.mrb[20].mxu1 }
 0x786   : > { %v2511_v23 = vpack.c.bf16 %v1224_v22, %v1224_v22  ;;  %v2625_v24 = vpop.f32.mrb[21].mxu1 }
 0x787   : > { %v1227_v25 = vpop.f32.mrb[22].mxu1 }
 0x788   : > { %1234 = vrot.lane.b32.xlu1 %v2511_v23, %s3496_s3  ;;  %v2626_v26 = vpop.f32.mrb[23].mxu1 }
 0x78c   : > { %1462 = vrot.lane.b32.xlu1 %v1460_v27, %s3488_s27 }
 0x78d   : > { %v1344_v28 = vpop.f32.mrb[24].mxu1 }
 0x78e   : > { %v2512_v29 = vpack.c.bf16 %v1344_v28, %v1344_v28  ;;  %v2637_v30 = vpop.f32.mrb[25].mxu1 }
 0x78f   : > { %v1347_v31 = vpop.f32.mrb[26].mxu1 }
 0x790   : > { %1572 = vrot.lane.b32.xlu1 %v1460_v27, %s3489_s21  ;;  %1354 = vrot.lane.b32.xlu0 %v2512_v29, %s3497_s15  ;;  %v2638_v32 = vpop.f32.mrb[27].mxu1 }
 0x794   : > { %1692 = vrot.lane.b32.xlu1 %v1460_v27, %s3490_s12  ;;  %1574 = vrot.lane.b32.xlu0 %v1460_v27, %s3487_s28  ;;  %s3377_s28 = sshll.u32 %s3498_s24, 4  ;;  %s3378_s28 = int_to_ptr.vmem [resolvable:$false] %s3377_s28 }
 0x795   : > { %s3379_s27 = scalar_lea.vmem %s3378_s28, 256  ;;  %p3380_p3 = scmp.lt.s32.totalorder %s4275_s1, %s3378_s28 }
 0x796   : > { %p3381_p5 = scmp.lt.s32.totalorder %s3379_s27, %s3373_s23 }
 0x798   : > { %1811 = vrot.lane.b32.xlu1 %v1460_v27, %s3492_s7  ;;  %1694 = vrot.lane.b32.xlu0 %v1460_v27, %s3491_s6  ;;  %p3382_p7 = por %p3381_p5, %p3380_p3 }
 0x79a   : > { %p3383_p8 = pnand %p3382_p7, %p3376_p13 }
 0x79c   : > { %1813 = vrot.lane.b32.xlu0 %v1460_v27, %s3493_s18 }
 0x7cd   : > { %v1115_v37 = vpop.permute.xlu1 %1114 }
 0x7ce   : > { %1118 = vst.msk [vmem:[#allocation2] sm:$0xf] %vm1117_vm7, %v1115_v37 }
 0x7fa   : > { %v1235_v34 = vpop.permute.xlu1 %1234 }
 0x7fb   : > { %1238 = vst.msk [vmem:[#allocation2] sm:$0xf] %vm1237_vm8, %v1235_v34 }
 0x7fe   : > { %v1463_v38 = vpop.permute.xlu1 %1462 }
 0x7ff   : > { %v1468_v40 = vsel %vm884_vm2, %v1463_v38, 0 }
 0x802   : > { %v1355_v36 = vpop.permute.xlu0 %1354  ;;  %v1573_v44 = vpop.permute.xlu1 %1572 }
 0x803   : > { %1358 = vst.msk [vmem:[#allocation2] sm:$0xf] %vm1357_vm9, %v1355_v36 }
 0x806   : > { %v1575_v41 = vpop.permute.xlu0 %1574  ;;  %v1693_v47 = vpop.permute.xlu1 %1692 }
 0x807   : > { %v1580_v42 = vsel %vm884_vm2, %v1575_v41, 0 }
 0x80a   : > { %v1359_v39 = vld [vmem:[#allocation2] sm:$0xf]  ;;  %v1695_v43 = vpop.permute.xlu0 %1694  ;;  %v1812_v49 = vpop.permute.xlu1 %1811 }
 0x80b   : > { %2644 = vmatmul.mubr.msk.bf16.vlgmr.msra.gmra.mrb[12].mxu0 %vm723_vm0, %v1359_v39  ;;  %v1700_v45 = vsel %vm884_vm2, %v1695_v43, 0 }
 0x80c   : > { %2656 = vmatpush3.bf16.xpose.msra.mxu0 %v1468_v40  ;;  %2657 = vmatprep.mubr.msk.bf16.mxu0 %vm3486_vm1, %v3485_v15 }
 0x80d   : > { %2667 = vmatprep.subr.bf16.mxu0 %v3485_v15 }
 0x80e   : > { %v1814_v46 = vpop.permute.xlu0 %1813 }
 0x80f   : > { %v1819_v48 = vsel %vm884_vm2, %v1814_v46, 0 }
 0x813   : > { %2658 = vmatmul.mubr.msk.bf16.vlgmr.msra.gmra.mrb[16].mxu0 %vm884_vm2, %v1460_v27 }
 0x814   : > { %2668 = vmatpush3.bf16.xpose.msra.mxu0 %v1580_v42  ;;  %2669 = vmatprep.mubr.msk.bf16.mxu0 %vm3486_vm1, %v3485_v15 }
 0x815   : > { %2679 = vmatprep.subr.bf16.mxu0 %v3485_v15 }
 0x81b   : > { %2670 = vmatmul.mubr.msk.bf16.vlgmr.msra.gmra.mrb[20].mxu0 %vm884_vm2, %v1573_v44 }
 0x81c   : > { %2680 = vmatpush3.bf16.xpose.msra.mxu0 %v1700_v45  ;;  %2681 = vmatprep.mubr.msk.bf16.mxu0 %vm3486_vm1, %v3485_v15 }
 0x81d   : > { %2691 = vmatprep.subr.bf16.mxu0 %v3485_v15 }
 0x823   : > { %2682 = vmatmul.mubr.msk.bf16.vlgmr.msra.gmra.mrb[24].mxu0 %vm884_vm2, %v1693_v47 }
 0x824   : > { %2692 = vmatpush3.bf16.xpose.msra.mxu0 %v1819_v48  ;;  %2693 = vmatprep.mubr.msk.bf16.mxu0 %vm3486_vm1, %v3485_v15 }
 0x825   : > { %2703 = vmatprep.subr.bf16.mxu0 %v3485_v15 }
 0x82b   : > { %2694 = vmatmul.mubr.msk.bf16.vlgmr.msra.gmra.mrb[28].mxu0 %vm884_vm2, %v1812_v49 }
 0x82c   : > { %2704 = vmatpush3.bf16.msra.mxu0 %v4149_v21  ;;  %2707 = vmatprep.mubr.msk.bf16.mxu0 %vm3486_vm1, %v3485_v15 }
 0x82d   : > { %2705 = vmatprep.subr.bf16.mxu0 %v3485_v15 }
 0x830   : > { %2706 = vmatpush3.bf16.msra.mxu0 %v4153_v35 }
 0x831   : > { %2719 = vmatprep.subr.bf16.mxu0 %v3485_v15 }
 0x8de   : > { %v1409_v50 = vpop.f32.mrb[12].mxu0 }
 0x8df   : > { %v1415_v52 = vadd.f32 %v1409_v50, %v4032_v1  ;;  %v2645_v53 = vpop.f32.mrb[13].mxu0 }
 0x8e0   : > { %v1412_v54 = vpop.f32.mrb[14].mxu0 }
 0x8e1   : > { %v1416_v55 = vpack.c.bf16 %v1415_v52, %v1415_v52  ;;  %v2646_v56 = vpop.f32.mrb[15].mxu0 }
 0x8e3   : > { %2652 = vmatmul.mubr.msk.bf16.vlgmr.msra.gmra.mrb[28].mxu1 %vm723_vm0, %v1416_v55 }
 0x8e4   : > { %2663 = vmatprep.mubr.msk.bf16.mxu1 %vm3486_vm1, %v3485_v15 }
 0x8e6   : > { %v1504_v57 = vpop.f32.mrb[16].mxu0 }
 0x8e7   : > { %v1510_v58 = vsel %vm4099_vm5, -35355340.0, %v1504_v57  ;;  %v2659_v59 = vpop.f32.mrb[17].mxu0 }
 0x8e8   : > { %v1507_v60 = vpop.f32.mrb[18].mxu0  ;;  %v1511_v51 = vsel %vm884_vm2, %v1510_v58, -inf }
 0x8e9   : > { %1512 = vmax.xlane.f32.xlu0 %v1511_v51  ;;  %v2660_v61 = vpop.f32.mrb[19].mxu0 }
 0x8ee   : > { %v1616_v1 = vpop.f32.mrb[20].mxu0 }
 0x8ef   : > { %v1622_v62 = vsel %vm4099_vm5, -35355340.0, %v1616_v1  ;;  %v2671_v2 = vpop.f32.mrb[21].mxu0 }
 0x8f0   : > { %v1619_v3 = vpop.f32.mrb[22].mxu0  ;;  %v1623_v4 = vsel %vm884_vm2, %v1622_v62, -inf }
 0x8f1   : > { %1624 = vmax.xlane.f32.xlu1 %v1623_v4  ;;  %v2672_v5 = vpop.f32.mrb[23].mxu0 }
 0x8f6   : > { %v1736_v6 = vpop.f32.mrb[24].mxu0 }
 0x8f7   : > { %v1742_v7 = vsel %vm4099_vm5, -35355340.0, %v1736_v6  ;;  %v2683_v8 = vpop.f32.mrb[25].mxu0 }
 0x8f8   : > { %v1739_v9 = vpop.f32.mrb[26].mxu0  ;;  %v1743_v10 = vsel %vm884_vm2, %v1742_v7, -inf }
 0x8f9   : > { %1744 = vmax.xlane.f32.xlu0 %v1743_v10  ;;  %v2684_v11 = vpop.f32.mrb[27].mxu0 }
 0x8fe   : > { %v1855_v12 = vpop.f32.mrb[28].mxu0 }
 0x8ff   : > { %v1861_v13 = vsel %vm4099_vm5, -35355340.0, %v1855_v12  ;;  %v2695_v14 = vpop.f32.mrb[29].mxu0 }
 0x900   : > { %v1858_v16 = vpop.f32.mrb[30].mxu0  ;;  %v1862_v17 = vsel %vm884_vm2, %v1861_v13, -inf }
 0x901   : > { %1863 = vmax.xlane.f32.xlu0 %v1862_v17  ;;  %v2696_v18 = vpop.f32.mrb[31].mxu0 }
 0x976   : > { %v1513_v33 = vpop.xlane.xlu0 %1512 }
 0x977   : > { %v1514_v19 = vsub.f32 %v1510_v58, %v1513_v33 }
 0x979   : > { %v1515_v20 = vmul.f32 1.442695, %v1514_v19 }
 0x97b   : > { %2957 = vpow2.f32 %v1515_v20 }
 0x97e   : > { %v1625_v21 = vpop.xlane.xlu1 %1624 }
 0x97f   : > { %v1626_v35 = vsub.f32 %v1622_v62, %v1625_v21 }
 0x981   : > { %v1627_v22 = vmul.f32 1.442695, %v1626_v35 }
 0x983   : > { %2959 = vpow2.f32 %v1627_v22 }
 0x985   : > { %v2958_v23 = vpop.eup %2957 }
 0x986   : > { %v1745_v24 = vpop.xlane.xlu0 %1744  ;;  %v1517_v25 = vsel %vm884_vm2, %v2958_v23, 0.0 }
 0x987   : > { %v1746_v63 = vsub.f32 %v1742_v7, %v1745_v24  ;;  %1518 = vadd.xlane.f32.xlu0 %v1517_v25 }
 0x989   : > { %v1747_v26 = vmul.f32 1.442695, %v1746_v63 }
 0x98b   : > { %2961 = vpow2.f32 %v1747_v26 }
 0x98d   : > { %v2960_v27 = vpop.eup %2959 }
 0x98e   : > { %v1864_v28 = vpop.xlane.xlu0 %1863  ;;  %v1629_v29 = vsel %vm884_vm2, %v2960_v27, 0.0 }
 0x98f   : > { %v1865_v30 = vsub.f32 %v1861_v13, %v1864_v28  ;;  %1630 = vadd.xlane.f32.xlu1 %v1629_v29 }
 0x991   : > { %v1866_v31 = vmul.f32 1.442695, %v1865_v30 }
 0x993   : > { %2963 = vpow2.f32 %v1866_v31 }
 0x995   : > { %v2962_v32 = vpop.eup %2961 }
 0x996   : > { %v1749_v37 = vsel %vm884_vm2, %v2962_v32, 0.0 }
 0x997   : > { %1750 = vadd.xlane.f32.xlu0 %v1749_v37 }
 0x99d   : > { %v2964_v34 = vpop.eup %2963 }
 0x99e   : > { %v1868_v36 = vsel %vm884_vm2, %v2964_v34, 0.0 }
 0x99f   : > { %1869 = vadd.xlane.f32.xlu1 %v1868_v36 }
 0x9b6   : > { %v1454_v38 = vpop.f32.mrb[28].mxu1 }
 0x9b7   : > { %v1523_v39 = vpack.c.bf16 %v1454_v38, %v1454_v38  ;;  %v2653_v40 = vpop.f32.mrb[29].mxu1 }
 0x9b8   : > { %v1457_v41 = vpop.f32.mrb[30].mxu1  ;;  %v2928_v40 = vld [vmem:[#allocation20 + $0x8] sm:$0xff]  }
 0x9b9   : > { %1755 = vrot.lane.b32.xlu1 %v1523_v39, %s3490_s12  ;;  %1636 = vrot.lane.b32.xlu0 %v1523_v39, %s3489_s21  ;;  %v2654_v42 = vpop.f32.mrb[31].mxu1  ;;  %v1528_v43 = vsel %vm951_vm3, %v1523_v39, 0  ;;  %v2930_v41 = vld [vmem:[#allocation23 + $0x8] sm:$0xff]  }
 0x9ba   : > { %2662 = vmatpush3.bf16.msra.mxu1 %v1528_v43  ;;  %v2931_v42 = vld [vmem:[#allocation23 + $0x10] sm:$0xff]   ;;  %v2932_v43 = vld [vmem:[#allocation23 + $0x18] sm:$0xff]  }
 0x9bb   : > { %2673 = vmatprep.subr.bf16.mxu1 %v3485_v15 }
 0x9bd   : > { %1874 = vrot.lane.b32.xlu1 %v1523_v39, %s3492_s7  ;;  %v2927_v39 = vld [vmem:[#allocation20] sm:$0xff]  }
 0xa14   : > { %v1519_v44 = vpop.xlane.xlu0 %1518 }
 0xa15   : > { %2965 = vrcp.f32 %v1519_v44  ;;  %v2933_v44 = vld [vmem:[#allocation23 + $0x20] sm:$0xff]  }
 0xa1c   : > { %v1631_v45 = vpop.xlane.xlu1 %1630 }
 0xa1d   : > { %2967 = vrcp.f32 %v1631_v45  ;;  %v2934_v45 = vld [vmem:[#allocation23 + $0x28] sm:$0xff]  }
 0xa1f   : > { %v2966_v46 = vpop.eup %2965 }
 0xa20   : > { %v1521_v47 = vmul.f32 %v2966_v46, %v2958_v23 }
 0xa22   : > { %v1522_v48 = vpack.c.bf16 %v1521_v47, %v1521_v47 }
 0xa24   : > { %v1751_v49 = vpop.xlane.xlu0 %1750  ;;  %2664 = vmatmul.mubr.msk.bf16.vlgmr.msra.gmra.mrb[32].mxu1 %vm884_vm2, %v1522_v48 }
 0xa25   : > { %2969 = vrcp.f32 %v1751_v49  ;;  %2675 = vmatprep.mubr.msk.bf16.mxu1 %vm3486_vm1, %v3485_v15 }
 0xa27   : > { %v2968_v50 = vpop.eup %2967 }
 0xa28   : > { %v1633_v52 = vmul.f32 %v2968_v50, %v2960_v27  ;;  %v2491_v50 = vld [vmem:[#allocation17] ss:$0 sm:$0xff] }
 0xa2a   : > { %v1634_v56 = vpack.c.bf16 %v1633_v52, %v1633_v52 }
 0xa2b   : > { %v1637_v53 = vpop.permute.xlu0 %1636 }
 0xa2c   : > { %v1642_v54 = vsel %vm951_vm3, %v1637_v53, 0  ;;  %v1870_v55 = vpop.xlane.xlu1 %1869  ;;  %v2492_v53 = vld [vmem:[#allocation18] ss:$0 sm:$0xff] }
 0xa2d   : > { %2971 = vrcp.f32 %v1870_v55  ;;  %2674 = vmatpush3.bf16.msra.mxu1 %v1642_v54 }
 0xa2e   : > { %2685 = vmatprep.subr.bf16.mxu1 %v3485_v15 }
 0xa2f   : > { %v2970_v57 = vpop.eup %2969 }
 0xa30   : > { %v1756_v58 = vpop.permute.xlu1 %1755  ;;  %2676 = vmatmul.mubr.msk.bf16.vlgmr.msra.gmra.mrb[36].mxu1 %vm884_vm2, %v1634_v56  ;;  %v1753_v60 = vmul.f32 %v2970_v57, %v2962_v32  ;;  %v2935_v57 = vld [vmem:[#allocation23 + $0x30] sm:$0xff]  }
 0xa31   : > { %v1761_v59 = vsel %vm951_vm3, %v1756_v58, 0  ;;  %2687 = vmatprep.mubr.msk.bf16.mxu1 %vm3486_vm1, %v3485_v15  ;;  %v2936_v58 = vld [vmem:[#allocation23 + $0x38] sm:$0xff]  }
 0xa32   : > { %2686 = vmatpush3.bf16.msra.mxu1 %v1761_v59  ;;  %v1754_v61 = vpack.c.bf16 %v1753_v60, %v1753_v60  ;;  %v2493_v59 = vld [vmem:[#allocation21] ss:$0 sm:$0xff] }
 0xa33   : > { %2697 = vmatprep.subr.bf16.mxu1 %v3485_v15 }
 0xa34   : > { %v1875_v51 = vpop.permute.xlu1 %1874 }
 0xa35   : > { %v1880_v62 = vsel %vm951_vm3, %v1875_v51, 0 }
 0xa37   : > { %v2972_v1 = vpop.eup %2971 }
 0xa38   : > { %2688 = vmatmul.mubr.msk.bf16.vlgmr.msra.gmra.mrb[40].mxu1 %vm884_vm2, %v1754_v61  ;;  %v1872_v2 = vmul.f32 %v2972_v1, %v2964_v34 }
 0xa39   : > { %2698 = vmatpush3.bf16.msra.mxu1 %v1880_v62  ;;  %2699 = vmatprep.mubr.msk.bf16.mxu1 %vm3486_vm1, %v3485_v15 }
 0xa3a   : > { %2711 = vmatprep.subr.bf16.mxu1 %v3485_v15  ;;  %v1873_v3 = vpack.c.bf16 %v1872_v2, %v1872_v2 }
 0xa40   : > { %2700 = vmatmul.mubr.msk.bf16.vlgmr.msra.gmra.mrb[44].mxu1 %vm884_vm2, %v1873_v3 }
 0xa41   : > { %2715 = vmatprep.mubr.msk.bf16.mxu1 %vm3486_vm1, %v3485_v15  ;;  %2712 = vmatpush3.bf16.msra.mxu1 %v2927_v39 }
 0xa42   : > { %2713 = vmatprep.subr.bf16.mxu1 %v3485_v15 }
 0xa45   : > { %2714 = vmatpush3.bf16.msra.mxu1 %v2928_v40 }
 0xaf7   : > { %v1564_v4 = vpop.f32.mrb[32].mxu1 }
 0xaf8   : > { %v1570_v5 = vpack.c.bf16 %v1564_v4, %v1564_v4  ;;  %v2665_v6 = vpop.f32.mrb[33].mxu1 }
 0xaf9   : > { %v1567_v7 = vpop.f32.mrb[34].mxu1 }
 0xafa   : > { %1571 = vst.msk [vmem:[#allocation2] sm:$0xf] %vm996_vm6, %v1570_v5  ;;  %v2666_v8 = vpop.f32.mrb[35].mxu1  ;;  %v2497_v5 = vld [vmem:[#allocation24] ss:$0 sm:$0xff] }
 0xb03   : > { %v1678_v9 = vpop.f32.mrb[36].mxu1 }
 0xb04   : > { %v2513_v10 = vpack.c.bf16 %v1678_v9, %v1678_v9  ;;  %v2677_v11 = vpop.f32.mrb[37].mxu1 }
 0xb05   : > { %v1681_v12 = vpop.f32.mrb[38].mxu1 }
 0xb06   : > { %1688 = vrot.lane.b32.xlu1 %v2513_v10, %s3495_s13  ;;  %v2678_v13 = vpop.f32.mrb[39].mxu1 }
 0xb0b   : > { %v1797_v14 = vpop.f32.mrb[40].mxu1 }
 0xb0c   : > { %v2514_v16 = vpack.c.bf16 %v1797_v14, %v1797_v14  ;;  %v2689_v17 = vpop.f32.mrb[41].mxu1 }
 0xb0d   : > { %v1800_v18 = vpop.f32.mrb[42].mxu1 }
 0xb0e   : > { %1807 = vrot.lane.b32.xlu0 %v2514_v16, %s3496_s3  ;;  %v2690_v33 = vpop.f32.mrb[43].mxu1 }
 0xb13   : > { %v1916_v19 = vpop.f32.mrb[44].mxu1 }
 0xb14   : > { %v2515_v20 = vpack.c.bf16 %v1916_v19, %v1916_v19  ;;  %v2701_v21 = vpop.f32.mrb[45].mxu1 }
 0xb15   : > { %v1919_v35 = vpop.f32.mrb[46].mxu1 }
 0xb16   : > { %1926 = vrot.lane.b32.xlu1 %v2515_v20, %s3497_s15  ;;  %v2702_v22 = vpop.f32.mrb[47].mxu1 }
 0xb78   : > { %v1689_v23 = vpop.permute.xlu1 %1688 }
 0xb79   : > { %1691 = vst.msk [vmem:[#allocation2] sm:$0xf] %vm1117_vm7, %v1689_v23 }
 0xb80   : > { %v1808_v24 = vpop.permute.xlu0 %1807 }
 0xb81   : > { %1810 = vst.msk [vmem:[#allocation2] sm:$0xf] %vm1237_vm8, %v1808_v24 }
 0xb88   : > { %v1927_v25 = vpop.permute.xlu1 %1926 }
 0xb89   : > { %1929 = vst.msk [vmem:[#allocation2] sm:$0xf] %vm1357_vm9, %v1927_v25 }
 0xb90   : > { %v1930_v63 = vld [vmem:[#allocation2] sm:$0xf] }
 0xb91   : > { %2708 = vmatmul.mubr.msk.bf16.vlgmr.msra.gmra.mrb[32].mxu0 %vm723_vm0, %v1930_v63 }
 0xb92   : > { %2735 = vmatprep.mubr.msk.bf16.mxu0 %vm3486_vm1, %v3485_v15 }
 0xc64   : > { %v1968_v26 = vpop.f32.mrb[32].mxu0 }
 0xc65   : > { %v4252_v27 = vadd.f32 %v1968_v26, %v4030_v0  ;;  %v2709_v28 = vpop.f32.mrb[33].mxu0  ;;  %v2929_v0 = vld [vmem:[#allocation23] sm:$0xff]  }
 0xc66   : > { %v1971_v29 = vpop.f32.mrb[34].mxu0  ;;  %2720 = vmatpush3.bf16.msra.mxu0 %v2929_v0 }
 0xc67   : > { %v2710_v30 = vpop.f32.mrb[35].mxu0  ;;  %v1977_v31 = vsel %vm723_vm0, %v4252_v27, 0.0  ;;  %2721 = vmatprep.subr.bf16.mxu0 %v3485_v15 }
 0xc68   : > { %1978 = vadd.xlane.f32.xlu0 %v1977_v31 }
 0xc6a   : > { %2722 = vmatpush3.bf16.msra.mxu0 %v2930_v41 }
 0xc6b   : > { %2723 = vmatprep.subr.bf16.mxu0 %v3485_v15 }
 0xc6e   : > { %2724 = vmatpush3.bf16.msra.mxu0 %v2931_v42 }
 0xc6f   : > { %2725 = vmatprep.subr.bf16.mxu0 %v3485_v15 }
 0xc72   : > { %2726 = vmatpush3.bf16.msra.mxu0 %v2932_v43 }
 0xc73   : > { %2727 = vmatprep.subr.bf16.mxu0 %v3485_v15 }
 0xc76   : > { %2728 = vmatpush3.bf16.msra.mxu0 %v2933_v44 }
 0xc77   : > { %2729 = vmatprep.subr.bf16.mxu0 %v3485_v15 }
 0xc7a   : > { %2730 = vmatpush3.bf16.msra.mxu0 %v2934_v45 }
 0xc7b   : > { %2731 = vmatprep.subr.bf16.mxu0 %v3485_v15 }
 0xc7e   : > { %2732 = vmatpush3.bf16.msra.mxu0 %v2935_v57 }
 0xc7f   : > { %2733 = vmatprep.subr.bf16.mxu0 %v3485_v15 }
 0xc82   : > { %2734 = vmatpush3.bf16.msra.mxu0 %v2936_v58 }
 0xcf5   : > { %v1979_v32 = vpop.xlane.xlu0 %1978 }
 0xcf6   : > { %v1980_v37 = vmul.f32 0.03125, %v1979_v32 }
 0xcf8   : > { %v1981_v34 = vsub.f32 %v4252_v27, %v1980_v37 }
 0xcfa   : > { %v1982_v36 = vmul.f32 %v1981_v34, %v1981_v34 }
 0xcfc   : > { %v1983_v38 = vsel %vm723_vm0, %v1982_v36, 0.0 }
 0xcfd   : > { %1984 = vadd.xlane.f32.xlu1 %v1983_v38 }
 0xd8a   : > { %v1985_v46 = vpop.xlane.xlu1 %1984 }
 0xd8b   : > { %v1986_v47 = vmul.f32 0.03125, %v1985_v46 }
 0xd8d   : > { %v1987_v48 = vadd.f32 1e-05, %v1986_v47 }
 0xd8f   : > { %2973 = vrsqrt.f32 %v1987_v48 }
 0xd99   : > { %v2974_v49 = vpop.eup %2973 }
 0xd9a   : > { %v1989_v52 = vmul.f32 %v2974_v49, %v1981_v34 }
 0xd9c   : > { %v1996_v54 = vmul.f32 %v2491_v50, %v1989_v52 }
 0xd9e   : > { %v2003_v55 = vadd.f32 %v2492_v53, %v1996_v54 }
 0xda0   : > { %v2004_v56 = vpack.c.bf16 %v2003_v55, %v2003_v55 }
 0xda2   : > { %2716 = vmatmul.mubr.msk.bf16.vlgmr.msra.gmra.mrb[48].mxu1 %vm723_vm0, %v2004_v56 }
 0xe75   : > { %v2065_v60 = vpop.f32.mrb[48].mxu1 }
 0xe76   : > { %v2066_v51 = vadd.f32 %v2493_v59, %v2065_v60  ;;  %v2717_v61 = vpop.f32.mrb[49].mxu1 }
 0xe77   : > { %v2068_v1 = vpop.f32.mrb[50].mxu1 }
 0xe78   : > { %vm2071_vm10 = vcmp.ge.f32.partialorder %v2066_v51, 0.0  ;;  %v2072_v62 = vmul.f32 0.01, %v2066_v51  ;;  %v2718_v2 = vpop.f32.mrb[51].mxu1 }
 0xe7a   : > { %v2073_v3 = vsel %vm2071_vm10, %v2066_v51, %v2072_v62 }
 0xe7b   : > { %v2074_v4 = vpack.c.bf16 %v2073_v3, %v2073_v3 }
 0xe7d   : > { %2736 = vmatmul.mubr.bf16.vlgmr.msra.gmra.mrb[36].mxu0 %v2074_v4 }
 0xf50   : > { %v2180_v6 = vpop.f32.mrb[36].mxu0 }
 0xf51   : > { %v2181_v15 = vadd.f32 %v2497_v5, %v2180_v6  ;;  %v2737_v7 = vpop.f32.mrb[37].mxu0 }
 0xf52   : > { %v2183_v8 = vpop.f32.mrb[38].mxu0 }
 0xf53   : > { %v2186_v9 = vadd.f32 %v2181_v15, %v4252_v27  ;;  %v2738_v10 = vpop.f32.mrb[39].mxu0 }
 0xf55   : > { %2187 = vst.msk [vmem:[%s701_s26] sm:$0xff] %vm723_vm0, %v2186_v9 }
 0xf56   : > { %3386 = shalt.err (!%p3383_p8)
}
 0xf57   : > { %s3387_s9 = scalar_lea.hbm %s4273_s11, 128  ;;  %s3391_s6 = scalar_lea.hbm %s4427_s14, 256 }
 0xf58   : > { %p3388_p6 = scmp.ne.s32.totalorder %s4273_s11, %s3387_s9  ;;  %p3392_p12 = scmp.lt.u32.totalorder %s4273_s11, %s4427_s14 }
 0xf59   : > { %p3393_p10 = scmp.lt.u32.totalorder %s3391_s6, %s3387_s9  ;;  %p3395_p2 = scmp.lt.u32.totalorder %s3387_s9, %s4273_s11 }
 0xf5a   : > { %p3389_p0 = pnand %p3388_p6, %p4428_p1 }
 0xf5b   : > { %p3394_p11 = por %p3393_p10, %p3392_p12 }
 0xf5c   : > { %p3390_p9 = pneg %p3389_p0 }
 0xf5d   : > { %p3396_p4 = por %p3395_p2, %p3394_p11 }
 0xf5f   : > { %p3397_p13 = pnand %p3396_p4, %p3390_p9 }
 0xf61   : > { %3400 = shalt.err (!%p3397_p13)
}
 0xf62   : > { %2789 = dma.vmem_to_hbm [thread:$0]  (%p4428_p1), %s4275_s1, 128, %s4273_s11, %s2189_s19  }
 0xf63 PF: > { %s2214_s13 = sand.u32 1, %s3455_s29   ;;  %p4429_p3 = scmp.ne.s32.totalorder %s4389_s0, 0 }
 0xf64   : > { %p4430_p5 = scmp.ge.s32.totalorder %s3467_s16, 2  ;;  %s2215_s3 = scalar_lea.sflag [#allocation5], %s2214_s13 }
 0xf66   : > { %p2836_p7 = pnand %p4430_p5, %p4429_p3 }
 0xf68   : > { %3450 = dma.done.wait (!%p2836_p7), %s2215_s3, 128  }
 0xf69   : > { %3452 = vsyncadd (!%p2836_p7), %s2215_s3, 4294967168  ;;  %s4431_s16 = sld [smem:[#allocation38_spill]]  ;;  %s4432_s15 = sld [smem:[#allocation36_spill]] }
 0xf6a   : > { %s4433_s20 = sld [smem:[#allocation39_spill]]  ;;  %s4434_s29 = smov %s3459_s30 }
 0xf6f   : > { %p36_p8 = scmp.ge.s32.totalorder %s4431_s16, 4   ;;  %s4435_s30 = smov %s4432_s15 }
 0xf70   : > { %s4436_s15 = smov %s4433_s20 }
 0xf71   :  { %38 = sbr.rel (!%p36_p8) target bundleno = 28 (0x1c), region = 189 }
 0xf78   :  { %2220 = vsyncpa [#allocation4], 1 }
 0xf79   :  { %2222 = vsyncpa [#allocation4 + $0x1], 1 }
 0xf7a   :  { %2223 = vsyncpa [#allocation7], 1 }
 0xf7b   :  { %2225 = vsyncpa [#allocation7 + $0x1], 1 }
 0xf7c   :  { %2226 = vsyncpa [#allocation10], 1 }
 0xf7d   :  { %2227 = vsyncpa [#allocation13], 1 }
 0xf7e   :  { %2228 = vsyncpa [#allocation16], 1 }
 0xf7f   :  { %2229 = vsyncpa [#allocation19], 1 }
 0xf80   :  { %2230 = vsyncpa [#allocation22], 1 }
 0xf81   :  { %2231 = vsyncpa [#allocation25], 1 }
 0xf82   :  { %2232 = vsyncpa [#allocation5], 1 }
 0xf83   :  { %2234 = vsyncpa [#allocation5 + $0x1], 1 }

// kernel: tpu_custom_call.1
= control target key start
LH: loop header
LB: loop body
LE: loop exit
PB: predicated region body
PF: predicated region fallthrough
CT: control target
= control target key end

     0   :  { %s4318_s0 = inlined_call_operand.hbm [shape: f32[2,8,32], index: 0, kind: input, shape index: {}]   ;;  %s4319_s1 = inlined_call_operand.hbm [shape: f32[2,8,32], index: 1, kind: input, shape index: {}]   ;;  %s4320_s2 = inlined_call_operand.hbm [shape: s8[2,8,8], index: 2, kind: input, shape index: {}]   ;;  %s4321_s3 = inlined_call_operand.hbm [shape: bf16[32,64], index: 3, kind: input, shape index: {}]   ;;  %s4322_s4 = inlined_call_operand.hbm [shape: bf16[32,32], index: 4, kind: input, shape index: {}]   ;;  %s4323_s5 = inlined_call_operand.hbm [shape: bf16[32,32], index: 5, kind: input, shape index: {}]   ;;  %s4324_s6 = inlined_call_operand.hbm [shape: f32[1,32], index: 6, kind: input, shape index: {}]   ;;  %s4325_s7 = inlined_call_operand.hbm [shape: f32[1,32], index: 7, kind: input, shape index: {}]   ;;  %s4326_s8 = inlined_call_operand.hbm [shape: f32[1,32], index: 8, kind: input, shape index: {}]   ;;  %s4327_s9 = inlined_call_operand.hbm [shape: f32[1,32], index: 9, kind: input, shape index: {}]   ;;  %s4328_s10 = inlined_call_operand.hbm [shape: bf16[32,128], index: 10, kind: input, shape index: {}]   ;;  %s4329_s11 = inlined_call_operand.hbm [shape: f32[1,128], index: 11, kind: input, shape index: {}]   ;;  %s4330_s12 = inlined_call_operand.hbm [shape: bf16[128,32], index: 12, kind: input, shape index: {}]   ;;  %s4331_s13 = inlined_call_operand.hbm [shape: f32[1,32], index: 13, kind: input, shape index: {}]   ;;  %s4332_s14 = inlined_call_operand.hbm [shape: f32[2,8,32], index: 14, kind: output, shape index: {}]  }
   0x1   :  { %4360 = sst [smem:[#allocation40_spill]] %s4318_s0 }
   0x2   :  { %4361 = sst [smem:[#allocation41_spill]] %s4319_s1 }
   0x3   :  { %4362 = sst [smem:[#allocation42_spill]] %s4320_s2 }
   0x4   :  { %4363 = sst [smem:[#allocation43_spill]] %s4321_s3 }
   0x5   :  { %4364 = sst [smem:[#allocation44_spill]] %s4322_s4 }
   0x6   :  { %4365 = sst [smem:[#allocation45_spill]] %s4323_s5 }
   0x7   :  { %4366 = sst [smem:[#allocation46_spill]] %s4324_s6 }
   0x8   :  { %4367 = sst [smem:[#allocation47_spill]] %s4325_s7 }
   0x9   :  { %4368 = sst [smem:[#allocation48_spill]] %s4326_s8 }
   0xa   :  { %4369 = sst [smem:[#allocation49_spill]] %s4327_s9 }
   0xb   :  { %4370 = sst [smem:[#allocation50_spill]] %s4329_s11 }
   0xc   :  { %4371 = sst [smem:[#allocation51_spill]] %s4330_s12 }
   0xd   :  { %4372 = sst [smem:[#allocation52_spill]] %s4331_s13 }
   0xe   :  { %4373 = sst [smem:[#allocation53_spill]] %s4332_s14 }
   0xf   :  { %19 = vsyncpa [#allocation4], 0 }
  0x10   :  { %21 = vsyncpa [#allocation4 + $0x1], 0 }
  0x11   :  { %22 = vsyncpa [#allocation7], 0 }
  0x12   :  { %24 = vsyncpa [#allocation7 + $0x1], 0 }
  0x13   :  { %25 = vsyncpa [#allocation10], 0 }
  0x14   :  { %26 = vsyncpa [#allocation13], 0 }
  0x15   :  { %27 = vsyncpa [#allocation16], 0 }
  0x16   :  { %28 = vsyncpa [#allocation19], 0 }
  0x17   :  { %29 = vsyncpa [#allocation22], 0 }
  0x18   :  { %30 = vsyncpa [#allocation25], 0 }
  0x19   :  { %31 = vsyncpa [#allocation5], 0 }
  0x1a   :  { %33 = vsyncpa [#allocation5 + $0x1], 0  ;;  %s3574_s29 = smov 0   ;;  %s3576_s30 = smov 0  }
  0x1b   :  { %s3578_s15 = smov 0   ;;  %s3580_s16 = smov 0  }
  0x1c LB: > { %4374 = sst [smem:[#allocation36_spill]] %s3463_s15  ;;  %s3469_s17 = smov [#allocation9]   ;;  %s3467_s16 = sphi %s3580_s16, %s4431_s16   ;;  %s3463_s15 = sphi %s3578_s15, %s4436_s15   ;;  %s3459_s30 = sphi %s3576_s30, %s4435_s30   ;;  %s3455_s29 = sphi %s3574_s29, %s4434_s29  }
  0x1d   : > { %s391_s18 = sshll.u32 %s3469_s17, 4  ;;  %s3595_s19 = sadd.s32 4294967295, %s3467_s16   ;;  %s3600_s18 = int_to_ptr.vmem [resolvable:$true] %s391_s18 }
  0x1e   : > { %p2421_p0 = scmp.ge.s32.totalorder %s3467_s16, 1  ;;  %p4341_p1 = scmp.eq.s32.totalorder %s3595_s19, 0 }
  0x1f   : > { %p379_p2 = scmp.lt.s32.totalorder %s3467_s16, 3  ;;  %s3470_s21 = smov [#allocation12]  }
  0x20   : > { %s417_s22 = sshll.u32 %s3470_s21, 4  ;;  %s3471_s24 = smov [#allocation15]   ;;  %s3615_s22 = int_to_ptr.vmem [resolvable:$true] %s417_s22 }
  0x21   : > { %p3602_p3 = pnand %p2421_p0, %p379_p2  ;;  %s442_s25 = sshll.u32 %s3471_s24, 4  ;;  %s3617_s25 = int_to_ptr.vmem [resolvable:$true] %s442_s25 }
  0x22   : > { %s4378_s3 = sld [smem:[#allocation43_spill]] }
  0x23   : > { %s4375_s20 = scalar_select %p3602_p3, 1, 0 }
  0x24   : > { %p2791_p5 = pneg %p3602_p3 }
  0x25   : > { %4376 = sst [smem:[#allocation37_spill]] %s4375_s20 }
  0x26   : > { %p3611_p6 = pnand %p2791_p5, %p4341_p1 }
  0x28   : > { %s4377_s23 = scalar_select %p3611_p6, 1, 0 }
  0x29   : > { %s2975_s28 = scalar_lea.hbm %s4378_s3, 256  ;;  %p3627_p8 = pneg %p3611_p6 }
  0x2a   : > { %p2976_p7 = scmp.ne.s32.totalorder %s4378_s3, %s2975_s28  ;;  %p2982_p11 = scmp.lt.u32.totalorder %s2975_s28, %s4378_s3 }
  0x2b   : > { %s4379_s21 = scalar_select %p3627_p8, 1, 0 }
  0x2c   : > { %p2978_p9 = pnand %p3627_p8, %p2976_p7 }
  0x2e   : > { %p2979_p10 = pneg %p2978_p9 }
  0x30   : > { %p2984_p12 = pnand %p2982_p11, %p2979_p10 }
  0x32   : > { %2987 = shalt.err (!%p2984_p12)
}
  0x33   : > { %s2988_s14 = scalar_lea.vmem %s3600_s18, 256  ;;  %p2996_p5 = scmp.lt.s32.totalorder %s3600_s18, %s3600_s18 }
  0x34   : > { %p2989_p13 = scmp.ne.s32.totalorder %s3600_s18, %s2988_s14  ;;  %p2997_p4 = scmp.lt.s32.totalorder %s2988_s14, %s2988_s14 }
  0x36   : > { %p2991_p0 = pnand %p2989_p13, %p3627_p8  ;;  %p2998_p7 = por %p2997_p4, %p2996_p5 }
  0x38   : > { %p2992_p2 = pneg %p2991_p0 }
  0x3a   : > { %p2999_p9 = pnand %p2998_p7, %p2992_p2 }
  0x3c   : > { %3002 = shalt.err (!%p2999_p9)
}
  0x3d   : > { %s4339_s26 = smov 64   ;;  %s4343_s20 = smov 4  }
  0x3e   : > { %2794 = dma.hbm_to_vmem [thread:$0]  (!%p3611_p6), %s4378_s3, 256, %s3600_s18, [#allocation10], %s4339_s26, %s4339_s26, %s4343_s20  }
  0x3f   : > { %s4380_s5 = sld [smem:[#allocation45_spill]] }
  0x45   : > { %s3003_s14 = scalar_lea.hbm %s4380_s5, 256 }
  0x46   : > { %p3004_p4 = scmp.ne.s32.totalorder %s4380_s5, %s3003_s14  ;;  %p3010_p12 = scmp.lt.u32.totalorder %s3003_s14, %s4380_s5 }
  0x48   : > { %p3006_p10 = pnand %p3004_p4, %p3627_p8 }
  0x4a   : > { %p3007_p11 = pneg %p3006_p10 }
  0x4c   : > { %p3012_p13 = pnand %p3010_p12, %p3007_p11 }
  0x4e   : > { %3015 = shalt.err (!%p3012_p13)
}
  0x4f   : > { %s3016_s18 = scalar_lea.vmem %s3615_s22, 256  ;;  %p3024_p7 = scmp.lt.s32.totalorder %s3615_s22, %s3615_s22 }
  0x50   : > { %p3017_p0 = scmp.ne.s32.totalorder %s3615_s22, %s3016_s18  ;;  %p3025_p9 = scmp.lt.s32.totalorder %s3016_s18, %s3016_s18 }
  0x52   : > { %p3019_p2 = pnand %p3017_p0, %p3627_p8  ;;  %p3026_p4 = por %p3025_p9, %p3024_p7 }
  0x54   : > { %p3020_p5 = pneg %p3019_p2 }
  0x56   : > { %p3027_p10 = pnand %p3026_p4, %p3020_p5 }
  0x58   : > { %3030 = shalt.err (!%p3027_p10)
}
  0x59   : > { %2800 = dma.hbm_to_vmem [thread:$0]  (!%p3611_p6), %s4380_s5, 256, %s3615_s22, [#allocation13], %s4339_s26, %s4339_s26, %s4343_s20  }
  0x5a   : > { %s4381_s7 = sld [smem:[#allocation47_spill]] }
  0x60   : > { %s3031_s27 = scalar_lea.hbm %s4381_s7, 16 }
  0x61   : > { %p3032_p11 = scmp.ne.s32.totalorder %s4381_s7, %s3031_s27  ;;  %p3038_p0 = scmp.lt.u32.totalorder %s3031_s27, %s4381_s7 }
  0x63   : > { %p3034_p12 = pnand %p3032_p11, %p3627_p8 }
  0x65   : > { %p3035_p13 = pneg %p3034_p12 }
  0x67   : > { %p3040_p2 = pnand %p3038_p0, %p3035_p13 }
  0x69   : > { %3043 = shalt.err (!%p3040_p2)
}
  0x6a   : > { %s3044_s22 = scalar_lea.vmem %s3617_s25, 16  ;;  %s3051_s18 = scalar_lea.vmem %s3617_s25, 32 }
  0x6b   : > { %p3045_p5 = scmp.ne.s32.totalorder %s3617_s25, %s3044_s22  ;;  %p3052_p4 = scmp.lt.s32.totalorder %s3617_s25, %s3617_s25 }
  0x6c   : > { %p3053_p10 = scmp.lt.s32.totalorder %s3051_s18, %s3044_s22 }
  0x6d   : > { %p3047_p7 = pnand %p3045_p5, %p3627_p8 }
  0x6e   : > { %p3054_p11 = por %p3053_p10, %p3052_p4 }
  0x6f   : > { %p3048_p9 = pneg %p3047_p7 }
  0x71   : > { %p3055_p12 = pnand %p3054_p11, %p3048_p9 }
  0x73   : > { %3058 = shalt.err (!%p3055_p12)
}
  0x74   : > { %2806 = dma.hbm_to_vmem [thread:$0]  (!%p3611_p6), %s4381_s7, 16, %s3617_s25, [#allocation16]  }
  0x75   : > { %s3474_s12 = smov [#allocation18]   ;;  %s3475_s27 = smov [#allocation21]  }
  0x76   : > { %s464_s13 = sshll.u32 %s3474_s12, 4  ;;  %s488_s28 = sshll.u32 %s3475_s27, 4  ;;  %s465_s13 = int_to_ptr.vmem [resolvable:$true] %s464_s13  ;;  %s489_s28 = int_to_ptr.vmem [resolvable:$true] %s488_s28 }
  0x77   : > { %s4382_s9 = sld [smem:[#allocation49_spill]] }
  0x7d   : > { %s3059_s14 = scalar_lea.hbm %s4382_s9, 16 }
  0x7e   : > { %p3060_p13 = scmp.ne.s32.totalorder %s4382_s9, %s3059_s14  ;;  %p3066_p5 = scmp.lt.u32.totalorder %s3059_s14, %s4382_s9 }
  0x80   : > { %p3062_p0 = pnand %p3060_p13, %p3627_p8 }
  0x82   : > { %p3063_p2 = pneg %p3062_p0 }
  0x84   : > { %p3068_p7 = pnand %p3066_p5, %p3063_p2 }
  0x86   : > { %3071 = shalt.err (!%p3068_p7)
}
  0x87   : > { %s3072_s25 = scalar_lea.vmem %s465_s13, 16  ;;  %s3079_s2 = scalar_lea.vmem %s465_s13, 32 }
  0x88   : > { %p3073_p9 = scmp.ne.s32.totalorder %s465_s13, %s3072_s25  ;;  %p3080_p11 = scmp.lt.s32.totalorder %s465_s13, %s465_s13 }
  0x89   : > { %p3081_p12 = scmp.lt.s32.totalorder %s3079_s2, %s3072_s25 }
  0x8a   : > { %p3075_p4 = pnand %p3073_p9, %p3627_p8 }
  0x8b   : > { %p3082_p1 = por %p3081_p12, %p3080_p11 }
  0x8c   : > { %p3076_p10 = pneg %p3075_p4 }
  0x8e   : > { %p3083_p3 = pnand %p3082_p1, %p3076_p10 }
  0x90   : > { %3086 = shalt.err (!%p3083_p3)
}
  0x91   : > { %2812 = dma.hbm_to_vmem [thread:$0]  (!%p3611_p6), %s4382_s9, 16, %s465_s13, [#allocation19]  }
  0x92   : > { %s4383_s11 = sld [smem:[#allocation50_spill]] }
  0x98   : > { %s3087_s24 = scalar_lea.hbm %s4383_s11, 16 }
  0x99   : > { %p3088_p13 = scmp.ne.s32.totalorder %s4383_s11, %s3087_s24  ;;  %p3094_p3 = scmp.lt.u32.totalorder %s3087_s24, %s4383_s11 }
  0x9b   : > { %p3090_p0 = pnand %p3088_p13, %p3627_p8 }
  0x9d   : > { %p3091_p1 = pneg %p3090_p0 }
  0x9f   : > { %p3096_p2 = pnand %p3094_p3, %p3091_p1 }
  0xa1   : > { %3099 = shalt.err (!%p3096_p2)
}
  0xa2   : > { %s3100_s25 = scalar_lea.vmem %s489_s28, 16  ;;  %s3107_s13 = scalar_lea.vmem %s489_s28, 32 }
  0xa3   : > { %p3101_p5 = scmp.ne.s32.totalorder %s489_s28, %s3100_s25  ;;  %p3108_p4 = scmp.lt.s32.totalorder %s489_s28, %s489_s28 }
  0xa4   : > { %p3109_p10 = scmp.lt.s32.totalorder %s3107_s13, %s3100_s25 }
  0xa5   : > { %p3103_p7 = pnand %p3101_p5, %p3627_p8 }
  0xa6   : > { %p3110_p11 = por %p3109_p10, %p3108_p4 }
  0xa7   : > { %p3104_p9 = pneg %p3103_p7 }
  0xa9   : > { %p3111_p12 = pnand %p3110_p11, %p3104_p9 }
  0xab   : > { %3114 = shalt.err (!%p3111_p12)
}
  0xac   : > { %2818 = dma.hbm_to_vmem [thread:$0]  (!%p3611_p6), %s4383_s11, 16, %s489_s28, [#allocation22]  }
  0xad   : > { %s2420_s27 = sadd.s32 4294967294, %s3467_s16   ;;  %s3739_s26 = sadd.s32 1, %s3467_s16  }
  0xae   : > { %4384 = sst [smem:[#allocation38_spill]] %s3739_s26  ;;  %s46_s17 = sadd.s32 1, %s3463_s15 }
  0xaf   : > { %s43_s24 = ssub.s32 %s3467_s16, %s3739_s26  ;;  %p53_p13 = scmp.ne.s32.totalorder %s3463_s15, %s3459_s30 }
  0xb0   : > { %p44_p0 = scmp.eq.s32.totalorder %s43_s24, 0  ;;  %p54_p1 = scmp.eq.s32.totalorder %s3467_s16, 0 }
  0xb1   : > { %p59_p3 = scmp.ne.s32.totalorder %s3459_s30, %s3455_s29  ;;  %p366_p2 = scmp.eq.s32.totalorder %s3595_s19, 1 }
  0xb2   : > { %s3751_s14 = scalar_select %p44_p0, %s3463_s15, %s46_s17  }
  0xb3   : > { %p55_p5 = por %p54_p1, %p53_p13  ;;  %p4386_p7 = scmp.eq.s32.totalorder %s3595_s19, 0 }
  0xb4   : > { %4385 = sst [smem:[#allocation39_spill]] %s3751_s14  ;;  %p3759_p4 = por %p366_p2, %p53_p13 }
  0xb5   : > { %p3755_p9 = por %p4386_p7, %p59_p3  ;;  %p372_p10 = scmp.eq.s32.totalorder %s2420_s27, 1 }
  0xb6   : > { %s4388_s22 = scalar_select %p3759_p4, 1, 0 }
  0xb7   : > { %s4387_s28 = scalar_select %p3755_p9, 1, 0 }
  0xb8   : > { %p2850_p11 = scmp.lt.s32.totalorder %s3467_s16, 2  ;;  %s3765_s18 = sand.u32 1, %s3463_s15  }
  0xb9   : > { %p3767_p12 = por %p372_p10, %p59_p3  ;;  %s4345_s25 = sshll.u32 %s3765_s18, 3 }
  0xba   : > { %s4346_s13 = sshll.u32 %s3467_s16, 7  ;;  %p3773_p0 = pnand %p2850_p11, %p55_p5 }
  0xbb   : > { %s4389_s0 = scalar_select %p3767_p12, 1, 0 }
  0xbc   : > { %s4390_s2 = scalar_select %p3773_p0, 1, 0 }
  0xbd   : > { %s541_s12 = sand.u32 1, %s3467_s16   ;;  %s4391_s1 = sld [smem:[#allocation41_spill]] }
  0xbe   : > { %s545_s20 = scalar_lea.vmem [#allocation6], %s4345_s25  ;;  %s3789_s5 = scalar_lea.sflag [#allocation7], %s541_s12 }
  0xbf   : > { %s552_s3 = sshll.u32 %s545_s20, 4  ;;  %p3795_p1 = pneg %p3773_p0  ;;  %s3787_s3 = int_to_ptr.vmem [resolvable:$true] %s552_s3 }
  0xc1   : > { %s4392_s9 = scalar_select %p3795_p1, 1, 0 }
  0xc3   : > { %s3783_s24 = scalar_lea.hbm %s4391_s1, %s4346_s13  ;;  %s3120_s25 = scalar_lea.hbm %s4391_s1, 256 }
  0xc4   : > { %s3115_s7 = scalar_lea.hbm %s3783_s24, 128  ;;  %p3121_p5 = scmp.lt.u32.totalorder %s3783_s24, %s4391_s1 }
  0xc5   : > { %p3116_p13 = scmp.ne.s32.totalorder %s3783_s24, %s3115_s7  ;;  %p3122_p7 = scmp.lt.u32.totalorder %s3120_s25, %s3115_s7 }
  0xc6   : > { %p3124_p11 = scmp.lt.u32.totalorder %s3115_s7, %s3783_s24 }
  0xc7   : > { %p3118_p3 = pnand %p3795_p1, %p3116_p13  ;;  %p3123_p10 = por %p3122_p7, %p3121_p5 }
  0xc9   : > { %p3119_p2 = pneg %p3118_p3  ;;  %p3125_p12 = por %p3124_p11, %p3123_p10 }
  0xcb   : > { %p3126_p4 = pnand %p3125_p12, %p3119_p2 }
  0xcd   : > { %3129 = shalt.err (!%p3126_p4)
}
  0xce   : > { %s3130_s12 = scalar_lea.vmem %s3787_s3, 128  ;;  %s3476_s17 = smov [#allocation6]  }
  0xcf   : > { %p3131_p13 = scmp.ne.s32.totalorder %s3787_s3, %s3130_s12  ;;  %s3135_s27 = sshll.u32 %s3476_s17, 4  ;;  %s3136_s27 = int_to_ptr.vmem [resolvable:$false] %s3135_s27 }
  0xd0   : > { %s3137_s13 = scalar_lea.vmem %s3136_s27, 256  ;;  %p3138_p6 = scmp.lt.s32.totalorder %s3787_s3, %s3136_s27 }
  0xd1   : > { %p3133_p3 = pnand %p3131_p13, %p3795_p1  ;;  %p3139_p8 = scmp.lt.s32.totalorder %s3137_s13, %s3130_s12 }
  0xd3   : > { %p3134_p9 = pneg %p3133_p3  ;;  %p3140_p5 = por %p3139_p8, %p3138_p6 }
  0xd5   : > { %p3141_p7 = pnand %p3140_p5, %p3134_p9 }
  0xd7   : > { %3144 = shalt.err (!%p3141_p7)
}
  0xd8   : > { %2831 = dma.hbm_to_vmem [thread:$0]  (!%p3773_p0), %s3783_s24, 128, %s3787_s3, %s3789_s5  }
  0xd9   : > { %s3477_s7 = smov [#allocation11]   ;;  %s3478_s20 = smov [#allocation14]  }
  0xda   : > { %s404_s25 = sshll.u32 %s3477_s7, 4  ;;  %s431_s1 = sshll.u32 %s3478_s20, 4  ;;  %s405_s25 = int_to_ptr.vmem [resolvable:$true] %s404_s25  ;;  %s432_s1 = int_to_ptr.vmem [resolvable:$true] %s431_s1 }
  0xdb   : > { %s4393_s4 = sld [smem:[#allocation44_spill]]  ;;  %p4394_p8 = scmp.ne.s32.totalorder %s4379_s21, 0 }
  0xe1   : > { %s3145_s27 = scalar_lea.hbm %s4393_s4, 256 }
  0xe2   : > { %p3146_p6 = scmp.ne.s32.totalorder %s4393_s4, %s3145_s27  ;;  %p3152_p12 = scmp.lt.u32.totalorder %s3145_s27, %s4393_s4 }
  0xe4   : > { %p3148_p9 = pnand %p3146_p6, %p4394_p8 }
  0xe6   : > { %p3149_p4 = pneg %p3148_p9 }
  0xe8   : > { %p3154_p2 = pnand %p3152_p12, %p3149_p4 }
  0xea   : > { %3157 = shalt.err (!%p3154_p2)
}
  0xeb   : > { %s3158_s3 = scalar_lea.vmem %s405_s25, 256  ;;  %p3166_p3 = scmp.lt.s32.totalorder %s405_s25, %s405_s25 }
  0xec   : > { %p3159_p10 = scmp.ne.s32.totalorder %s405_s25, %s3158_s3  ;;  %p3167_p5 = scmp.lt.s32.totalorder %s3158_s3, %s3158_s3 }
  0xee   : > { %p3161_p11 = pnand %p3159_p10, %p4394_p8  ;;  %p3168_p7 = por %p3167_p5, %p3166_p3 }
  0xf0   : > { %p3162_p13 = pneg %p3161_p11 }
  0xf2   : > { %p3169_p0 = pnand %p3168_p7, %p3162_p13 }
  0xf4   : > { %3172 = shalt.err (!%p3169_p0)
}
  0xf5   : > { %p4395_p6 = scmp.ne.s32.totalorder %s4377_s23, 0  ;;  %s4396_s11 = smov 4  }
  0xf6   : > { %s4397_s24 = smov 64   ;;  %s4398_s6 = sld [smem:[#allocation46_spill]] }
  0xf7   : > { %2797 = dma.hbm_to_vmem [thread:$0]  (!%p4395_p6), %s4393_s4, 256, %s405_s25, [#allocation10], %s4397_s24, %s4397_s24, %s4396_s11  }
  0xfc   : > { %s3173_s17 = scalar_lea.hbm %s4398_s6, 16 }
  0xfd   : > { %p3174_p9 = scmp.ne.s32.totalorder %s4398_s6, %s3173_s17  ;;  %p3180_p12 = scmp.lt.u32.totalorder %s3173_s17, %s4398_s6 }
  0xff   : > { %p3176_p0 = pnand %p3174_p9, %p4394_p8 }
 0x101   : > { %p3177_p4 = pneg %p3176_p0 }
 0x103   : > { %p3182_p2 = pnand %p3180_p12, %p3177_p4 }
 0x105   : > { %3185 = shalt.err (!%p3182_p2)
}
 0x106   : > { %s3186_s15 = scalar_lea.vmem %s432_s1, 16  ;;  %s3193_s25 = scalar_lea.vmem %s432_s1, 32 }
 0x107   : > { %p3187_p10 = scmp.ne.s32.totalorder %s432_s1, %s3186_s15  ;;  %p3194_p3 = scmp.lt.s32.totalorder %s432_s1, %s432_s1 }
 0x108   : > { %p3195_p5 = scmp.lt.s32.totalorder %s3193_s25, %s3186_s15 }
 0x109   : > { %p3189_p11 = pnand %p3187_p10, %p4394_p8 }
 0x10a   : > { %p3196_p7 = por %p3195_p5, %p3194_p3 }
 0x10b   : > { %p3190_p13 = pneg %p3189_p11 }
 0x10d   : > { %p3197_p1 = pnand %p3196_p7, %p3190_p13 }
 0x10f   : > { %3200 = shalt.err (!%p3197_p1)
}
 0x110   : > { %2803 = dma.hbm_to_vmem [thread:$0]  (!%p4395_p6), %s4398_s6, 16, %s432_s1, [#allocation13]  }
 0x111   : > { %s3479_s20 = smov [#allocation17]   ;;  %s3480_s27 = smov [#allocation20]  }
 0x112   : > { %s453_s17 = sshll.u32 %s3479_s20, 4  ;;  %s474_s12 = sshll.u32 %s3480_s27, 4  ;;  %s454_s17 = int_to_ptr.vmem [resolvable:$true] %s453_s17  ;;  %s475_s12 = int_to_ptr.vmem [resolvable:$true] %s474_s12 }
 0x113   : > { %s4399_s8 = sld [smem:[#allocation48_spill]] }
 0x119   : > { %s3201_s4 = scalar_lea.hbm %s4399_s8, 16 }
 0x11a   : > { %p3202_p1 = scmp.ne.s32.totalorder %s4399_s8, %s3201_s4  ;;  %p3208_p4 = scmp.lt.u32.totalorder %s3201_s4, %s4399_s8 }
 0x11c   : > { %p3204_p9 = pnand %p3202_p1, %p4394_p8 }
 0x11e   : > { %p3205_p0 = pneg %p3204_p9 }
 0x120   : > { %p3210_p12 = pnand %p3208_p4, %p3205_p0 }
 0x122   : > { %3213 = shalt.err (!%p3210_p12)
}
 0x123   : > { %s3214_s1 = scalar_lea.vmem %s454_s17, 16  ;;  %s3221_s7 = scalar_lea.vmem %s454_s17, 32 }
 0x124   : > { %p3215_p2 = scmp.ne.s32.totalorder %s454_s17, %s3214_s1  ;;  %p3222_p13 = scmp.lt.s32.totalorder %s454_s17, %s454_s17 }
 0x125   : > { %p3223_p3 = scmp.lt.s32.totalorder %s3221_s7, %s3214_s1 }
 0x126   : > { %p3217_p10 = pnand %p3215_p2, %p4394_p8 }
 0x127   : > { %p3224_p5 = por %p3223_p3, %p3222_p13 }
 0x128   : > { %p3218_p11 = pneg %p3217_p10 }
 0x12a   : > { %p3225_p7 = pnand %p3224_p5, %p3218_p11 }
 0x12c   : > { %3228 = shalt.err (!%p3225_p7)
}
 0x12d   : > { %2809 = dma.hbm_to_vmem [thread:$0]  (!%p4395_p6), %s4399_s8, 16, %s454_s17, [#allocation16]  }
 0x12e   : > { %s3229_s13 = scalar_lea.hbm %s4328_s10, 256 }
 0x12f   : > { %p3230_p1 = scmp.ne.s32.totalorder %s4328_s10, %s3229_s13  ;;  %p3236_p4 = scmp.lt.u32.totalorder %s3229_s13, %s4328_s10 }
 0x131   : > { %p3232_p9 = pnand %p3230_p1, %p4394_p8 }
 0x133   : > { %p3233_p0 = pneg %p3232_p9 }
 0x135   : > { %p3238_p12 = pnand %p3236_p4, %p3233_p0 }
 0x137   : > { %3241 = shalt.err (!%p3238_p12)
}
 0x138   : > { %s3242_s1 = scalar_lea.vmem %s475_s12, 256  ;;  %p3250_p13 = scmp.lt.s32.totalorder %s475_s12, %s475_s12 }
 0x139   : > { %p3243_p2 = scmp.ne.s32.totalorder %s475_s12, %s3242_s1  ;;  %p3251_p3 = scmp.lt.s32.totalorder %s3242_s1, %s3242_s1 }
 0x13b   : > { %p3245_p10 = pnand %p3243_p2, %p4394_p8  ;;  %p3252_p5 = por %p3251_p3, %p3250_p13 }
 0x13d   : > { %p3246_p11 = pneg %p3245_p10 }
 0x13f   : > { %p3253_p7 = pnand %p3252_p5, %p3246_p11 }
 0x141   : > { %3256 = shalt.err (!%p3253_p7)
}
 0x142   : > { %2815 = dma.hbm_to_vmem [thread:$0]  (!%p4395_p6), %s4328_s10, 256, %s475_s12, [#allocation19], %s4397_s24, %s4397_s24, %s4396_s11  }
 0x143   : > { %s3481_s20 = smov [#allocation23]   ;;  %s3482_s4 = smov [#allocation24]  }
 0x144   : > { %s498_s27 = sshll.u32 %s3481_s20, 4  ;;  %s512_s26 = sshll.u32 %s3482_s4, 4  ;;  %s499_s27 = int_to_ptr.vmem [resolvable:$true] %s498_s27  ;;  %s513_s26 = int_to_ptr.vmem [resolvable:$true] %s512_s26 }
 0x145   : > { %s4400_s15 = sld [smem:[#allocation51_spill]] }
 0x14b   : > { %s4401_s25 = smov %s4400_s15  ;;  %s3257_s14 = scalar_lea.hbm %s4400_s15, 1024 }
 0x14c   : > { %p3258_p1 = scmp.ne.s32.totalorder %s4401_s25, %s3257_s14  ;;  %p3264_p4 = scmp.lt.u32.totalorder %s3257_s14, %s4401_s25 }
 0x14e   : > { %p3260_p9 = pnand %p3258_p1, %p4394_p8 }
 0x150   : > { %p3261_p0 = pneg %p3260_p9 }
 0x152   : > { %p3266_p12 = pnand %p3264_p4, %p3261_p0 }
 0x154   : > { %3269 = shalt.err (!%p3266_p12)
}
 0x155   : > { %s3270_s12 = scalar_lea.vmem %s499_s27, 1024  ;;  %p3278_p13 = scmp.lt.s32.totalorder %s499_s27, %s499_s27 }
 0x156   : > { %p3271_p2 = scmp.ne.s32.totalorder %s499_s27, %s3270_s12  ;;  %p3279_p3 = scmp.lt.s32.totalorder %s3270_s12, %s3270_s12 }
 0x158   : > { %p3273_p10 = pnand %p3271_p2, %p4394_p8  ;;  %p3280_p5 = por %p3279_p3, %p3278_p13 }
 0x15a   : > { %p3274_p11 = pneg %p3273_p10 }
 0x15c   : > { %p3281_p7 = pnand %p3280_p5, %p3274_p11 }
 0x15e   : > { %3284 = shalt.err (!%p3281_p7)
}
 0x15f   : > { %2821 = dma.hbm_to_vmem [thread:$0]  (!%p4395_p6), %s4401_s25, 1024, %s499_s27, [#allocation22], %s4397_s24, %s4397_s24, %s4396_s11  }
 0x160   : > { %s4402_s4 = sld [smem:[#allocation52_spill]] }
 0x166   : > { %s3285_s13 = scalar_lea.hbm %s4402_s4, 16 }
 0x167   : > { %p3286_p1 = scmp.ne.s32.totalorder %s4402_s4, %s3285_s13  ;;  %p3292_p4 = scmp.lt.u32.totalorder %s3285_s13, %s4402_s4 }
 0x169   : > { %p3288_p9 = pnand %p3286_p1, %p4394_p8 }
 0x16b   : > { %p3289_p0 = pneg %p3288_p9 }
 0x16d   : > { %p3294_p12 = pnand %p3292_p4, %p3289_p0 }
 0x16f   : > { %3297 = shalt.err (!%p3294_p12)
}
 0x170   : > { %s3298_s17 = scalar_lea.vmem %s513_s26, 16  ;;  %s3305_s11 = scalar_lea.vmem %s513_s26, 32 }
 0x171   : > { %p3299_p2 = scmp.ne.s32.totalorder %s513_s26, %s3298_s17  ;;  %p3306_p13 = scmp.lt.s32.totalorder %s513_s26, %s513_s26 }
 0x172   : > { %p3307_p3 = scmp.lt.s32.totalorder %s3305_s11, %s3298_s17 }
 0x173   : > { %p3301_p10 = pnand %p3299_p2, %p4394_p8 }
 0x174   : > { %p3308_p5 = por %p3307_p3, %p3306_p13 }
 0x175   : > { %p3302_p11 = pneg %p3301_p10 }
 0x177   : > { %p3309_p7 = pnand %p3308_p5, %p3302_p11 }
 0x179   : > { %3312 = shalt.err (!%p3309_p7)
}
 0x17a   : > { %2824 = dma.hbm_to_vmem [thread:$0]  (!%p4395_p6), %s4402_s4, 16, %s513_s26, [#allocation25]  }
 0x17b   : > { %s4403_s21 = sshll.u32 %s3467_s16, 7  ;;  %s4404_s8 = sld [smem:[#allocation40_spill]] }
 0x17c   : > { %s4405_s20 = sshll.u32 %s3765_s18, 3  ;;  %s2438_s3 = sshll.u32 %s3765_s18, 1 }
 0x17d   : > { %s527_s23 = scalar_lea.vmem [#allocation3], %s4405_s20  ;;  %s524_s15 = scalar_lea.sflag [#allocation4], %s3765_s18 }
 0x17e   : > { %s534_s13 = sshll.u32 %s527_s23, 4  ;;  %p4406_p1 = scmp.ne.s32.totalorder %s4392_s9, 0  ;;  %s535_s13 = int_to_ptr.vmem [resolvable:$true] %s534_s13 }
 0x181   : > { %s3941_s7 = scalar_lea.hbm %s4404_s8, %s4403_s21  ;;  %s3318_s17 = scalar_lea.hbm %s4404_s8, 256 }
 0x182   : > { %s3313_s14 = scalar_lea.hbm %s3941_s7, 128  ;;  %p3319_p0 = scmp.lt.u32.totalorder %s3941_s7, %s4404_s8 }
 0x183   : > { %p3314_p8 = scmp.ne.s32.totalorder %s3941_s7, %s3313_s14  ;;  %p3320_p4 = scmp.lt.u32.totalorder %s3318_s17, %s3313_s14 }
 0x184   : > { %p3322_p2 = scmp.lt.u32.totalorder %s3313_s14, %s3941_s7 }
 0x185   : > { %p3316_p6 = pnand %p3314_p8, %p4406_p1  ;;  %p3321_p12 = por %p3320_p4, %p3319_p0 }
 0x187   : > { %p3317_p9 = pneg %p3316_p6  ;;  %p3323_p10 = por %p3322_p2, %p3321_p12 }
 0x189   : > { %p3324_p11 = pnand %p3323_p10, %p3317_p9 }
 0x18b   : > { %3327 = shalt.err (!%p3324_p11)
}
 0x18c   : > { %s3328_s27 = scalar_lea.vmem %s535_s13, 128  ;;  %s3483_s21 = smov [#allocation3]  }
 0x18d   : > { %p3329_p13 = scmp.ne.s32.totalorder %s535_s13, %s3328_s27  ;;  %s3333_s12 = sshll.u32 %s3483_s21, 4  ;;  %s3334_s12 = int_to_ptr.vmem [resolvable:$false] %s3333_s12 }
 0x18e   : > { %s3335_s6 = scalar_lea.vmem %s3334_s12, 256  ;;  %p3336_p7 = scmp.lt.s32.totalorder %s535_s13, %s3334_s12 }
 0x18f   : > { %p3331_p3 = pnand %p3329_p13, %p4406_p1  ;;  %p3337_p8 = scmp.lt.s32.totalorder %s3335_s6, %s3328_s27 }
 0x191   : > { %p3332_p5 = pneg %p3331_p3  ;;  %p3338_p6 = por %p3337_p8, %p3336_p7 }
 0x193   : > { %p3339_p0 = pnand %p3338_p6, %p3332_p5 }
 0x195   : > { %3342 = shalt.err (!%p3339_p0)
}
 0x196   : > { %p4407_p4 = scmp.ne.s32.totalorder %s4390_s2, 0  ;;  %s2439_s20 = sshll.u32 %s3467_s16, 5 }
 0x197   : > { %s563_s23 = scalar_lea.vmem [#allocation8], %s2438_s3  ;;  %s4408_s17 = sld [smem:[#allocation42_spill]] }
 0x198   : > { %2828 = dma.hbm_to_vmem [thread:$0]  (!%p4407_p4), %s3941_s7, 128, %s535_s13, %s524_s15  }
 0x199   : > { %s570_s14 = sshll.u32 %s563_s23, 4  ;;  %s571_s14 = int_to_ptr.vmem [resolvable:$true] %s570_s14 }
 0x19d   : > { %s568_s11 = scalar_lea.hbm %s4408_s17, %s2439_s20  ;;  %s3348_s12 = scalar_lea.hbm %s4408_s17, 64 }
 0x19e   : > { %s3343_s24 = scalar_lea.hbm %s568_s11, 32  ;;  %p3349_p10 = scmp.lt.u32.totalorder %s568_s11, %s4408_s17 }
 0x19f   : > { %p3344_p9 = scmp.ne.s32.totalorder %s568_s11, %s3343_s24  ;;  %p3350_p11 = scmp.lt.u32.totalorder %s3348_s12, %s3343_s24 }
 0x1a0   : > { %p3352_p3 = scmp.lt.u32.totalorder %s3343_s24, %s568_s11 }
 0x1a1   : > { %p3346_p12 = pnand %p3344_p9, %p4406_p1  ;;  %p3351_p13 = por %p3350_p11, %p3349_p10 }
 0x1a3   : > { %p3347_p2 = pneg %p3346_p12  ;;  %p3353_p5 = por %p3352_p3, %p3351_p13 }
 0x1a5   : > { %p3354_p7 = pnand %p3353_p5, %p3347_p2 }
 0x1a7   : > { %3357 = shalt.err (!%p3354_p7)
}
 0x1a8   : > { %s3358_s18 = scalar_lea.vmem %s571_s14, 32  ;;  %s3484_s13 = smov [#allocation8]  }
 0x1a9   : > { %p3359_p8 = scmp.ne.s32.totalorder %s571_s14, %s3358_s18  ;;  %s3363_s3 = sshll.u32 %s3484_s13, 4  ;;  %s3364_s3 = int_to_ptr.vmem [resolvable:$false] %s3363_s3 }
 0x1aa   : > { %s3365_s15 = scalar_lea.vmem %s3364_s3, 64  ;;  %p3366_p9 = scmp.lt.s32.totalorder %s571_s14, %s3364_s3 }
 0x1ab   : > { %p3361_p6 = pnand %p3359_p8, %p4406_p1  ;;  %p3367_p12 = scmp.lt.s32.totalorder %s3365_s15, %s3358_s18 }
 0x1ad   : > { %p3362_p0 = pneg %p3361_p6  ;;  %p3368_p4 = por %p3367_p12, %p3366_p9 }
 0x1af   : > { %p3369_p10 = pnand %p3368_p4, %p3362_p0 }
 0x1b1   : > { %3372 = shalt.err (!%p3369_p10)
}
 0x1b2   : > { %p4409_p11 = scmp.ne.s32.totalorder %s4390_s2, 0  ;;  %s4410_s20 = sld [smem:[#allocation37_spill]] }
 0x1b4   : > { %2834 = dma.hbm_to_vmem [thread:$0]  (!%p4409_p11), %s568_s11, 32, %s571_s14, %s3789_s5  }
 0x1b8   : > { %p4411_p2 = scmp.ne.s32.totalorder %s4410_s20, 0 }
 0x1b9   : > { %s3986_s9 = sand.u32 (!%p4411_p2), 1, %s3459_s30   ;;  %p4412_p1 = scmp.ne.s32.totalorder (!%p4411_p2), %s4387_s28, 0 }
 0x1ba   : > { %579 = sbr.rel (%p4411_p2) target bundleno = 3939 (0xf63), region = 76  ;;  %s3989_s23 = sshll.u32 (!%p4411_p2), %s3986_s9, 3 }
 0x1bb   : > { %s582_s26 = scalar_lea.sflag (!%p4411_p2), [#allocation4], %s3986_s9  ;;  %s585_s1 = scalar_lea.vmem (!%p4411_p2), [#allocation3], %s3989_s23 }
 0x1c1   : > { %3418 = dma.done.wait (%p4412_p1), %s582_s26, 128  }
 0x1c2   : > { %3420 = vsyncadd (%p4412_p1), %s582_s26, 4294967168  ;;  %s590_s5 = sand.u32 1, %s3595_s19   ;;  %s594_s14 = scalar_lea.vmem [#allocation6], %s3989_s23 }
 0x1c3   : > { %s591_s2 = scalar_lea.sflag [#allocation7], %s590_s5 }
 0x1c4   : > { %3422 = dma.done.wait (%p4412_p1), %s591_s2, 160  }
 0x1c5   : > { %3424 = vsyncadd (%p4412_p1), %s591_s2, 4294967136  ;;  %s2443_s11 = sshll.u32 %s3986_s9, 1  ;;  %p4413_p4 = scmp.eq.s32.totalorder %s3595_s19, 0 }
 0x1c6   : > { %s4004_s24 = scalar_lea.vmem [#allocation8], %s2443_s11 }
 0x1c7   : > { %3426 = dma.done.wait (%p4413_p4), [#allocation10], 512   ;;  %p4414_p13 = pmov %p4413_p4 }
 0x1c8   : > { %p4415_p3 = pmov %p4413_p4 }
 0x1c9   : > { %3428 = vsyncadd (%p4414_p13), [#allocation10], 4294966784 }
 0x1ca   : > { %3430 = dma.done.wait (%p4415_p3), [#allocation13], 272   ;;  %p4416_p5 = pmov %p4415_p3 }
 0x1cb   : > { %p4417_p7 = pmov %p4415_p3 }
 0x1cc   : > { %3432 = vsyncadd (%p4416_p5), [#allocation13], 4294967024 }
 0x1cd   : > { %3434 = dma.done.wait (%p4417_p7), [#allocation16], 32   ;;  %p4418_p8 = pmov %p4415_p3 }
 0x1ce   : > { %p4419_p6 = pmov %p4415_p3 }
 0x1cf   : > { %3436 = vsyncadd (%p4418_p8), [#allocation16], 4294967264 }
 0x1d0   : > { %3438 = dma.done.wait (%p4419_p6), [#allocation19], 272   ;;  %p4420_p0 = pmov %p4415_p3 }
 0x1d2   : > { %3440 = vsyncadd (%p4420_p0), [#allocation19], 4294967024  ;;  %p4421_p9 = pmov %p4420_p0 }
 0x1d3   : > { %p4422_p12 = pmov %p4420_p0 }
 0x1d4   : > { %3442 = dma.done.wait (%p4421_p9), [#allocation22], 1040  }
 0x1d5   : > { %3444 = vsyncadd (%p4422_p12), [#allocation22], 4294966256  ;;  %p4423_p10 = pmov %p4420_p0 }
 0x1d6   : > { %p4424_p11 = pmov %p4420_p0 }
 0x1d7   : > { %3446 = dma.done.wait (%p4423_p10), [#allocation25], 16  }
 0x1d8   : > { %3448 = vsyncadd (%p4424_p11), [#allocation25], 4294967280  ;;  %vm723_vm0 = vcmask 261120   ;;  %v4030_v0 = vld [vmem:[%s585_s1] sm:$0xff]  ;;  %v4032_v1 = vld [vmem:[%s594_s14] sm:$0xff]  ;;  %v3485_v15 = vmov 0.0  }
 0x1d9   : > { %v724_v2 = vsel %vm723_vm0, %v4030_v0, 0.0  ;;  %v727_v3 = vsel %vm723_vm0, %v4032_v1, 0.0  ;;  %v2921_v14 = vld [vmem:[#allocation9] sm:$0xff]   ;;  %2575 = vmatprep.subr.bf16.mxu1 %v3485_v15  ;;  %2603 = vmatprep.subr.bf16.mxu0 %v3485_v15  ;;  %v2922_v16 = vld [vmem:[#allocation9 + $0x8] sm:$0xff]   ;;  %vm3486_vm1 = vmmov 0   ;;  %v4050_v33 = vld [vmem:[#allocation11] sm:$0xff]  }
 0x1da   : > { %725 = vadd.xlane.f32.xlu0 %v724_v2  ;;  %2576 = vmatpush3.bf16.msra.mxu1 %v2921_v14  ;;  %v2456_v25 = vld [vmem:[#allocation14] ss:$0 sm:$0xff]  ;;  %v2457_v29 = vld [vmem:[#allocation15] ss:$0 sm:$0xff]  ;;  %v4054_v35 = vld [vmem:[#allocation11 + $0x8] sm:$0xff]   ;;  %s3487_s28 = smov 88  }
 0x1db   : > { %2579 = vmatprep.mubr.msk.bf16.mxu1 %vm3486_vm1, %v3485_v15  ;;  %2577 = vmatprep.subr.bf16.mxu1 %v3485_v15  ;;  %s3488_s27 = smov 96   ;;  %s3489_s21 = smov 120   ;;  %vm884_vm2 = vcmask 64512   ;;  %vm951_vm3 = vcmask 1043456   ;;  %v707_v59 = vld [vmem:[%s4004_s24] sm:$0x3] }
 0x1dc   : > { %2605 = vmatprep.mubr.msk.bf16.mxu0 %vm3486_vm1, %v3485_v15  ;;  %s3490_s12 = smov 112   ;;  %s3491_s6 = smov 80   ;;  %vm708_vm4 = vnez %v707_v59  ;;  %v3494_v60 = vmov 0   ;;  %vm996_vm6 = vcmask 60416   ;;  %vm1117_vm7 = vcmask 126016  }
 0x1dd   : > { %s3492_s7 = smov 104   ;;  %s3493_s18 = smov 72   ;;  %v931_v61 = vsel %vm708_vm4, 16843009, %v3494_v60  ;;  %vm1237_vm8 = vcmask 191616   ;;  %vm1357_vm9 = vcmask 257216  }
 0x1de   : > { %728 = vadd.xlane.f32.xlu0 %v727_v3  ;;  %2578 = vmatpush3.bf16.msra.mxu1 %v2922_v16  ;;  %v932_v62 = vunpack.c.0.s8 %v931_v61  ;;  %s3495_s13 = smov 8   ;;  %s3496_s3 = smov 16  }
 0x1df   : > { %2583 = vmatprep.subr.bf16.mxu1 %v3485_v15  ;;  %s3497_s15 = smov 24   ;;  %s2507_s20 = sshll.u32 %s3595_s19, 7 }
 0x1e0   : > { %vm4099_vm5 = vcmp.ne.s32.totalorder %v932_v62, 0  ;;  %s701_s26 = scalar_lea.vmem [#allocation26], %s3989_s23  ;;  %s4427_s14 = sld [smem:[#allocation53_spill]] }
 0x1e1   : > { %s2202_s1 = sshll.u32 %s701_s26, 4  ;;  %s2189_s19 = scalar_lea.sflag [#allocation5], %s3986_s9  ;;  %s4275_s1 = int_to_ptr.vmem [resolvable:$true] %s2202_s1 }
 0x1e2   : > { %s3373_s23 = scalar_lea.vmem %s4275_s1, 128  ;;  %p4428_p1 = scmp.ne.s32.totalorder %s4388_s22, 0 }
 0x1e3   : > { %p3374_p2 = scmp.ne.s32.totalorder %s4275_s1, %s3373_s23  ;;  %s3498_s24 = smov [#allocation26]  }
 0x1e5   : > { %p3375_p4 = pnand %p3374_p2, %p4428_p1 }
 0x1e6   : > { %s4273_s11 = scalar_lea.hbm %s4427_s14, %s2507_s20 }
 0x1e7   : > { %p3376_p13 = pneg %p3375_p4 }
 0x267   : > { %v726_v4 = vpop.xlane.xlu0 %725 }
 0x268   : > { %v731_v5 = vmul.f32 0.03125, %v726_v4 }
 0x26a   : > { %v733_v6 = vsub.f32 %v4030_v0, %v731_v5 }
 0x26b   : > { %v729_v7 = vpop.xlane.xlu0 %728 }
 0x26c   : > { %v732_v8 = vmul.f32 0.03125, %v729_v7  ;;  %v735_v9 = vmul.f32 %v733_v6, %v733_v6 }
 0x26e   : > { %v734_v10 = vsub.f32 %v4032_v1, %v732_v8  ;;  %v737_v11 = vsel %vm723_vm0, %v735_v9, 0.0 }
 0x26f   : > { %738 = vadd.xlane.f32.xlu1 %v737_v11 }
 0x270   : > { %v736_v12 = vmul.f32 %v734_v10, %v734_v10 }
 0x272   : > { %v740_v13 = vsel %vm723_vm0, %v736_v12, 0.0 }
 0x273   : > { %741 = vadd.xlane.f32.xlu1 %v740_v13 }
 0x2fc   : > { %v739_v17 = vpop.xlane.xlu1 %738 }
 0x2fd   : > { %v743_v18 = vmul.f32 0.03125, %v739_v17 }
 0x2ff   : > { %v745_v19 = vadd.f32 1e-05, %v743_v18 }
 0x300   : > { %v742_v20 = vpop.xlane.xlu1 %741 }
 0x301   : > { %2937 = vrsqrt.f32 %v745_v19  ;;  %v744_v21 = vmul.f32 0.03125, %v742_v20 }
 0x303   : > { %v746_v22 = vadd.f32 1e-05, %v744_v21 }
 0x305   : > { %2939 = vrsqrt.f32 %v746_v22 }
 0x30b   : > { %v2938_v23 = vpop.eup %2937 }
 0x30c   : > { %v749_v24 = vmul.f32 %v2938_v23, %v733_v6 }
 0x30e   : > { %v757_v28 = vmul.f32 %v2456_v25, %v749_v24 }
 0x30f   : > { %v2940_v26 = vpop.eup %2939 }
 0x310   : > { %v750_v27 = vmul.f32 %v2940_v26, %v734_v10  ;;  %v765_v31 = vadd.f32 %v2457_v29, %v757_v28 }
 0x312   : > { %v758_v30 = vmul.f32 %v2456_v25, %v750_v27 }
 0x314   : > { %v766_v32 = vadd.f32 %v2457_v29, %v758_v30 }
 0x316   : > { %v767_v34 = vpack.c.bf16 %v766_v32, %v765_v31  ;;  %v824_v36 = vpack.c.bf16 %v766_v32, %v766_v32 }
 0x318   : > { %2580 = vmatmul.mubr.msk.bf16.vlgmr.msra.gmra.mrb[0].mxu1 %vm723_vm0, %v767_v34 }
 0x319   : > { %2584 = vmatpush3.bf16.msra.mxu1 %v4050_v33  ;;  %2587 = vmatprep.mubr.msk.bf16.mxu1 %vm3486_vm1, %v3485_v15 }
 0x31a   : > { %2585 = vmatprep.subr.bf16.mxu1 %v3485_v15 }
 0x31d   : > { %2586 = vmatpush3.bf16.msra.mxu1 %v4054_v35 }
 0x31e   : > { %2591 = vmatprep.subr.bf16.mxu1 %v3485_v15 }
 0x320   : > { %2588 = vmatmul.mubr.msk.bf16.vlgmr.msra.gmra.mrb[4].mxu1 %vm723_vm0, %v824_v36 }
 0x321   : > { %2593 = vmatprep.mubr.msk.bf16.mxu1 %vm3486_vm1, %v3485_v15 }
 0x3eb   : > { %v4064_v37 = vpop.f32.mrb[0].mxu1 }
 0x3ec   : > { %v2581_v38 = vpop.f32.mrb[1].mxu1 }
 0x3ed   : > { %v820_v39 = vpop.f32.mrb[2].mxu1 }
 0x3ee   : > { %v880_v40 = vpack.c.bf16 %v820_v39, %v820_v39  ;;  %v2582_v41 = vpop.f32.mrb[3].mxu1 }
 0x3f0   : > { %1000 = vrot.lane.b32.xlu1 %v880_v40, %s3487_s28  ;;  %882 = vrot.lane.b32.xlu0 %v880_v40, %s3488_s27 }
 0x3f3   : > { %v874_v42 = vpop.f32.mrb[4].mxu1 }
 0x3f4   : > { %998 = vrot.lane.b32.xlu1 %v880_v40, %s3489_s21  ;;  %1119 = vrot.lane.b32.xlu0 %v880_v40, %s3490_s12  ;;  %v2589_v43 = vpop.f32.mrb[5].mxu1  ;;  %v4077_v51 = vpack.c.bf16 %v874_v42, %v874_v42 }
 0x3f5   : > { %v877_v44 = vpop.f32.mrb[6].mxu1 }
 0x3f6   : > { %v2590_v45 = vpop.f32.mrb[7].mxu1  ;;  %v953_v54 = vsel %vm951_vm3, %v4077_v51, 0 }
 0x3f8   : > { %1121 = vrot.lane.b32.xlu1 %v880_v40, %s3491_s6  ;;  %1239 = vrot.lane.b32.xlu0 %v880_v40, %s3492_s7 }
 0x3fc   : > { %1241 = vrot.lane.b32.xlu1 %v880_v40, %s3493_s18 }
 0x462   : > { %v1001_v46 = vpop.permute.xlu1 %1000  ;;  %v883_v47 = vpop.permute.xlu0 %882 }
 0x463   : > { %v889_v48 = vsel %vm884_vm2, %v883_v47, 0  ;;  %v1006_v49 = vsel %vm884_vm2, %v1001_v46, 0 }
 0x464   : > { %2592 = vmatpush3.bf16.xpose.msra.mxu1 %v889_v48  ;;  %2604 = vmatpush3.bf16.xpose.msra.mxu0 %v1006_v49 }
 0x465   : > { %2597 = vmatprep.subr.bf16.mxu1 %v3485_v15  ;;  %2615 = vmatprep.subr.bf16.mxu0 %v3485_v15 }
 0x466   : > { %v999_v50 = vpop.permute.xlu1 %998  ;;  %v1120_v56 = vpop.permute.xlu0 %1119 }
 0x46a   : > { %v1122_v52 = vpop.permute.xlu1 %1121  ;;  %v1240_v58 = vpop.permute.xlu0 %1239 }
 0x46b   : > { %v1127_v53 = vsel %vm884_vm2, %v1122_v52, 0  ;;  %2594 = vmatmul.mubr.msk.bf16.vlgmr.msra.gmra.mrb[8].mxu1 %vm884_vm2, %v880_v40  ;;  %2606 = vmatmul.mubr.msk.bf16.vlgmr.msra.gmra.mrb[0].mxu0 %vm884_vm2, %v999_v50 }
 0x46c   : > { %2598 = vmatpush3.bf16.msra.mxu1 %v953_v54  ;;  %2616 = vmatpush3.bf16.xpose.msra.mxu0 %v1127_v53 }
 0x46d   : > { %2617 = vmatprep.mubr.msk.bf16.mxu0 %vm3486_vm1, %v3485_v15  ;;  %2627 = vmatprep.subr.bf16.mxu0 %v3485_v15 }
 0x46e   : > { %2599 = vmatprep.mubr.msk.bf16.mxu1 %vm3486_vm1, %v3485_v15  ;;  %2609 = vmatprep.subr.bf16.mxu1 %v3485_v15  ;;  %v1242_v55 = vpop.permute.xlu1 %1241 }
 0x46f   : > { %v1247_v57 = vsel %vm884_vm2, %v1242_v55, 0 }
 0x473   : > { %2618 = vmatmul.mubr.msk.bf16.vlgmr.msra.gmra.mrb[4].mxu0 %vm884_vm2, %v1120_v56 }
 0x474   : > { %2628 = vmatpush3.bf16.xpose.msra.mxu0 %v1247_v57  ;;  %2629 = vmatprep.mubr.msk.bf16.mxu0 %vm3486_vm1, %v3485_v15 }
 0x475   : > { %2639 = vmatprep.subr.bf16.mxu0 %v3485_v15 }
 0x47b   : > { %2630 = vmatmul.mubr.msk.bf16.vlgmr.msra.gmra.mrb[8].mxu0 %vm884_vm2, %v1240_v58 }
 0x47c   : > { %2643 = vmatprep.mubr.msk.bf16.mxu0 %vm3486_vm1, %v3485_v15 }
 0x53e   : > { %v925_v2 = vpop.f32.mrb[8].mxu1  ;;  %v1042_v3 = vpop.f32.mrb[0].mxu0 }
 0x53f   : > { %v934_v4 = vsel %vm4099_vm5, -35355340.0, %v925_v2  ;;  %v1048_v5 = vsel %vm4099_vm5, -35355340.0, %v1042_v3  ;;  %v2595_v6 = vpop.f32.mrb[9].mxu1  ;;  %v2607_v7 = vpop.f32.mrb[1].mxu0 }
 0x540   : > { %v928_v8 = vpop.f32.mrb[10].mxu1  ;;  %v1045_v9 = vpop.f32.mrb[2].mxu0  ;;  %v1049_v10 = vsel %vm884_vm2, %v1048_v5, -inf  ;;  %v935_v11 = vsel %vm884_vm2, %v934_v4, -inf }
 0x541   : > { %v2608_v12 = vpop.f32.mrb[3].mxu0  ;;  %1050 = vmax.xlane.f32.xlu0 %v1049_v10  ;;  %936 = vmax.xlane.f32.xlu1 %v935_v11  ;;  %v2596_v13 = vpop.f32.mrb[11].mxu1 }
 0x546   : > { %v1163_v14 = vpop.f32.mrb[4].mxu0 }
 0x547   : > { %v1169_v16 = vsel %vm4099_vm5, -35355340.0, %v1163_v14  ;;  %v2619_v17 = vpop.f32.mrb[5].mxu0 }
 0x548   : > { %v1166_v18 = vpop.f32.mrb[6].mxu0  ;;  %v1170_v19 = vsel %vm884_vm2, %v1169_v16, -inf }
 0x549   : > { %1171 = vmax.xlane.f32.xlu0 %v1170_v19  ;;  %v2620_v20 = vpop.f32.mrb[7].mxu0 }
 0x54e   : > { %v1283_v21 = vpop.f32.mrb[8].mxu0 }
 0x54f   : > { %v1289_v22 = vsel %vm4099_vm5, -35355340.0, %v1283_v21  ;;  %v2631_v23 = vpop.f32.mrb[9].mxu0  ;;  %v4149_v21 = vld [vmem:[#allocation12] sm:$0xff]  }
 0x550   : > { %v1286_v24 = vpop.f32.mrb[10].mxu0  ;;  %v1290_v25 = vsel %vm884_vm2, %v1289_v22, -inf  ;;  %2640 = vmatpush3.bf16.msra.mxu0 %v4149_v21 }
 0x551   : > { %1291 = vmax.xlane.f32.xlu0 %v1290_v25  ;;  %v2632_v26 = vpop.f32.mrb[11].mxu0  ;;  %2641 = vmatprep.subr.bf16.mxu0 %v3485_v15 }
 0x5ce   : > { %v1051_v27 = vpop.xlane.xlu0 %1050  ;;  %v937_v28 = vpop.xlane.xlu1 %936 }
 0x5cf   : > { %v1052_v29 = vsub.f32 %v1048_v5, %v1051_v27  ;;  %v938_v30 = vsub.f32 %v934_v4, %v937_v28  ;;  %v1460_v27 = vpack.c.bf16 %v4064_v37, %v4064_v37 }
 0x5d1   : > { %v1053_v31 = vmul.f32 1.442695, %v1052_v29  ;;  %v939_v32 = vmul.f32 1.442695, %v938_v30 }
 0x5d3   : > { %2941 = vpow2.f32 %v1053_v31 }
 0x5d4   : > { %2943 = vpow2.f32 %v939_v32 }
 0x5d6   : > { %v1172_v34 = vpop.xlane.xlu0 %1171 }
 0x5d7   : > { %v1173_v46 = vsub.f32 %v1169_v16, %v1172_v34 }
 0x5d9   : > { %v1174_v47 = vmul.f32 1.442695, %v1173_v46 }
 0x5dd   : > { %v2942_v36 = vpop.eup %2941 }
 0x5de   : > { %v2944_v38 = vpop.eup %2943  ;;  %v1292_v39 = vpop.xlane.xlu0 %1291  ;;  %v1055_v40 = vsel %vm884_vm2, %v2942_v36, 0.0 }
 0x5df   : > { %v1293_v41 = vsub.f32 %v1289_v22, %v1292_v39  ;;  %1056 = vadd.xlane.f32.xlu0 %v1055_v40  ;;  %v941_v42 = vsel %vm884_vm2, %v2944_v38, 0.0 }
 0x5e0   : > { %942 = vadd.xlane.f32.xlu1 %v941_v42 }
 0x5e1   : > { %v1294_v43 = vmul.f32 1.442695, %v1293_v41 }
 0x5e3   : > { %2945 = vpow2.f32 %v1294_v43 }
 0x5e4   : > { %2947 = vpow2.f32 %v1174_v47 }
 0x5ed   : > { %v2946_v44 = vpop.eup %2945 }
 0x5ee   : > { %v1296_v45 = vsel %vm884_vm2, %v2946_v44, 0.0  ;;  %v2948_v48 = vpop.eup %2947 }
 0x5ef   : > { %1297 = vadd.xlane.f32.xlu0 %v1296_v45  ;;  %v1176_v49 = vsel %vm884_vm2, %v2948_v48, 0.0 }
 0x5f1   : > { %1062 = vrot.lane.b32.xlu1 %v4077_v51, %s3489_s21 }
 0x605   : > { %1182 = vrot.lane.b32.xlu0 %v4077_v51, %s3490_s12 }
 0x615   : > { %1177 = vadd.xlane.f32.xlu1 %v1176_v49 }
 0x626   : > { %1302 = vrot.lane.b32.xlu1 %v4077_v51, %s3492_s7 }
 0x66c   : > { %v1057_v52 = vpop.xlane.xlu0 %1056 }
 0x66d   : > { %v943_v50 = vpop.xlane.xlu1 %942 }
 0x66e   : > { %2949 = vrcp.f32 %v943_v50 }
 0x66f   : > { %2951 = vrcp.f32 %v1057_v52 }
 0x671   : > { %v1063_v55 = vpop.permute.xlu1 %1062 }
 0x672   : > { %v1068_v59 = vsel %vm951_vm3, %v1063_v55, 0 }
 0x678   : > { %v2950_v53 = vpop.eup %2949 }
 0x679   : > { %v945_v54 = vmul.f32 %v2950_v53, %v2944_v38  ;;  %v2952_v57 = vpop.eup %2951 }
 0x67a   : > { %v1059_v60 = vmul.f32 %v2952_v57, %v2942_v36 }
 0x67b   : > { %v946_v56 = vpack.c.bf16 %v945_v54, %v945_v54 }
 0x67c   : > { %v1298_v58 = vpop.xlane.xlu0 %1297  ;;  %v1060_v61 = vpack.c.bf16 %v1059_v60, %v1059_v60 }
 0x67d   : > { %2600 = vmatmul.mubr.msk.bf16.vlgmr.msra.gmra.mrb[12].mxu1 %vm884_vm2, %v946_v56 }
 0x67e   : > { %2610 = vmatpush3.bf16.msra.mxu1 %v1068_v59  ;;  %2611 = vmatprep.mubr.msk.bf16.mxu1 %vm3486_vm1, %v3485_v15 }
 0x67f   : > { %2621 = vmatprep.subr.bf16.mxu1 %v3485_v15 }
 0x680   : > { %v1183_v51 = vpop.permute.xlu0 %1182 }
 0x681   : > { %v1188_v62 = vsel %vm951_vm3, %v1183_v51, 0 }
 0x685   : > { %2612 = vmatmul.mubr.msk.bf16.vlgmr.msra.gmra.mrb[16].mxu1 %vm884_vm2, %v1060_v61 }
 0x686   : > { %2622 = vmatpush3.bf16.msra.mxu1 %v1188_v62  ;;  %2623 = vmatprep.mubr.msk.bf16.mxu1 %vm3486_vm1, %v3485_v15 }
 0x687   : > { %2633 = vmatprep.subr.bf16.mxu1 %v3485_v15 }
 0x6a2   : > { %v1178_v2 = vpop.xlane.xlu1 %1177 }
 0x6a3   : > { %2953 = vrcp.f32 %v1178_v2 }
 0x6a4   : > { %2955 = vrcp.f32 %v1298_v58 }
 0x6a6   : > { %v1303_v5 = vpop.permute.xlu1 %1302 }
 0x6a7   : > { %v1308_v8 = vsel %vm951_vm3, %v1303_v5, 0 }
 0x6ad   : > { %v2954_v3 = vpop.eup %2953 }
 0x6ae   : > { %v1180_v4 = vmul.f32 %v2954_v3, %v2948_v48  ;;  %v2956_v7 = vpop.eup %2955 }
 0x6af   : > { %v1300_v9 = vmul.f32 %v2956_v7, %v2946_v44 }
 0x6b0   : > { %v1181_v6 = vpack.c.bf16 %v1180_v4, %v1180_v4 }
 0x6b1   : > { %v1301_v10 = vpack.c.bf16 %v1300_v9, %v1300_v9 }
 0x6b2   : > { %2624 = vmatmul.mubr.msk.bf16.vlgmr.msra.gmra.mrb[20].mxu1 %vm884_vm2, %v1181_v6 }
 0x6b3   : > { %2634 = vmatpush3.bf16.msra.mxu1 %v1308_v8  ;;  %2635 = vmatprep.mubr.msk.bf16.mxu1 %vm3486_vm1, %v3485_v15 }
 0x6b4   : > { %2647 = vmatprep.subr.bf16.mxu1 %v3485_v15 }
 0x6ba   : > { %2636 = vmatmul.mubr.msk.bf16.vlgmr.msra.gmra.mrb[24].mxu1 %vm884_vm2, %v1301_v10 }
 0x6bb   : > { %2648 = vmatpush3.bf16.msra.mxu1 %v4050_v33  ;;  %2651 = vmatprep.mubr.msk.bf16.mxu1 %vm3486_vm1, %v3485_v15 }
 0x6bc   : > { %2649 = vmatprep.subr.bf16.mxu1 %v3485_v15 }
 0x6bf   : > { %2650 = vmatpush3.bf16.msra.mxu1 %v4054_v35  ;;  %v4153_v35 = vld [vmem:[#allocation12 + $0x8] sm:$0xff]  }
 0x6c0   : > { %2661 = vmatprep.subr.bf16.mxu1 %v3485_v15  ;;  %2642 = vmatpush3.bf16.msra.mxu0 %v4153_v35 }
 0x6c1   : > { %2655 = vmatprep.subr.bf16.mxu0 %v3485_v15 }
 0x750   : > { %v989_v11 = vpop.f32.mrb[12].mxu1 }
 0x751   : > { %v995_v12 = vpack.c.bf16 %v989_v11, %v989_v11  ;;  %v2601_v13 = vpop.f32.mrb[13].mxu1 }
 0x752   : > { %v992_v14 = vpop.f32.mrb[14].mxu1 }
 0x753   : > { %997 = vst.msk [vmem:[#allocation2] sm:$0xf] %vm996_vm6, %v995_v12  ;;  %v2602_v16 = vpop.f32.mrb[15].mxu1 }
 0x758   : > { %v1104_v17 = vpop.f32.mrb[16].mxu1 }
 0x759   : > { %v2510_v18 = vpack.c.bf16 %v1104_v17, %v1104_v17  ;;  %v2613_v33 = vpop.f32.mrb[17].mxu1 }
 0x75a   : > { %v1107_v19 = vpop.f32.mrb[18].mxu1 }
 0x75b   : > { %1114 = vrot.lane.b32.xlu1 %v2510_v18, %s3495_s13  ;;  %v2614_v20 = vpop.f32.mrb[19].mxu1 }
 0x785   : > { %v1224_v22 = vpop.f32.mrb[20].mxu1 }
 0x786   : > { %v2511_v23 = vpack.c.bf16 %v1224_v22, %v1224_v22  ;;  %v2625_v24 = vpop.f32.mrb[21].mxu1 }
 0x787   : > { %v1227_v25 = vpop.f32.mrb[22].mxu1 }
 0x788   : > { %1234 = vrot.lane.b32.xlu1 %v2511_v23, %s3496_s3  ;;  %v2626_v26 = vpop.f32.mrb[23].mxu1 }
 0x78c   : > { %1462 = vrot.lane.b32.xlu1 %v1460_v27, %s3488_s27 }
 0x78d   : > { %v1344_v28 = vpop.f32.mrb[24].mxu1 }
 0x78e   : > { %v2512_v29 = vpack.c.bf16 %v1344_v28, %v1344_v28  ;;  %v2637_v30 = vpop.f32.mrb[25].mxu1 }
 0x78f   : > { %v1347_v31 = vpop.f32.mrb[26].mxu1 }
 0x790   : > { %1572 = vrot.lane.b32.xlu1 %v1460_v27, %s3489_s21  ;;  %1354 = vrot.lane.b32.xlu0 %v2512_v29, %s3497_s15  ;;  %v2638_v32 = vpop.f32.mrb[27].mxu1 }
 0x794   : > { %1692 = vrot.lane.b32.xlu1 %v1460_v27, %s3490_s12  ;;  %1574 = vrot.lane.b32.xlu0 %v1460_v27, %s3487_s28  ;;  %s3377_s28 = sshll.u32 %s3498_s24, 4  ;;  %s3378_s28 = int_to_ptr.vmem [resolvable:$false] %s3377_s28 }
 0x795   : > { %s3379_s27 = scalar_lea.vmem %s3378_s28, 256  ;;  %p3380_p3 = scmp.lt.s32.totalorder %s4275_s1, %s3378_s28 }
 0x796   : > { %p3381_p5 = scmp.lt.s32.totalorder %s3379_s27, %s3373_s23 }
 0x798   : > { %1811 = vrot.lane.b32.xlu1 %v1460_v27, %s3492_s7  ;;  %1694 = vrot.lane.b32.xlu0 %v1460_v27, %s3491_s6  ;;  %p3382_p7 = por %p3381_p5, %p3380_p3 }
 0x79a   : > { %p3383_p8 = pnand %p3382_p7, %p3376_p13 }
 0x79c   : > { %1813 = vrot.lane.b32.xlu0 %v1460_v27, %s3493_s18 }
 0x7cd   : > { %v1115_v37 = vpop.permute.xlu1 %1114 }
 0x7ce   : > { %1118 = vst.msk [vmem:[#allocation2] sm:$0xf] %vm1117_vm7, %v1115_v37 }
 0x7fa   : > { %v1235_v34 = vpop.permute.xlu1 %1234 }
 0x7fb   : > { %1238 = vst.msk [vmem:[#allocation2] sm:$0xf] %vm1237_vm8, %v1235_v34 }
 0x7fe   : > { %v1463_v38 = vpop.permute.xlu1 %1462 }
 0x7ff   : > { %v1468_v40 = vsel %vm884_vm2, %v1463_v38, 0 }
 0x802   : > { %v1355_v36 = vpop.permute.xlu0 %1354  ;;  %v1573_v44 = vpop.permute.xlu1 %1572 }
 0x803   : > { %1358 = vst.msk [vmem:[#allocation2] sm:$0xf] %vm1357_vm9, %v1355_v36 }
 0x806   : > { %v1575_v41 = vpop.permute.xlu0 %1574  ;;  %v1693_v47 = vpop.permute.xlu1 %1692 }
 0x807   : > { %v1580_v42 = vsel %vm884_vm2, %v1575_v41, 0 }
 0x80a   : > { %v1359_v39 = vld [vmem:[#allocation2] sm:$0xf]  ;;  %v1695_v43 = vpop.permute.xlu0 %1694  ;;  %v1812_v49 = vpop.permute.xlu1 %1811 }
 0x80b   : > { %2644 = vmatmul.mubr.msk.bf16.vlgmr.msra.gmra.mrb[12].mxu0 %vm723_vm0, %v1359_v39  ;;  %v1700_v45 = vsel %vm884_vm2, %v1695_v43, 0 }
 0x80c   : > { %2656 = vmatpush3.bf16.xpose.msra.mxu0 %v1468_v40  ;;  %2657 = vmatprep.mubr.msk.bf16.mxu0 %vm3486_vm1, %v3485_v15 }
 0x80d   : > { %2667 = vmatprep.subr.bf16.mxu0 %v3485_v15 }
 0x80e   : > { %v1814_v46 = vpop.permute.xlu0 %1813 }
 0x80f   : > { %v1819_v48 = vsel %vm884_vm2, %v1814_v46, 0 }
 0x813   : > { %2658 = vmatmul.mubr.msk.bf16.vlgmr.msra.gmra.mrb[16].mxu0 %vm884_vm2, %v1460_v27 }
 0x814   : > { %2668 = vmatpush3.bf16.xpose.msra.mxu0 %v1580_v42  ;;  %2669 = vmatprep.mubr.msk.bf16.mxu0 %vm3486_vm1, %v3485_v15 }
 0x815   : > { %2679 = vmatprep.subr.bf16.mxu0 %v3485_v15 }
 0x81b   : > { %2670 = vmatmul.mubr.msk.bf16.vlgmr.msra.gmra.mrb[20].mxu0 %vm884_vm2, %v1573_v44 }
 0x81c   : > { %2680 = vmatpush3.bf16.xpose.msra.mxu0 %v1700_v45  ;;  %2681 = vmatprep.mubr.msk.bf16.mxu0 %vm3486_vm1, %v3485_v15 }
 0x81d   : > { %2691 = vmatprep.subr.bf16.mxu0 %v3485_v15 }
 0x823   : > { %2682 = vmatmul.mubr.msk.bf16.vlgmr.msra.gmra.mrb[24].mxu0 %vm884_vm2, %v1693_v47 }
 0x824   : > { %2692 = vmatpush3.bf16.xpose.msra.mxu0 %v1819_v48  ;;  %2693 = vmatprep.mubr.msk.bf16.mxu0 %vm3486_vm1, %v3485_v15 }
 0x825   : > { %2703 = vmatprep.subr.bf16.mxu0 %v3485_v15 }
 0x82b   : > { %2694 = vmatmul.mubr.msk.bf16.vlgmr.msra.gmra.mrb[28].mxu0 %vm884_vm2, %v1812_v49 }
 0x82c   : > { %2704 = vmatpush3.bf16.msra.mxu0 %v4149_v21  ;;  %2707 = vmatprep.mubr.msk.bf16.mxu0 %vm3486_vm1, %v3485_v15 }
 0x82d   : > { %2705 = vmatprep.subr.bf16.mxu0 %v3485_v15 }
 0x830   : > { %2706 = vmatpush3.bf16.msra.mxu0 %v4153_v35 }
 0x831   : > { %2719 = vmatprep.subr.bf16.mxu0 %v3485_v15 }
 0x8de   : > { %v1409_v50 = vpop.f32.mrb[12].mxu0 }
 0x8df   : > { %v1415_v52 = vadd.f32 %v1409_v50, %v4032_v1  ;;  %v2645_v53 = vpop.f32.mrb[13].mxu0 }
 0x8e0   : > { %v1412_v54 = vpop.f32.mrb[14].mxu0 }
 0x8e1   : > { %v1416_v55 = vpack.c.bf16 %v1415_v52, %v1415_v52  ;;  %v2646_v56 = vpop.f32.mrb[15].mxu0 }
 0x8e3   : > { %2652 = vmatmul.mubr.msk.bf16.vlgmr.msra.gmra.mrb[28].mxu1 %vm723_vm0, %v1416_v55 }
 0x8e4   : > { %2663 = vmatprep.mubr.msk.bf16.mxu1 %vm3486_vm1, %v3485_v15 }
 0x8e6   : > { %v1504_v57 = vpop.f32.mrb[16].mxu0 }
 0x8e7   : > { %v1510_v58 = vsel %vm4099_vm5, -35355340.0, %v1504_v57  ;;  %v2659_v59 = vpop.f32.mrb[17].mxu0 }
 0x8e8   : > { %v1507_v60 = vpop.f32.mrb[18].mxu0  ;;  %v1511_v51 = vsel %vm884_vm2, %v1510_v58, -inf }
 0x8e9   : > { %1512 = vmax.xlane.f32.xlu0 %v1511_v51  ;;  %v2660_v61 = vpop.f32.mrb[19].mxu0 }
 0x8ee   : > { %v1616_v1 = vpop.f32.mrb[20].mxu0 }
 0x8ef   : > { %v1622_v62 = vsel %vm4099_vm5, -35355340.0, %v1616_v1  ;;  %v2671_v2 = vpop.f32.mrb[21].mxu0 }
 0x8f0   : > { %v1619_v3 = vpop.f32.mrb[22].mxu0  ;;  %v1623_v4 = vsel %vm884_vm2, %v1622_v62, -inf }
 0x8f1   : > { %1624 = vmax.xlane.f32.xlu1 %v1623_v4  ;;  %v2672_v5 = vpop.f32.mrb[23].mxu0 }
 0x8f6   : > { %v1736_v6 = vpop.f32.mrb[24].mxu0 }
 0x8f7   : > { %v1742_v7 = vsel %vm4099_vm5, -35355340.0, %v1736_v6  ;;  %v2683_v8 = vpop.f32.mrb[25].mxu0 }
 0x8f8   : > { %v1739_v9 = vpop.f32.mrb[26].mxu0  ;;  %v1743_v10 = vsel %vm884_vm2, %v1742_v7, -inf }
 0x8f9   : > { %1744 = vmax.xlane.f32.xlu0 %v1743_v10  ;;  %v2684_v11 = vpop.f32.mrb[27].mxu0 }
 0x8fe   : > { %v1855_v12 = vpop.f32.mrb[28].mxu0 }
 0x8ff   : > { %v1861_v13 = vsel %vm4099_vm5, -35355340.0, %v1855_v12  ;;  %v2695_v14 = vpop.f32.mrb[29].mxu0 }
 0x900   : > { %v1858_v16 = vpop.f32.mrb[30].mxu0  ;;  %v1862_v17 = vsel %vm884_vm2, %v1861_v13, -inf }
 0x901   : > { %1863 = vmax.xlane.f32.xlu0 %v1862_v17  ;;  %v2696_v18 = vpop.f32.mrb[31].mxu0 }
 0x976   : > { %v1513_v33 = vpop.xlane.xlu0 %1512 }
 0x977   : > { %v1514_v19 = vsub.f32 %v1510_v58, %v1513_v33 }
 0x979   : > { %v1515_v20 = vmul.f32 1.442695, %v1514_v19 }
 0x97b   : > { %2957 = vpow2.f32 %v1515_v20 }
 0x97e   : > { %v1625_v21 = vpop.xlane.xlu1 %1624 }
 0x97f   : > { %v1626_v35 = vsub.f32 %v1622_v62, %v1625_v21 }
 0x981   : > { %v1627_v22 = vmul.f32 1.442695, %v1626_v35 }
 0x983   : > { %2959 = vpow2.f32 %v1627_v22 }
 0x985   : > { %v2958_v23 = vpop.eup %2957 }
 0x986   : > { %v1745_v24 = vpop.xlane.xlu0 %1744  ;;  %v1517_v25 = vsel %vm884_vm2, %v2958_v23, 0.0 }
 0x987   : > { %v1746_v63 = vsub.f32 %v1742_v7, %v1745_v24  ;;  %1518 = vadd.xlane.f32.xlu0 %v1517_v25 }
 0x989   : > { %v1747_v26 = vmul.f32 1.442695, %v1746_v63 }
 0x98b   : > { %2961 = vpow2.f32 %v1747_v26 }
 0x98d   : > { %v2960_v27 = vpop.eup %2959 }
 0x98e   : > { %v1864_v28 = vpop.xlane.xlu0 %1863  ;;  %v1629_v29 = vsel %vm884_vm2, %v2960_v27, 0.0 }
 0x98f   : > { %v1865_v30 = vsub.f32 %v1861_v13, %v1864_v28  ;;  %1630 = vadd.xlane.f32.xlu1 %v1629_v29 }
 0x991   : > { %v1866_v31 = vmul.f32 1.442695, %v1865_v30 }
 0x993   : > { %2963 = vpow2.f32 %v1866_v31 }
 0x995   : > { %v2962_v32 = vpop.eup %2961 }
 0x996   : > { %v1749_v37 = vsel %vm884_vm2, %v2962_v32, 0.0 }
 0x997   : > { %1750 = vadd.xlane.f32.xlu0 %v1749_v37 }
 0x99d   : > { %v2964_v34 = vpop.eup %2963 }
 0x99e   : > { %v1868_v36 = vsel %vm884_vm2, %v2964_v34, 0.0 }
 0x99f   : > { %1869 = vadd.xlane.f32.xlu1 %v1868_v36 }
 0x9b6   : > { %v1454_v38 = vpop.f32.mrb[28].mxu1 }
 0x9b7   : > { %v1523_v39 = vpack.c.bf16 %v1454_v38, %v1454_v38  ;;  %v2653_v40 = vpop.f32.mrb[29].mxu1 }
 0x9b8   : > { %v1457_v41 = vpop.f32.mrb[30].mxu1  ;;  %v2928_v40 = vld [vmem:[#allocation20 + $0x8] sm:$0xff]  }
 0x9b9   : > { %1755 = vrot.lane.b32.xlu1 %v1523_v39, %s3490_s12  ;;  %1636 = vrot.lane.b32.xlu0 %v1523_v39, %s3489_s21  ;;  %v2654_v42 = vpop.f32.mrb[31].mxu1  ;;  %v1528_v43 = vsel %vm951_vm3, %v1523_v39, 0  ;;  %v2930_v41 = vld [vmem:[#allocation23 + $0x8] sm:$0xff]  }
 0x9ba   : > { %2662 = vmatpush3.bf16.msra.mxu1 %v1528_v43  ;;  %v2931_v42 = vld [vmem:[#allocation23 + $0x10] sm:$0xff]   ;;  %v2932_v43 = vld [vmem:[#allocation23 + $0x18] sm:$0xff]  }
 0x9bb   : > { %2673 = vmatprep.subr.bf16.mxu1 %v3485_v15 }
 0x9bd   : > { %1874 = vrot.lane.b32.xlu1 %v1523_v39, %s3492_s7  ;;  %v2927_v39 = vld [vmem:[#allocation20] sm:$0xff]  }
 0xa14   : > { %v1519_v44 = vpop.xlane.xlu0 %1518 }
 0xa15   : > { %2965 = vrcp.f32 %v1519_v44  ;;  %v2933_v44 = vld [vmem:[#allocation23 + $0x20] sm:$0xff]  }
 0xa1c   : > { %v1631_v45 = vpop.xlane.xlu1 %1630 }
 0xa1d   : > { %2967 = vrcp.f32 %v1631_v45  ;;  %v2934_v45 = vld [vmem:[#allocation23 + $0x28] sm:$0xff]  }
 0xa1f   : > { %v2966_v46 = vpop.eup %2965 }
 0xa20   : > { %v1521_v47 = vmul.f32 %v2966_v46, %v2958_v23 }
 0xa22   : > { %v1522_v48 = vpack.c.bf16 %v1521_v47, %v1521_v47 }
 0xa24   : > { %v1751_v49 = vpop.xlane.xlu0 %1750  ;;  %2664 = vmatmul.mubr.msk.bf16.vlgmr.msra.gmra.mrb[32].mxu1 %vm884_vm2, %v1522_v48 }
 0xa25   : > { %2969 = vrcp.f32 %v1751_v49  ;;  %2675 = vmatprep.mubr.msk.bf16.mxu1 %vm3486_vm1, %v3485_v15 }
 0xa27   : > { %v2968_v50 = vpop.eup %2967 }
 0xa28   : > { %v1633_v52 = vmul.f32 %v2968_v50, %v2960_v27  ;;  %v2491_v50 = vld [vmem:[#allocation17] ss:$0 sm:$0xff] }
 0xa2a   : > { %v1634_v56 = vpack.c.bf16 %v1633_v52, %v1633_v52 }
 0xa2b   : > { %v1637_v53 = vpop.permute.xlu0 %1636 }
 0xa2c   : > { %v1642_v54 = vsel %vm951_vm3, %v1637_v53, 0  ;;  %v1870_v55 = vpop.xlane.xlu1 %1869  ;;  %v2492_v53 = vld [vmem:[#allocation18] ss:$0 sm:$0xff] }
 0xa2d   : > { %2971 = vrcp.f32 %v1870_v55  ;;  %2674 = vmatpush3.bf16.msra.mxu1 %v1642_v54 }
 0xa2e   : > { %2685 = vmatprep.subr.bf16.mxu1 %v3485_v15 }
 0xa2f   : > { %v2970_v57 = vpop.eup %2969 }
 0xa30   : > { %v1756_v58 = vpop.permute.xlu1 %1755  ;;  %2676 = vmatmul.mubr.msk.bf16.vlgmr.msra.gmra.mrb[36].mxu1 %vm884_vm2, %v1634_v56  ;;  %v1753_v60 = vmul.f32 %v2970_v57, %v2962_v32  ;;  %v2935_v57 = vld [vmem:[#allocation23 + $0x30] sm:$0xff]  }
 0xa31   : > { %v1761_v59 = vsel %vm951_vm3, %v1756_v58, 0  ;;  %2687 = vmatprep.mubr.msk.bf16.mxu1 %vm3486_vm1, %v3485_v15  ;;  %v2936_v58 = vld [vmem:[#allocation23 + $0x38] sm:$0xff]  }
 0xa32   : > { %2686 = vmatpush3.bf16.msra.mxu1 %v1761_v59  ;;  %v1754_v61 = vpack.c.bf16 %v1753_v60, %v1753_v60  ;;  %v2493_v59 = vld [vmem:[#allocation21] ss:$0 sm:$0xff] }
 0xa33   : > { %2697 = vmatprep.subr.bf16.mxu1 %v3485_v15 }
 0xa34   : > { %v1875_v51 = vpop.permute.xlu1 %1874 }
 0xa35   : > { %v1880_v62 = vsel %vm951_vm3, %v1875_v51, 0 }
 0xa37   : > { %v2972_v1 = vpop.eup %2971 }
 0xa38   : > { %2688 = vmatmul.mubr.msk.bf16.vlgmr.msra.gmra.mrb[40].mxu1 %vm884_vm2, %v1754_v61  ;;  %v1872_v2 = vmul.f32 %v2972_v1, %v2964_v34 }
 0xa39   : > { %2698 = vmatpush3.bf16.msra.mxu1 %v1880_v62  ;;  %2699 = vmatprep.mubr.msk.bf16.mxu1 %vm3486_vm1, %v3485_v15 }
 0xa3a   : > { %2711 = vmatprep.subr.bf16.mxu1 %v3485_v15  ;;  %v1873_v3 = vpack.c.bf16 %v1872_v2, %v1872_v2 }
 0xa40   : > { %2700 = vmatmul.mubr.msk.bf16.vlgmr.msra.gmra.mrb[44].mxu1 %vm884_vm2, %v1873_v3 }
 0xa41   : > { %2715 = vmatprep.mubr.msk.bf16.mxu1 %vm3486_vm1, %v3485_v15  ;;  %2712 = vmatpush3.bf16.msra.mxu1 %v2927_v39 }
 0xa42   : > { %2713 = vmatprep.subr.bf16.mxu1 %v3485_v15 }
 0xa45   : > { %2714 = vmatpush3.bf16.msra.mxu1 %v2928_v40 }
 0xaf7   : > { %v1564_v4 = vpop.f32.mrb[32].mxu1 }
 0xaf8   : > { %v1570_v5 = vpack.c.bf16 %v1564_v4, %v1564_v4  ;;  %v2665_v6 = vpop.f32.mrb[33].mxu1 }
 0xaf9   : > { %v1567_v7 = vpop.f32.mrb[34].mxu1 }
 0xafa   : > { %1571 = vst.msk [vmem:[#allocation2] sm:$0xf] %vm996_vm6, %v1570_v5  ;;  %v2666_v8 = vpop.f32.mrb[35].mxu1  ;;  %v2497_v5 = vld [vmem:[#allocation24] ss:$0 sm:$0xff] }
 0xb03   : > { %v1678_v9 = vpop.f32.mrb[36].mxu1 }
 0xb04   : > { %v2513_v10 = vpack.c.bf16 %v1678_v9, %v1678_v9  ;;  %v2677_v11 = vpop.f32.mrb[37].mxu1 }
 0xb05   : > { %v1681_v12 = vpop.f32.mrb[38].mxu1 }
 0xb06   : > { %1688 = vrot.lane.b32.xlu1 %v2513_v10, %s3495_s13  ;;  %v2678_v13 = vpop.f32.mrb[39].mxu1 }
 0xb0b   : > { %v1797_v14 = vpop.f32.mrb[40].mxu1 }
 0xb0c   : > { %v2514_v16 = vpack.c.bf16 %v1797_v14, %v1797_v14  ;;  %v2689_v17 = vpop.f32.mrb[41].mxu1 }
 0xb0d   : > { %v1800_v18 = vpop.f32.mrb[42].mxu1 }
 0xb0e   : > { %1807 = vrot.lane.b32.xlu0 %v2514_v16, %s3496_s3  ;;  %v2690_v33 = vpop.f32.mrb[43].mxu1 }
 0xb13   : > { %v1916_v19 = vpop.f32.mrb[44].mxu1 }
 0xb14   : > { %v2515_v20 = vpack.c.bf16 %v1916_v19, %v1916_v19  ;;  %v2701_v21 = vpop.f32.mrb[45].mxu1 }
 0xb15   : > { %v1919_v35 = vpop.f32.mrb[46].mxu1 }
 0xb16   : > { %1926 = vrot.lane.b32.xlu1 %v2515_v20, %s3497_s15  ;;  %v2702_v22 = vpop.f32.mrb[47].mxu1 }
 0xb78   : > { %v1689_v23 = vpop.permute.xlu1 %1688 }
 0xb79   : > { %1691 = vst.msk [vmem:[#allocation2] sm:$0xf] %vm1117_vm7, %v1689_v23 }
 0xb80   : > { %v1808_v24 = vpop.permute.xlu0 %1807 }
 0xb81   : > { %1810 = vst.msk [vmem:[#allocation2] sm:$0xf] %vm1237_vm8, %v1808_v24 }
 0xb88   : > { %v1927_v25 = vpop.permute.xlu1 %1926 }
 0xb89   : > { %1929 = vst.msk [vmem:[#allocation2] sm:$0xf] %vm1357_vm9, %v1927_v25 }
 0xb90   : > { %v1930_v63 = vld [vmem:[#allocation2] sm:$0xf] }
 0xb91   : > { %2708 = vmatmul.mubr.msk.bf16.vlgmr.msra.gmra.mrb[32].mxu0 %vm723_vm0, %v1930_v63 }
 0xb92   : > { %2735 = vmatprep.mubr.msk.bf16.mxu0 %vm3486_vm1, %v3485_v15 }
 0xc64   : > { %v1968_v26 = vpop.f32.mrb[32].mxu0 }
 0xc65   : > { %v4252_v27 = vadd.f32 %v1968_v26, %v4030_v0  ;;  %v2709_v28 = vpop.f32.mrb[33].mxu0  ;;  %v2929_v0 = vld [vmem:[#allocation23] sm:$0xff]  }
 0xc66   : > { %v1971_v29 = vpop.f32.mrb[34].mxu0  ;;  %2720 = vmatpush3.bf16.msra.mxu0 %v2929_v0 }
 0xc67   : > { %v2710_v30 = vpop.f32.mrb[35].mxu0  ;;  %v1977_v31 = vsel %vm723_vm0, %v4252_v27, 0.0  ;;  %2721 = vmatprep.subr.bf16.mxu0 %v3485_v15 }
 0xc68   : > { %1978 = vadd.xlane.f32.xlu0 %v1977_v31 }
 0xc6a   : > { %2722 = vmatpush3.bf16.msra.mxu0 %v2930_v41 }
 0xc6b   : > { %2723 = vmatprep.subr.bf16.mxu0 %v3485_v15 }
 0xc6e   : > { %2724 = vmatpush3.bf16.msra.mxu0 %v2931_v42 }
 0xc6f   : > { %2725 = vmatprep.subr.bf16.mxu0 %v3485_v15 }
 0xc72   : > { %2726 = vmatpush3.bf16.msra.mxu0 %v2932_v43 }
 0xc73   : > { %2727 = vmatprep.subr.bf16.mxu0 %v3485_v15 }
 0xc76   : > { %2728 = vmatpush3.bf16.msra.mxu0 %v2933_v44 }
 0xc77   : > { %2729 = vmatprep.subr.bf16.mxu0 %v3485_v15 }
 0xc7a   : > { %2730 = vmatpush3.bf16.msra.mxu0 %v2934_v45 }
 0xc7b   : > { %2731 = vmatprep.subr.bf16.mxu0 %v3485_v15 }
 0xc7e   : > { %2732 = vmatpush3.bf16.msra.mxu0 %v2935_v57 }
 0xc7f   : > { %2733 = vmatprep.subr.bf16.mxu0 %v3485_v15 }
 0xc82   : > { %2734 = vmatpush3.bf16.msra.mxu0 %v2936_v58 }
 0xcf5   : > { %v1979_v32 = vpop.xlane.xlu0 %1978 }
 0xcf6   : > { %v1980_v37 = vmul.f32 0.03125, %v1979_v32 }
 0xcf8   : > { %v1981_v34 = vsub.f32 %v4252_v27, %v1980_v37 }
 0xcfa   : > { %v1982_v36 = vmul.f32 %v1981_v34, %v1981_v34 }
 0xcfc   : > { %v1983_v38 = vsel %vm723_vm0, %v1982_v36, 0.0 }
 0xcfd   : > { %1984 = vadd.xlane.f32.xlu1 %v1983_v38 }
 0xd8a   : > { %v1985_v46 = vpop.xlane.xlu1 %1984 }
 0xd8b   : > { %v1986_v47 = vmul.f32 0.03125, %v1985_v46 }
 0xd8d   : > { %v1987_v48 = vadd.f32 1e-05, %v1986_v47 }
 0xd8f   : > { %2973 = vrsqrt.f32 %v1987_v48 }
 0xd99   : > { %v2974_v49 = vpop.eup %2973 }
 0xd9a   : > { %v1989_v52 = vmul.f32 %v2974_v49, %v1981_v34 }
 0xd9c   : > { %v1996_v54 = vmul.f32 %v2491_v50, %v1989_v52 }
 0xd9e   : > { %v2003_v55 = vadd.f32 %v2492_v53, %v1996_v54 }
 0xda0   : > { %v2004_v56 = vpack.c.bf16 %v2003_v55, %v2003_v55 }
 0xda2   : > { %2716 = vmatmul.mubr.msk.bf16.vlgmr.msra.gmra.mrb[48].mxu1 %vm723_vm0, %v2004_v56 }
 0xe75   : > { %v2065_v60 = vpop.f32.mrb[48].mxu1 }
 0xe76   : > { %v2066_v51 = vadd.f32 %v2493_v59, %v2065_v60  ;;  %v2717_v61 = vpop.f32.mrb[49].mxu1 }
 0xe77   : > { %v2068_v1 = vpop.f32.mrb[50].mxu1 }
 0xe78   : > { %vm2071_vm10 = vcmp.ge.f32.partialorder %v2066_v51, 0.0  ;;  %v2072_v62 = vmul.f32 0.01, %v2066_v51  ;;  %v2718_v2 = vpop.f32.mrb[51].mxu1 }
 0xe7a   : > { %v2073_v3 = vsel %vm2071_vm10, %v2066_v51, %v2072_v62 }
 0xe7b   : > { %v2074_v4 = vpack.c.bf16 %v2073_v3, %v2073_v3 }
 0xe7d   : > { %2736 = vmatmul.mubr.bf16.vlgmr.msra.gmra.mrb[36].mxu0 %v2074_v4 }
 0xf50   : > { %v2180_v6 = vpop.f32.mrb[36].mxu0 }
 0xf51   : > { %v2181_v15 = vadd.f32 %v2497_v5, %v2180_v6  ;;  %v2737_v7 = vpop.f32.mrb[37].mxu0 }
 0xf52   : > { %v2183_v8 = vpop.f32.mrb[38].mxu0 }
 0xf53   : > { %v2186_v9 = vadd.f32 %v2181_v15, %v4252_v27  ;;  %v2738_v10 = vpop.f32.mrb[39].mxu0 }
 0xf55   : > { %2187 = vst.msk [vmem:[%s701_s26] sm:$0xff] %vm723_vm0, %v2186_v9 }
 0xf56   : > { %3386 = shalt.err (!%p3383_p8)
}
 0xf57   : > { %s3387_s9 = scalar_lea.hbm %s4273_s11, 128  ;;  %s3391_s6 = scalar_lea.hbm %s4427_s14, 256 }
 0xf58   : > { %p3388_p6 = scmp.ne.s32.totalorder %s4273_s11, %s3387_s9  ;;  %p3392_p12 = scmp.lt.u32.totalorder %s4273_s11, %s4427_s14 }
 0xf59   : > { %p3393_p10 = scmp.lt.u32.totalorder %s3391_s6, %s3387_s9  ;;  %p3395_p2 = scmp.lt.u32.totalorder %s3387_s9, %s4273_s11 }
 0xf5a   : > { %p3389_p0 = pnand %p3388_p6, %p4428_p1 }
 0xf5b   : > { %p3394_p11 = por %p3393_p10, %p3392_p12 }
 0xf5c   : > { %p3390_p9 = pneg %p3389_p0 }
 0xf5d   : > { %p3396_p4 = por %p3395_p2, %p3394_p11 }
 0xf5f   : > { %p3397_p13 = pnand %p3396_p4, %p3390_p9 }
 0xf61   : > { %3400 = shalt.err (!%p3397_p13)
}
 0xf62   : > { %2789 = dma.vmem_to_hbm [thread:$0]  (%p4428_p1), %s4275_s1, 128, %s4273_s11, %s2189_s19  }
 0xf63 PF: > { %s2214_s13 = sand.u32 1, %s3455_s29   ;;  %p4429_p3 = scmp.ne.s32.totalorder %s4389_s0, 0 }
 0xf64   : > { %p4430_p5 = scmp.ge.s32.totalorder %s3467_s16, 2  ;;  %s2215_s3 = scalar_lea.sflag [#allocation5], %s2214_s13 }
 0xf66   : > { %p2836_p7 = pnand %p4430_p5, %p4429_p3 }
 0xf68   : > { %3450 = dma.done.wait (!%p2836_p7), %s2215_s3, 128  }
 0xf69   : > { %3452 = vsyncadd (!%p2836_p7), %s2215_s3, 4294967168  ;;  %s4431_s16 = sld [smem:[#allocation38_spill]]  ;;  %s4432_s15 = sld [smem:[#allocation36_spill]] }
 0xf6a   : > { %s4433_s20 = sld [smem:[#allocation39_spill]]  ;;  %s4434_s29 = smov %s3459_s30 }
 0xf6f   : > { %p36_p8 = scmp.ge.s32.totalorder %s4431_s16, 4   ;;  %s4435_s30 = smov %s4432_s15 }
 0xf70   : > { %s4436_s15 = smov %s4433_s20 }
 0xf71   :  { %38 = sbr.rel (!%p36_p8) target bundleno = 28 (0x1c), region = 189 }
 0xf78   :  { %2220 = vsyncpa [#allocation4], 1 }
 0xf79   :  { %2222 = vsyncpa [#allocation4 + $0x1], 1 }
 0xf7a   :  { %2223 = vsyncpa [#allocation7], 1 }
 0xf7b   :  { %2225 = vsyncpa [#allocation7 + $0x1], 1 }
 0xf7c   :  { %2226 = vsyncpa [#allocation10], 1 }
 0xf7d   :  { %2227 = vsyncpa [#allocation13], 1 }
 0xf7e   :  { %2228 = vsyncpa [#allocation16], 1 }
 0xf7f   :  { %2229 = vsyncpa [#allocation19], 1 }
 0xf80   :  { %2230 = vsyncpa [#allocation22], 1 }
 0xf81   :  { %2231 = vsyncpa [#allocation25], 1 }
 0xf82   :  { %2232 = vsyncpa [#allocation5], 1 }
 0xf83   :  { %2234 = vsyncpa [#allocation5 + $0x1], 1 }

</bundles_post_ra>
